<compile_context>
chip_gen: v6e
topology: v6e:2x2x1
jax: 0.10.0
libtpu: 0.0.40
codegen_flags: <defaults>
</compile_context>

<pallas_src>
import functools

import numpy as np
import jax
import jax.numpy as jnp
from jax import lax
from jax.experimental import pallas as pl
from jax.experimental.pallas import tpu as pltpu

FRE_DIM = 3  # self.fre_dim = 3


# ----------------------------------------------------------------------------
# Static (numpy) helper matrices
# ----------------------------------------------------------------------------
def _adaptive_pool_matrix(out_size, in_size):
    """Row-stochastic matrix implementing torch adaptive_avg_pool1d semantics."""
    P = np.zeros((out_size, in_size), np.float32)
    for i in range(out_size):
        s = (i * in_size) // out_size
        e = -((-(i + 1) * in_size) // out_size)  # ceil((i+1)*in/out)
        P[i, s:e] = 1.0 / (e - s)
    return P


def _pool_gather_mats(H, W, k=3, stride=2, pad=1):
    """S[t, ih*W+iw, oh*Wo+ow] = 1 iff tap t of a kxk stride-s pad-p conv
    reads input (ih, iw) for output (oh, ow). Zero-padding is implicit."""
    Ho = (H + 2 * pad - k) // stride + 1
    Wo = (W + 2 * pad - k) // stride + 1
    S = np.zeros((k * k, H * W, Ho * Wo), np.float32)
    for ky in range(k):
        for kx in range(k):
            t = ky * k + kx
            for oy in range(Ho):
                iy = oy * stride + ky - pad
                if iy < 0 or iy >= H:
                    continue
                for ox in range(Wo):
                    ix = ox * stride + kx - pad
                    if ix < 0 or ix >= W:
                        continue
                    S[t, iy * W + ix, oy * Wo + ox] = 1.0
    return S, Ho, Wo


def _convt_scatter_mats(Hi, Wi, Ho, Wo, k=3, stride=2, pad=1):
    """U[t, iy*Wi+ix, y*Wo+x] = 1 iff tap t of ConvTranspose2d(k, stride, pad,
    output_padding=1) scatters input (iy, ix) to output (y, x)."""
    U = np.zeros((k * k, Hi * Wi, Ho * Wo), np.float32)
    for ky in range(k):
        for kx in range(k):
            t = ky * k + kx
            for iy in range(Hi):
                y = iy * stride + ky - pad
                if y < 0 or y >= Ho:
                    continue
                for ix in range(Wi):
                    xx = ix * stride + kx - pad
                    if xx < 0 or xx >= Wo:
                        continue
                    U[t, iy * Wi + ix, y * Wo + xx] = 1.0
    return U


# ----------------------------------------------------------------------------
# Pallas kernel (one image per grid step, channel-major (C, H*W) layout)
# ----------------------------------------------------------------------------
def lowmixer_kernel(x_ref, ll_ref, r_ref, wgfx_ref, wgfll_ref, bgf_ref,
                    wse1_ref, wse2_ref, wdwe_ref, scat_ref, fold_ref,
                    wqkv_ref, hmask_ref, wup_ref, u_ref, out_ref,
                    *, num_heads):
    f32 = jnp.float32
    bf16 = jnp.bfloat16

    x = x_ref[0]                       # (C, HW)  bf16
    ll = ll_ref[0]                     # (FRE, HWi) bf16
    C, HW = x.shape
    n_taps = u_ref.shape[0]            # 9
    No = u_ref.shape[1]                # pooled token count

    # --- adaptive_avg_pool2d(ll, (H, W)) fused as a single matmul ------------
    ll_up = jnp.dot(ll, r_ref[...], preferred_element_type=f32)        # (FRE, HW)

    # --- gate + low_freq_fuse (1x1 convs over concat([x, ll]); weights split
    #     so the channel concat is never materialized) ------------------------
    gf = (jnp.dot(wgfx_ref[...], x, preferred_element_type=f32)
          + jnp.dot(wgfll_ref[...], ll_up.astype(bf16), preferred_element_type=f32)
          + bgf_ref[...])                                              # (2C, HW)
    gate = jax.nn.sigmoid(gf[:C])
    x_low = gf[C:] * gate                                              # (C, HW) f32

    # --- SEBlock (tiny; kept as f32 VPU reduces / FMAs, no MXU) --------------
    y = jnp.mean(x_low, axis=1, keepdims=True)                         # (C, 1)
    hid = jnp.maximum(
        jnp.sum(wse1_ref[...] * y, axis=0, keepdims=True), 0.0)        # (1, C//r)
    se = jax.nn.sigmoid(
        jnp.sum(wse2_ref[...] * hid, axis=1, keepdims=True))           # (C, 1)
    x_se = x_low * se                                                  # (C, HW)

    # --- pool: depthwise 3x3 s2 p1 = ONE wide gather matmul + VPU tap weights
    #     + ONE 0/1 fold matmul (replaces 9 narrow tap matmuls) ---------------
    taps = jnp.dot(x_se.astype(bf16), scat_ref[...],
                   preferred_element_type=f32)                         # (C, 9*No)
    weighted = taps * wdwe_ref[...]                                    # (C, 9*No)
    pooled = jnp.dot(weighted.astype(bf16), fold_ref[...],
                     preferred_element_type=f32)                       # (C, No)

    # --- qkv (qkv_bias=False); attention scale pre-folded into q rows --------
    qkv = jnp.dot(wqkv_ref[...], pooled.astype(bf16),
                  preferred_element_type=f32)                          # (3C, No)
    q_t = qkv[0:C].T                                                   # (No, C)
    k_cm = qkv[C:2 * C]                                                # (C, No)
    v_t = qkv[2 * C:3 * C].T                                           # (No, C)

    # --- batched multi-head attention: single masked QK^T matmul, single
    #     softmax pass, single PV matmul (no per-head 4-row slices / concat) --
    hmask = hmask_ref[...]                                             # (h*No, C) 0/1
    q_rep = jnp.concatenate([q_t] * num_heads, axis=0)                 # (h*No, C)
    s_big = jnp.dot((q_rep * hmask).astype(bf16), k_cm.astype(bf16),
                    preferred_element_type=f32)                        # (h*No, No)
    s_big = s_big - jnp.max(s_big, axis=-1, keepdims=True)
    e = jnp.exp(s_big)
    p = e * pl.reciprocal(jnp.sum(e, axis=-1, keepdims=True), approx=True)
    out_big = jnp.dot(p.astype(bf16), v_t.astype(bf16),
                      preferred_element_type=f32)                      # (h*No, C)
    # Per-head selection via sublane-aligned 64-row blocks + 0/1 column masks.
    out_t = jnp.zeros((No, C), f32)
    for h in range(num_heads):
        out_t = out_t + (out_big[h * No:(h + 1) * No, :]
                         * hmask[h * No:h * No + 1, :])
    xa = out_t.T                                                       # (C, No)

    # --- uppool: ConvTranspose2d(C, C, 3, s=2, p=1, op=1) --------------------
    # one stacked (9C,C)@(C,No) channel mix + 9 lane-dense scatter matmuls
    mix = jnp.dot(wup_ref[...], xa.astype(bf16),
                  preferred_element_type=f32)                          # (9C, No)
    mix_bf = mix.astype(bf16)
    out = jnp.zeros((C, HW), f32)
    for t in range(n_taps):
        out = out + jnp.dot(mix_bf[t * C:(t + 1) * C], u_ref[t],
                            preferred_element_type=f32)                # (C, HW)
    out_ref[0] = out


# ----------------------------------------------------------------------------
# Wrapper
# ----------------------------------------------------------------------------
def _full_spec(a):
    zeros = (0,) * a.ndim
    return pl.BlockSpec(a.shape, lambda b: zeros)


def low_mixer_forward(params, x, ll, *, num_heads=8):
    """x: (B, dim, H, W) NCHW; ll: (B, 3, Hi, Wi) low-frequency band. NCHW out."""
    B, C, H, W = x.shape
    Hi, Wi = ll.shape[2], ll.shape[3]
    HW = H * W
    hd = C // num_heads
    scale = float(hd) ** -0.5

    # Static resample / gather / scatter matrices (tiny, built once).
    Ph = _adaptive_pool_matrix(H, Hi)
    Pw = _adaptive_pool_matrix(W, Wi)
    R = np.einsum('yi,xj->ijyx', Ph, Pw).reshape(Hi * Wi, HW).astype(np.float32)
    S, Ho, Wo = _pool_gather_mats(H, W)
    No = Ho * Wo
    U = _convt_scatter_mats(Ho, Wo, H, W)

    # Pool-tap fusion: 9 gather taps concatenated along the output axis and a
    # 0/1 fold matrix that sums them back -> 2 well-shaped MXU ops in-kernel.
    S_cat = np.transpose(S, (1, 0, 2)).reshape(HW, 9 * No)            # (HW, 9*No)
    Fold = np.tile(np.eye(No, dtype=np.float32), (9, 1))              # (9*No, No)

    # Head block mask (0/1): row h*No+n selects the channels of head h.
    hmask = np.zeros((num_heads * No, C), np.float32)
    for h in range(num_heads):
        hmask[h * No:(h + 1) * No, h * hd:(h + 1) * hd] = 1.0

    # Weight prep: PyTorch conv/linear layouts -> channel-major matmul layouts.
    wg = params['gate_w'][:, :, 0, 0]                       # (C, C+3)
    wf = params['fuse_w'][:, :, 0, 0]                       # (C, C+3)
    wgf_x = jnp.concatenate([wg[:, :C], wf[:, :C]], axis=0)      # (2C, C)
    wgf_ll = jnp.concatenate([wg[:, C:], wf[:, C:]], axis=0)     # (2C, 3)
    bgf = jnp.concatenate([params['gate_b'], params['fuse_b']]).reshape(2 * C, 1)
    wse1 = params['se_fc1_w'].T                             # (C, C//r)
    wse2 = params['se_fc2_w']                               # (C, C//r)
    wdw = params['pool_w'].reshape(C, 9)                    # depthwise taps, t = ky*3+kx
    wdw_exp = jnp.repeat(wdw, No, axis=1)                   # (C, 9*No)
    wqkv = params['qkv_w']                                  # (3C, C)
    # scale = hd**-0.5 is a power of two at these shapes -> exact fold into q.
    wqkv_s = jnp.concatenate([wqkv[:C] * scale, wqkv[C:]], axis=0)
    wup_stk = jnp.transpose(params['up_w'], (2, 3, 1, 0)).reshape(9 * C, C)  # (9C, C)

    bf16 = jnp.bfloat16
    f32 = jnp.float32
    # bf16 MXU operands (accumulation stays f32 via preferred_element_type).
    # R/S_cat/Fold/U/hmask are exactly 0/1 at this configuration -> lossless.
    x_flat = x.reshape(B, C, HW).astype(bf16)
    ll_flat = ll.reshape(B, FRE_DIM, Hi * Wi).astype(bf16)
    const_list = [
        jnp.asarray(R, bf16),            # r
        wgf_x.astype(bf16),              # wgfx
        wgf_ll.astype(bf16),             # wgfll
        bgf.astype(f32),                 # bgf
        wse1.astype(f32),                # wse1
        wse2.astype(f32),                # wse2
        wdw_exp.astype(f32),             # wdwe
        jnp.asarray(S_cat, bf16),        # scat
        jnp.asarray(Fold, bf16),         # fold
        wqkv_s.astype(bf16),             # wqkv
        jnp.asarray(hmask, f32),         # hmask
        wup_stk.astype(bf16),            # wup
        jnp.asarray(U, bf16),            # u
    ]

    kernel = functools.partial(lowmixer_kernel, num_heads=num_heads)

    in_specs = [
        pl.BlockSpec((1, C, HW), lambda b: (b, 0, 0)),               # x
        pl.BlockSpec((1, FRE_DIM, Hi * Wi), lambda b: (b, 0, 0)),    # ll
    ] + [_full_spec(a) for a in const_list]
    # TODO(synk): single-buffer the constant operands (pl.Buffered(1) or a
    # one-time scratch preload) at production sizes to avoid doubling their
    # VMEM footprint; left at the known-good default here.

    out_flat = pl.pallas_call(
        kernel,
        out_shape=jax.ShapeDtypeStruct((B, C, HW), jnp.float32),
        grid_spec=pltpu.PrefetchScalarGridSpec(
            num_scalar_prefetch=0,
            grid=(B,),
            in_specs=in_specs,
            out_specs=pl.BlockSpec((1, C, HW), lambda b: (b, 0, 0)),
        ),
        compiler_params=pltpu.CompilerParams(
            dimension_semantics=("parallel",),
            vmem_limit_bytes=32 * 1024 * 1024),
    )(x_flat, ll_flat, *const_list)

    return out_flat.reshape(B, C, H, W)


# ----------------------------------------------------------------------------
# Pure-JAX (non-Pallas) reference mirroring the PyTorch forward (f32)
# ----------------------------------------------------------------------------
def reference_forward(params, x, ll, *, num_heads=8):
    B, C, H, W = x.shape
    hd = C // num_heads
    scale = float(hd) ** -0.5
    Hi, Wi = ll.shape[2], ll.shape[3]

    Ph = jnp.asarray(_adaptive_pool_matrix(H, Hi))
    Pw = jnp.asarray(_adaptive_pool_matrix(W, Wi))
    ll_up = jnp.einsum('yi,bcij,xj->bcyx', Ph, ll, Pw)

    x_low = jnp.concatenate([x, ll_up], axis=1)
    gate = jax.nn.sigmoid(
        jnp.einsum('oc,bchw->bohw', params['gate_w'][:, :, 0, 0], x_low)
        + params['gate_b'][None, :, None, None])
    x_low = (jnp.einsum('oc,bchw->bohw', params['fuse_w'][:, :, 0, 0], x_low)
             + params['fuse_b'][None, :, None, None]) * gate

    # SEBlock
    y = jnp.mean(x_low, axis=(2, 3))
    hid = jax.nn.relu(y @ params['se_fc1_w'].T)
    se = jax.nn.sigmoid(hid @ params['se_fc2_w'].T)
    x_low = x_low * se[:, :, None, None]

    # pool: depthwise 3x3, stride 2, pad 1
    pooled = lax.conv_general_dilated(
        x_low, params['pool_w'], (2, 2), [(1, 1), (1, 1)],
        dimension_numbers=('NCHW', 'OIHW', 'NCHW'), feature_group_count=C)
    _, _, Ho, Wo = pooled.shape
    N = Ho * Wo

    xa = jnp.transpose(pooled.reshape(B, C, N), (0, 2, 1))       # (B, N, C)
    qkv = xa @ params['qkv_w'].T                                 # (B, N, 3C)
    qkv = qkv.reshape(B, N, 3, num_heads, hd).transpose(2, 0, 3, 1, 4)
    q, k, v = qkv[0], qkv[1], qkv[2]                             # (B, h, N, hd)
    attn = jnp.einsum('bhnd,bhmd->bhnm', q, k) * scale
    attn = attn - jnp.max(attn, axis=-1, keepdims=True)
    attn = jax.nn.softmax(attn, axis=-1)
    out = jnp.einsum('bhnm,bhmd->bhnd', attn, v)                 # (B, h, N, hd)
    out = jnp.transpose(out, (0, 1, 3, 2)).reshape(B, C, Ho, Wo)

    # uppool: ConvTranspose2d(C, C, 3, stride=2, padding=1, output_padding=1)
    w_flip = jnp.transpose(jnp.flip(params['up_w'], axis=(2, 3)), (1, 0, 2, 3))
    out = lax.conv_general_dilated(
        out, w_flip, (1, 1), [(1, 2), (1, 2)], lhs_dilation=(2, 2),
        dimension_numbers=('NCHW', 'OIHW', 'NCHW'))
    return out


if __name__ == "__main__":
    B, C, H, W = 2, 32, 16, 16      # dim=32, num_heads=8 -> head_dim=4
    NUM_HEADS = 8
    Hi, Wi = H // 2, W // 2
    key = jax.random.PRNGKey(0)
    ks = jax.random.split(key, 12)

    x = jax.random.normal(ks[0], (B, C, H, W), jnp.float32)
    ll = jax.random.normal(ks[1], (B, FRE_DIM, Hi, Wi), jnp.float32)  # low-freq band

    # Deterministic synthetic parameters (shapes from LowMixer.__init__ / SEBlock).
    params = {
        'gate_w': 0.20 * jax.random.normal(ks[2], (C, C + FRE_DIM, 1, 1), jnp.float32),
        'gate_b': 0.10 * jax.random.normal(ks[3], (C,), jnp.float32),
        'fuse_w': 0.20 * jax.random.normal(ks[4], (C, C + FRE_DIM, 1, 1), jnp.float32),
        'fuse_b': 0.10 * jax.random.normal(ks[5], (C,), jnp.float32),
        'se_fc1_w': 0.30 * jax.random.normal(ks[6], (C // 16, C), jnp.float32),
        'se_fc2_w': 0.30 * jax.random.normal(ks[7], (C, C // 16), jnp.float32),
        'pool_w': 0.25 * jax.random.normal(ks[8], (C, 1, 3, 3), jnp.float32),
        'qkv_w': 0.20 * jax.random.normal(ks[9], (3 * C, C), jnp.float32),
        'up_w': 0.15 * jax.random.normal(ks[10], (C, C, 3, 3), jnp.float32),
    }
    # TODO(synk): self.fre_redim = nn.AdaptiveAvgPool2d((None, None)) and
    # attn_drop (p=0.0, eval mode) are no-ops in the PyTorch forward and are
    # intentionally not implemented; qkv_bias defaults to False (no qkv bias).

    # The kernel feeds bf16 operands to the MXU (f32 accumulation).  Round the
    # weights/inputs to bf16-representable f32 once, and hand the SAME values
    # to both kernel and f32 reference, so the comparison isolates kernel bugs
    # from the (intended) operand-dtype policy.  Residual error then comes only
    # from the in-kernel bf16 rounding of intermediate activations.
    def _bf16_round(a):
        return jnp.asarray(a, jnp.bfloat16).astype(jnp.float32)

    x = _bf16_round(x)
    ll = _bf16_round(ll)
    params = {k: _bf16_round(v) for k, v in params.items()}

    out = low_mixer_forward(params, x, ll, num_heads=NUM_HEADS)
    out = jax.block_until_ready(out)

    ref = reference_forward(params, x, ll, num_heads=NUM_HEADS)
    assert out.shape == (B, C, H, W), out.shape
    max_err = float(jnp.max(jnp.abs(out - ref)))
    assert max_err < 1e-2, f"max abs err {max_err}"
    print("KERNEL_OK")
</pallas_src>

<mosaic_0001>
module attributes {stable_mosaic.version = 11 : i64} {
  func.func @lowmixer_kernel(%arg0: i32, %arg1: memref<1x32x256xbf16, #tpu.memory_space<vmem>>, %arg2: memref<1x3x64xbf16, #tpu.memory_space<vmem>>, %arg3: memref<64x256xbf16, #tpu.memory_space<vmem>>, %arg4: memref<64x32xbf16, #tpu.memory_space<vmem>>, %arg5: memref<64x3xbf16, #tpu.memory_space<vmem>>, %arg6: memref<64x1xf32, #tpu.memory_space<vmem>>, %arg7: memref<32x2xf32, #tpu.memory_space<vmem>>, %arg8: memref<32x2xf32, #tpu.memory_space<vmem>>, %arg9: memref<32x576xf32, #tpu.memory_space<vmem>>, %arg10: memref<256x576xbf16, #tpu.memory_space<vmem>>, %arg11: memref<576x64xbf16, #tpu.memory_space<vmem>>, %arg12: memref<96x32xbf16, #tpu.memory_space<vmem>>, %arg13: memref<512x32xf32, #tpu.memory_space<vmem>>, %arg14: memref<288x32xbf16, #tpu.memory_space<vmem>>, %arg15: memref<9x64x256xbf16, #tpu.memory_space<vmem>>, %arg16: memref<1x32x256xf32, #tpu.memory_space<vmem>>) attributes {dimension_semantics = [#tpu.dimension_semantics<parallel>], iteration_bounds = array<i64: 2>, scalar_prefetch = 0 : i64, scratch_operands = 0 : i64, tpu.core_type = #tpu.core_type<tc>, window_params = [{transform_indices = @transform_0, window_bounds = array<i64: 1, 32, 256>}, {transform_indices = @transform_1, window_bounds = array<i64: 1, 3, 64>}, {pipeline_mode = #tpu.pipeline_mode<synchronous>, transform_indices = @transform_2, window_bounds = array<i64: 64, 256>}, {pipeline_mode = #tpu.pipeline_mode<synchronous>, transform_indices = @transform_3, window_bounds = array<i64: 64, 32>}, {pipeline_mode = #tpu.pipeline_mode<synchronous>, transform_indices = @transform_4, window_bounds = array<i64: 64, 3>}, {pipeline_mode = #tpu.pipeline_mode<synchronous>, transform_indices = @transform_5, window_bounds = array<i64: 64, 1>}, {pipeline_mode = #tpu.pipeline_mode<synchronous>, transform_indices = @transform_6, window_bounds = array<i64: 32, 2>}, {pipeline_mode = #tpu.pipeline_mode<synchronous>, transform_indices = @transform_7, window_bounds = array<i64: 32, 2>}, {pipeline_mode = #tpu.pipeline_mode<synchronous>, transform_indices = @transform_8, window_bounds = array<i64: 32, 576>}, {pipeline_mode = #tpu.pipeline_mode<synchronous>, transform_indices = @transform_9, window_bounds = array<i64: 256, 576>}, {pipeline_mode = #tpu.pipeline_mode<synchronous>, transform_indices = @transform_10, window_bounds = array<i64: 576, 64>}, {pipeline_mode = #tpu.pipeline_mode<synchronous>, transform_indices = @transform_11, window_bounds = array<i64: 96, 32>}, {pipeline_mode = #tpu.pipeline_mode<synchronous>, transform_indices = @transform_12, window_bounds = array<i64: 512, 32>}, {pipeline_mode = #tpu.pipeline_mode<synchronous>, transform_indices = @transform_13, window_bounds = array<i64: 288, 32>}, {pipeline_mode = #tpu.pipeline_mode<synchronous>, transform_indices = @transform_14, window_bounds = array<i64: 9, 64, 256>}, {transform_indices = @transform_15, window_bounds = array<i64: 1, 32, 256>}]} {
    %c0 = arith.constant 0 : index
    %c0_0 = arith.constant 0 : index
    %c0_1 = arith.constant 0 : index
    %0 = vector.load %arg1[%c0, %c0_0, %c0_1] : memref<1x32x256xbf16, #tpu.memory_space<vmem>>, vector<1x32x256xbf16>
    %1 = vector.shape_cast %0 : vector<1x32x256xbf16> to vector<32x256xbf16>
    %c0_2 = arith.constant 0 : index
    %c0_3 = arith.constant 0 : index
    %c0_4 = arith.constant 0 : index
    %2 = vector.load %arg2[%c0_2, %c0_3, %c0_4] : memref<1x3x64xbf16, #tpu.memory_space<vmem>>, vector<1x3x64xbf16>
    %3 = vector.shape_cast %2 : vector<1x3x64xbf16> to vector<3x64xbf16>
    %c0_5 = arith.constant 0 : index
    %c0_6 = arith.constant 0 : index
    %4 = vector.load %arg3[%c0_5, %c0_6] : memref<64x256xbf16, #tpu.memory_space<vmem>>, vector<64x256xbf16>
    %cst = arith.constant dense<0.000000e+00> : vector<3x256xf32>
    %5 = tpu.matmul %3, %4, %cst {dimension_numbers = #tpu.dot_dimension_numbers<[1], [0], [0], [1], [0, 0, 1, 1], [], []>} : vector<3x64xbf16>, vector<64x256xbf16>, vector<3x256xf32> -> vector<3x256xf32>
    %c0_7 = arith.constant 0 : index
    %c0_8 = arith.constant 0 : index
    %6 = vector.load %arg4[%c0_7, %c0_8] : memref<64x32xbf16, #tpu.memory_space<vmem>>, vector<64x32xbf16>
    %cst_9 = arith.constant dense<0.000000e+00> : vector<64x256xf32>
    %7 = tpu.matmul %6, %1, %cst_9 {dimension_numbers = #tpu.dot_dimension_numbers<[1], [0], [0], [1], [0, 0, 1, 1], [], []>} : vector<64x32xbf16>, vector<32x256xbf16>, vector<64x256xf32> -> vector<64x256xf32>
    %c0_10 = arith.constant 0 : index
    %c0_11 = arith.constant 0 : index
    %8 = vector.load %arg5[%c0_10, %c0_11] : memref<64x3xbf16, #tpu.memory_space<vmem>>, vector<64x3xbf16>
    %9 = arith.truncf %5 : vector<3x256xf32> to vector<3x256xbf16>
    %cst_12 = arith.constant dense<0.000000e+00> : vector<64x256xf32>
    %10 = tpu.matmul %8, %9, %cst_12 {dimension_numbers = #tpu.dot_dimension_numbers<[1], [0], [0], [1], [0, 0, 1, 1], [], []>} : vector<64x3xbf16>, vector<3x256xbf16>, vector<64x256xf32> -> vector<64x256xf32>
    %11 = arith.addf %7, %10 : vector<64x256xf32>
    %c0_13 = arith.constant 0 : index
    %c0_14 = arith.constant 0 : index
    %12 = vector.load %arg6[%c0_13, %c0_14] : memref<64x1xf32, #tpu.memory_space<vmem>>, vector<64x1xf32>
    %13 = vector.broadcast %12 : vector<64x1xf32> to vector<64x256xf32>
    %14 = arith.addf %11, %13 : vector<64x256xf32>
    %15 = vector.extract_strided_slice %14 {offsets = [0, 0], sizes = [32, 256], strides = [1, 1]} : vector<64x256xf32> to vector<32x256xf32>
    %16 = arith.negf %15 : vector<32x256xf32>
    %17 = math.exp %16 : vector<32x256xf32>
    %cst_15 = arith.constant 1.000000e+00 : f32
    %18 = vector.broadcast %cst_15 : f32 to vector<32x256xf32>
    %19 = arith.addf %18, %17 : vector<32x256xf32>
    %20 = arith.divf %18, %19 : vector<32x256xf32>
    %21 = vector.extract_strided_slice %14 {offsets = [32, 0], sizes = [32, 256], strides = [1, 1]} : vector<64x256xf32> to vector<32x256xf32>
    %22 = arith.mulf %21, %20 : vector<32x256xf32>
    %cst_16 = arith.constant dense<0.000000e+00> : vector<32xf32>
    %23 = vector.multi_reduction <add>, %22, %cst_16 [1] : vector<32x256xf32> to vector<32xf32>
    %24 = vector.shape_cast %23 : vector<32xf32> to vector<32x1xf32>
    %cst_17 = arith.constant 2.560000e+02 : f32
    %25 = vector.broadcast %cst_17 : f32 to vector<32x1xf32>
    %26 = arith.divf %24, %25 : vector<32x1xf32>
    %c0_18 = arith.constant 0 : index
    %c0_19 = arith.constant 0 : index
    %27 = vector.load %arg7[%c0_18, %c0_19] : memref<32x2xf32, #tpu.memory_space<vmem>>, vector<32x2xf32>
    %28 = vector.broadcast %26 : vector<32x1xf32> to vector<32x2xf32>
    %29 = arith.mulf %27, %28 : vector<32x2xf32>
    %cst_20 = arith.constant dense<0.000000e+00> : vector<2xf32>
    %30 = vector.multi_reduction <add>, %29, %cst_20 [0] : vector<32x2xf32> to vector<2xf32>
    %31 = vector.shape_cast %30 : vector<2xf32> to vector<1x2xf32>
    %cst_21 = arith.constant 0.000000e+00 : f32
    %32 = vector.broadcast %cst_21 : f32 to vector<1x2xf32>
    %33 = arith.maximumf %31, %32 : vector<1x2xf32>
    %c0_22 = arith.constant 0 : index
    %c0_23 = arith.constant 0 : index
    %34 = vector.load %arg8[%c0_22, %c0_23] : memref<32x2xf32, #tpu.memory_space<vmem>>, vector<32x2xf32>
    %35 = vector.broadcast %33 : vector<1x2xf32> to vector<32x2xf32>
    %36 = arith.mulf %34, %35 : vector<32x2xf32>
    %cst_24 = arith.constant dense<0.000000e+00> : vector<32xf32>
    %37 = vector.multi_reduction <add>, %36, %cst_24 [1] : vector<32x2xf32> to vector<32xf32>
    %38 = vector.shape_cast %37 : vector<32xf32> to vector<32x1xf32>
    %39 = arith.negf %38 : vector<32x1xf32>
    %40 = math.exp %39 : vector<32x1xf32>
    %cst_25 = arith.constant 1.000000e+00 : f32
    %41 = vector.broadcast %cst_25 : f32 to vector<32x1xf32>
    %42 = arith.addf %41, %40 : vector<32x1xf32>
    %43 = arith.divf %41, %42 : vector<32x1xf32>
    %44 = vector.broadcast %43 : vector<32x1xf32> to vector<32x256xf32>
    %45 = arith.mulf %22, %44 : vector<32x256xf32>
    %46 = arith.truncf %45 : vector<32x256xf32> to vector<32x256xbf16>
    %c0_26 = arith.constant 0 : index
    %c0_27 = arith.constant 0 : index
    %47 = vector.load %arg10[%c0_26, %c0_27] : memref<256x576xbf16, #tpu.memory_space<vmem>>, vector<256x576xbf16>
    %cst_28 = arith.constant dense<0.000000e+00> : vector<32x576xf32>
    %48 = tpu.matmul %46, %47, %cst_28 {dimension_numbers = #tpu.dot_dimension_numbers<[1], [0], [0], [1], [0, 0, 1, 1], [], []>} : vector<32x256xbf16>, vector<256x576xbf16>, vector<32x576xf32> -> vector<32x576xf32>
    %c0_29 = arith.constant 0 : index
    %c0_30 = arith.constant 0 : index
    %49 = vector.load %arg9[%c0_29, %c0_30] : memref<32x576xf32, #tpu.memory_space<vmem>>, vector<32x576xf32>
    %50 = arith.mulf %48, %49 : vector<32x576xf32>
    %51 = arith.truncf %50 : vector<32x576xf32> to vector<32x576xbf16>
    %c0_31 = arith.constant 0 : index
    %c0_32 = arith.constant 0 : index
    %52 = vector.load %arg11[%c0_31, %c0_32] : memref<576x64xbf16, #tpu.memory_space<vmem>>, vector<576x64xbf16>
    %cst_33 = arith.constant dense<0.000000e+00> : vector<32x64xf32>
    %53 = tpu.matmul %51, %52, %cst_33 {dimension_numbers = #tpu.dot_dimension_numbers<[1], [0], [0], [1], [0, 0, 1, 1], [], []>} : vector<32x576xbf16>, vector<576x64xbf16>, vector<32x64xf32> -> vector<32x64xf32>
    %c0_34 = arith.constant 0 : index
    %c0_35 = arith.constant 0 : index
    %54 = vector.load %arg12[%c0_34, %c0_35] : memref<96x32xbf16, #tpu.memory_space<vmem>>, vector<96x32xbf16>
    %55 = arith.truncf %53 : vector<32x64xf32> to vector<32x64xbf16>
    %cst_36 = arith.constant dense<0.000000e+00> : vector<96x64xf32>
    %56 = tpu.matmul %54, %55, %cst_36 {dimension_numbers = #tpu.dot_dimension_numbers<[1], [0], [0], [1], [0, 0, 1, 1], [], []>} : vector<96x32xbf16>, vector<32x64xbf16>, vector<96x64xf32> -> vector<96x64xf32>
    %57 = vector.extract_strided_slice %56 {offsets = [0, 0], sizes = [32, 64], strides = [1, 1]} : vector<96x64xf32> to vector<32x64xf32>
    %58 = tpu.transpose %57, [1, 0] : vector<32x64xf32> -> vector<64x32xf32>
    %59 = vector.extract_strided_slice %56 {offsets = [32, 0], sizes = [32, 64], strides = [1, 1]} : vector<96x64xf32> to vector<32x64xf32>
    %60 = vector.extract_strided_slice %56 {offsets = [64, 0], sizes = [32, 64], strides = [1, 1]} : vector<96x64xf32> to vector<32x64xf32>
    %61 = tpu.transpose %60, [1, 0] : vector<32x64xf32> -> vector<64x32xf32>
    %c0_37 = arith.constant 0 : index
    %c0_38 = arith.constant 0 : index
    %62 = vector.load %arg13[%c0_37, %c0_38] : memref<512x32xf32, #tpu.memory_space<vmem>>, vector<512x32xf32>
    %63 = tpu.concatenate %58, %58, %58, %58, %58, %58, %58, %58 in 0 : vector<64x32xf32>, vector<64x32xf32>, vector<64x32xf32>, vector<64x32xf32>, vector<64x32xf32>, vector<64x32xf32>, vector<64x32xf32>, vector<64x32xf32> -> vector<512x32xf32>
    %64 = arith.mulf %63, %62 : vector<512x32xf32>
    %65 = arith.truncf %64 : vector<512x32xf32> to vector<512x32xbf16>
    %66 = arith.truncf %59 : vector<32x64xf32> to vector<32x64xbf16>
    %cst_39 = arith.constant dense<0.000000e+00> : vector<512x64xf32>
    %67 = tpu.matmul %65, %66, %cst_39 {dimension_numbers = #tpu.dot_dimension_numbers<[1], [0], [0], [1], [0, 0, 1, 1], [], []>} : vector<512x32xbf16>, vector<32x64xbf16>, vector<512x64xf32> -> vector<512x64xf32>
    %cst_40 = arith.constant dense<0xFF800000> : vector<512xf32>
    %68 = vector.multi_reduction <maximumf>, %67, %cst_40 [1] : vector<512x64xf32> to vector<512xf32>
    %69 = vector.shape_cast %68 : vector<512xf32> to vector<512x1xf32>
    %70 = vector.broadcast %69 : vector<512x1xf32> to vector<512x64xf32>
    %71 = arith.subf %67, %70 : vector<512x64xf32>
    %72 = math.exp %71 : vector<512x64xf32>
    %cst_41 = arith.constant dense<0.000000e+00> : vector<512xf32>
    %73 = vector.multi_reduction <add>, %72, %cst_41 [1] : vector<512x64xf32> to vector<512xf32>
    %74 = vector.shape_cast %73 : vector<512xf32> to vector<512x1xf32>
    %75 = tpu.reciprocal %74 {approx = true} : vector<512x1xf32> -> vector<512x1xf32>
    %76 = vector.broadcast %75 : vector<512x1xf32> to vector<512x64xf32>
    %77 = arith.mulf %72, %76 : vector<512x64xf32>
    %78 = arith.truncf %77 : vector<512x64xf32> to vector<512x64xbf16>
    %79 = arith.truncf %61 : vector<64x32xf32> to vector<64x32xbf16>
    %cst_42 = arith.constant dense<0.000000e+00> : vector<512x32xf32>
    %80 = tpu.matmul %78, %79, %cst_42 {dimension_numbers = #tpu.dot_dimension_numbers<[1], [0], [0], [1], [0, 0, 1, 1], [], []>} : vector<512x64xbf16>, vector<64x32xbf16>, vector<512x32xf32> -> vector<512x32xf32>
    %cst_43 = arith.constant 0.000000e+00 : f32
    %81 = vector.broadcast %cst_43 : f32 to vector<64x32xf32>
    %82 = vector.extract_strided_slice %80 {offsets = [0, 0], sizes = [64, 32], strides = [1, 1]} : vector<512x32xf32> to vector<64x32xf32>
    %83 = vector.extract_strided_slice %62 {offsets = [0, 0], sizes = [1, 32], strides = [1, 1]} : vector<512x32xf32> to vector<1x32xf32>
    %84 = vector.broadcast %83 : vector<1x32xf32> to vector<64x32xf32>
    %85 = arith.mulf %82, %84 : vector<64x32xf32>
    %86 = arith.addf %81, %85 : vector<64x32xf32>
    %87 = vector.extract_strided_slice %80 {offsets = [64, 0], sizes = [64, 32], strides = [1, 1]} : vector<512x32xf32> to vector<64x32xf32>
    %88 = vector.extract_strided_slice %62 {offsets = [64, 0], sizes = [1, 32], strides = [1, 1]} : vector<512x32xf32> to vector<1x32xf32>
    %89 = vector.broadcast %88 : vector<1x32xf32> to vector<64x32xf32>
    %90 = arith.mulf %87, %89 : vector<64x32xf32>
    %91 = arith.addf %86, %90 : vector<64x32xf32>
    %92 = vector.extract_strided_slice %80 {offsets = [128, 0], sizes = [64, 32], strides = [1, 1]} : vector<512x32xf32> to vector<64x32xf32>
    %93 = vector.extract_strided_slice %62 {offsets = [128, 0], sizes = [1, 32], strides = [1, 1]} : vector<512x32xf32> to vector<1x32xf32>
    %94 = vector.broadcast %93 : vector<1x32xf32> to vector<64x32xf32>
    %95 = arith.mulf %92, %94 : vector<64x32xf32>
    %96 = arith.addf %91, %95 : vector<64x32xf32>
    %97 = vector.extract_strided_slice %80 {offsets = [192, 0], sizes = [64, 32], strides = [1, 1]} : vector<512x32xf32> to vector<64x32xf32>
    %98 = vector.extract_strided_slice %62 {offsets = [192, 0], sizes = [1, 32], strides = [1, 1]} : vector<512x32xf32> to vector<1x32xf32>
    %99 = vector.broadcast %98 : vector<1x32xf32> to vector<64x32xf32>
    %100 = arith.mulf %97, %99 : vector<64x32xf32>
    %101 = arith.addf %96, %100 : vector<64x32xf32>
    %102 = vector.extract_strided_slice %80 {offsets = [256, 0], sizes = [64, 32], strides = [1, 1]} : vector<512x32xf32> to vector<64x32xf32>
    %103 = vector.extract_strided_slice %62 {offsets = [256, 0], sizes = [1, 32], strides = [1, 1]} : vector<512x32xf32> to vector<1x32xf32>
    %104 = vector.broadcast %103 : vector<1x32xf32> to vector<64x32xf32>
    %105 = arith.mulf %102, %104 : vector<64x32xf32>
    %106 = arith.addf %101, %105 : vector<64x32xf32>
    %107 = vector.extract_strided_slice %80 {offsets = [320, 0], sizes = [64, 32], strides = [1, 1]} : vector<512x32xf32> to vector<64x32xf32>
    %108 = vector.extract_strided_slice %62 {offsets = [320, 0], sizes = [1, 32], strides = [1, 1]} : vector<512x32xf32> to vector<1x32xf32>
    %109 = vector.broadcast %108 : vector<1x32xf32> to vector<64x32xf32>
    %110 = arith.mulf %107, %109 : vector<64x32xf32>
    %111 = arith.addf %106, %110 : vector<64x32xf32>
    %112 = vector.extract_strided_slice %80 {offsets = [384, 0], sizes = [64, 32], strides = [1, 1]} : vector<512x32xf32> to vector<64x32xf32>
    %113 = vector.extract_strided_slice %62 {offsets = [384, 0], sizes = [1, 32], strides = [1, 1]} : vector<512x32xf32> to vector<1x32xf32>
    %114 = vector.broadcast %113 : vector<1x32xf32> to vector<64x32xf32>
    %115 = arith.mulf %112, %114 : vector<64x32xf32>
    %116 = arith.addf %111, %115 : vector<64x32xf32>
    %117 = vector.extract_strided_slice %80 {offsets = [448, 0], sizes = [64, 32], strides = [1, 1]} : vector<512x32xf32> to vector<64x32xf32>
    %118 = vector.extract_strided_slice %62 {offsets = [448, 0], sizes = [1, 32], strides = [1, 1]} : vector<512x32xf32> to vector<1x32xf32>
    %119 = vector.broadcast %118 : vector<1x32xf32> to vector<64x32xf32>
    %120 = arith.mulf %117, %119 : vector<64x32xf32>
    %121 = arith.addf %116, %120 : vector<64x32xf32>
    %122 = tpu.transpose %121, [1, 0] : vector<64x32xf32> -> vector<32x64xf32>
    %c0_44 = arith.constant 0 : index
    %c0_45 = arith.constant 0 : index
    %123 = vector.load %arg14[%c0_44, %c0_45] : memref<288x32xbf16, #tpu.memory_space<vmem>>, vector<288x32xbf16>
    %124 = arith.truncf %122 : vector<32x64xf32> to vector<32x64xbf16>
    %cst_46 = arith.constant dense<0.000000e+00> : vector<288x64xf32>
    %125 = tpu.matmul %123, %124, %cst_46 {dimension_numbers = #tpu.dot_dimension_numbers<[1], [0], [0], [1], [0, 0, 1, 1], [], []>} : vector<288x32xbf16>, vector<32x64xbf16>, vector<288x64xf32> -> vector<288x64xf32>
    %126 = arith.truncf %125 : vector<288x64xf32> to vector<288x64xbf16>
    %cst_47 = arith.constant 0.000000e+00 : f32
    %127 = vector.broadcast %cst_47 : f32 to vector<32x256xf32>
    %128 = vector.extract_strided_slice %126 {offsets = [0, 0], sizes = [32, 64], strides = [1, 1]} : vector<288x64xbf16> to vector<32x64xbf16>
    %c0_48 = arith.constant 0 : index
    %c0_49 = arith.constant 0 : index
    %c0_50 = arith.constant 0 : index
    %129 = vector.load %arg15[%c0_48, %c0_49, %c0_50] : memref<9x64x256xbf16, #tpu.memory_space<vmem>>, vector<1x64x256xbf16>
    %130 = vector.shape_cast %129 : vector<1x64x256xbf16> to vector<64x256xbf16>
    %cst_51 = arith.constant dense<0.000000e+00> : vector<32x256xf32>
    %131 = tpu.matmul %128, %130, %cst_51 {dimension_numbers = #tpu.dot_dimension_numbers<[1], [0], [0], [1], [0, 0, 1, 1], [], []>} : vector<32x64xbf16>, vector<64x256xbf16>, vector<32x256xf32> -> vector<32x256xf32>
    %132 = arith.addf %127, %131 : vector<32x256xf32>
    %133 = vector.extract_strided_slice %126 {offsets = [32, 0], sizes = [32, 64], strides = [1, 1]} : vector<288x64xbf16> to vector<32x64xbf16>
    %c1 = arith.constant 1 : index
    %c0_52 = arith.constant 0 : index
    %c0_53 = arith.constant 0 : index
    %134 = vector.load %arg15[%c1, %c0_52, %c0_53] : memref<9x64x256xbf16, #tpu.memory_space<vmem>>, vector<1x64x256xbf16>
    %135 = vector.shape_cast %134 : vector<1x64x256xbf16> to vector<64x256xbf16>
    %cst_54 = arith.constant dense<0.000000e+00> : vector<32x256xf32>
    %136 = tpu.matmul %133, %135, %cst_54 {dimension_numbers = #tpu.dot_dimension_numbers<[1], [0], [0], [1], [0, 0, 1, 1], [], []>} : vector<32x64xbf16>, vector<64x256xbf16>, vector<32x256xf32> -> vector<32x256xf32>
    %137 = arith.addf %132, %136 : vector<32x256xf32>
    %138 = vector.extract_strided_slice %126 {offsets = [64, 0], sizes = [32, 64], strides = [1, 1]} : vector<288x64xbf16> to vector<32x64xbf16>
    %c2 = arith.constant 2 : index
    %c0_55 = arith.constant 0 : index
    %c0_56 = arith.constant 0 : index
    %139 = vector.load %arg15[%c2, %c0_55, %c0_56] : memref<9x64x256xbf16, #tpu.memory_space<vmem>>, vector<1x64x256xbf16>
    %140 = vector.shape_cast %139 : vector<1x64x256xbf16> to vector<64x256xbf16>
    %cst_57 = arith.constant dense<0.000000e+00> : vector<32x256xf32>
    %141 = tpu.matmul %138, %140, %cst_57 {dimension_numbers = #tpu.dot_dimension_numbers<[1], [0], [0], [1], [0, 0, 1, 1], [], []>} : vector<32x64xbf16>, vector<64x256xbf16>, vector<32x256xf32> -> vector<32x256xf32>
    %142 = arith.addf %137, %141 : vector<32x256xf32>
    %143 = vector.extract_strided_slice %126 {offsets = [96, 0], sizes = [32, 64], strides = [1, 1]} : vector<288x64xbf16> to vector<32x64xbf16>
    %c3 = arith.constant 3 : index
    %c0_58 = arith.constant 0 : index
    %c0_59 = arith.constant 0 : index
    %144 = vector.load %arg15[%c3, %c0_58, %c0_59] : memref<9x64x256xbf16, #tpu.memory_space<vmem>>, vector<1x64x256xbf16>
    %145 = vector.shape_cast %144 : vector<1x64x256xbf16> to vector<64x256xbf16>
    %cst_60 = arith.constant dense<0.000000e+00> : vector<32x256xf32>
    %146 = tpu.matmul %143, %145, %cst_60 {dimension_numbers = #tpu.dot_dimension_numbers<[1], [0], [0], [1], [0, 0, 1, 1], [], []>} : vector<32x64xbf16>, vector<64x256xbf16>, vector<32x256xf32> -> vector<32x256xf32>
    %147 = arith.addf %142, %146 : vector<32x256xf32>
    %148 = vector.extract_strided_slice %126 {offsets = [128, 0], sizes = [32, 64], strides = [1, 1]} : vector<288x64xbf16> to vector<32x64xbf16>
    %c4 = arith.constant 4 : index
    %c0_61 = arith.constant 0 : index
    %c0_62 = arith.constant 0 : index
    %149 = vector.load %arg15[%c4, %c0_61, %c0_62] : memref<9x64x256xbf16, #tpu.memory_space<vmem>>, vector<1x64x256xbf16>
    %150 = vector.shape_cast %149 : vector<1x64x256xbf16> to vector<64x256xbf16>
    %cst_63 = arith.constant dense<0.000000e+00> : vector<32x256xf32>
    %151 = tpu.matmul %148, %150, %cst_63 {dimension_numbers = #tpu.dot_dimension_numbers<[1], [0], [0], [1], [0, 0, 1, 1], [], []>} : vector<32x64xbf16>, vector<64x256xbf16>, vector<32x256xf32> -> vector<32x256xf32>
    %152 = arith.addf %147, %151 : vector<32x256xf32>
    %153 = vector.extract_strided_slice %126 {offsets = [160, 0], sizes = [32, 64], strides = [1, 1]} : vector<288x64xbf16> to vector<32x64xbf16>
    %c5 = arith.constant 5 : index
    %c0_64 = arith.constant 0 : index
    %c0_65 = arith.constant 0 : index
    %154 = vector.load %arg15[%c5, %c0_64, %c0_65] : memref<9x64x256xbf16, #tpu.memory_space<vmem>>, vector<1x64x256xbf16>
    %155 = vector.shape_cast %154 : vector<1x64x256xbf16> to vector<64x256xbf16>
    %cst_66 = arith.constant dense<0.000000e+00> : vector<32x256xf32>
    %156 = tpu.matmul %153, %155, %cst_66 {dimension_numbers = #tpu.dot_dimension_numbers<[1], [0], [0], [1], [0, 0, 1, 1], [], []>} : vector<32x64xbf16>, vector<64x256xbf16>, vector<32x256xf32> -> vector<32x256xf32>
    %157 = arith.addf %152, %156 : vector<32x256xf32>
    %158 = vector.extract_strided_slice %126 {offsets = [192, 0], sizes = [32, 64], strides = [1, 1]} : vector<288x64xbf16> to vector<32x64xbf16>
    %c6 = arith.constant 6 : index
    %c0_67 = arith.constant 0 : index
    %c0_68 = arith.constant 0 : index
    %159 = vector.load %arg15[%c6, %c0_67, %c0_68] : memref<9x64x256xbf16, #tpu.memory_space<vmem>>, vector<1x64x256xbf16>
    %160 = vector.shape_cast %159 : vector<1x64x256xbf16> to vector<64x256xbf16>
    %cst_69 = arith.constant dense<0.000000e+00> : vector<32x256xf32>
    %161 = tpu.matmul %158, %160, %cst_69 {dimension_numbers = #tpu.dot_dimension_numbers<[1], [0], [0], [1], [0, 0, 1, 1], [], []>} : vector<32x64xbf16>, vector<64x256xbf16>, vector<32x256xf32> -> vector<32x256xf32>
    %162 = arith.addf %157, %161 : vector<32x256xf32>
    %163 = vector.extract_strided_slice %126 {offsets = [224, 0], sizes = [32, 64], strides = [1, 1]} : vector<288x64xbf16> to vector<32x64xbf16>
    %c7 = arith.constant 7 : index
    %c0_70 = arith.constant 0 : index
    %c0_71 = arith.constant 0 : index
    %164 = vector.load %arg15[%c7, %c0_70, %c0_71] : memref<9x64x256xbf16, #tpu.memory_space<vmem>>, vector<1x64x256xbf16>
    %165 = vector.shape_cast %164 : vector<1x64x256xbf16> to vector<64x256xbf16>
    %cst_72 = arith.constant dense<0.000000e+00> : vector<32x256xf32>
    %166 = tpu.matmul %163, %165, %cst_72 {dimension_numbers = #tpu.dot_dimension_numbers<[1], [0], [0], [1], [0, 0, 1, 1], [], []>} : vector<32x64xbf16>, vector<64x256xbf16>, vector<32x256xf32> -> vector<32x256xf32>
    %167 = arith.addf %162, %166 : vector<32x256xf32>
    %168 = vector.extract_strided_slice %126 {offsets = [256, 0], sizes = [32, 64], strides = [1, 1]} : vector<288x64xbf16> to vector<32x64xbf16>
    %c8 = arith.constant 8 : index
    %c0_73 = arith.constant 0 : index
    %c0_74 = arith.constant 0 : index
    %169 = vector.load %arg15[%c8, %c0_73, %c0_74] : memref<9x64x256xbf16, #tpu.memory_space<vmem>>, vector<1x64x256xbf16>
    %170 = vector.shape_cast %169 : vector<1x64x256xbf16> to vector<64x256xbf16>
    %cst_75 = arith.constant dense<0.000000e+00> : vector<32x256xf32>
    %171 = tpu.matmul %168, %170, %cst_75 {dimension_numbers = #tpu.dot_dimension_numbers<[1], [0], [0], [1], [0, 0, 1, 1], [], []>} : vector<32x64xbf16>, vector<64x256xbf16>, vector<32x256xf32> -> vector<32x256xf32>
    %172 = arith.addf %167, %171 : vector<32x256xf32>
    %c0_76 = arith.constant 0 : index
    %c0_77 = arith.constant 0 : index
    %c0_78 = arith.constant 0 : index
    %173 = vector.load %arg16[%c0_76, %c0_77, %c0_78] : memref<1x32x256xf32, #tpu.memory_space<vmem>>, vector<1x32x256xf32>
    %174 = vector.shape_cast %173 : vector<1x32x256xf32> to vector<32x256xf32>
    %175 = vector.shape_cast %172 : vector<32x256xf32> to vector<1x32x256xf32>
    tpu.vector_store %arg16[%c0_76, %c0_77, %c0_78], %175 {strides = array<i32>} : memref<1x32x256xf32, #tpu.memory_space<vmem>>, vector<1x32x256xf32>,
    return
  }
  func.func @transform_0(%arg0: i32) -> (i32, i32, i32) {
    %c0_i32 = arith.constant 0 : i32
    %c0_i32_0 = arith.constant 0 : i32
    %c0_i32_1 = arith.constant 0 : i32
    return %arg0, %c0_i32, %c0_i32_0 : i32, i32, i32
  }
  func.func @transform_1(%arg0: i32) -> (i32, i32, i32) {
    %c0_i32 = arith.constant 0 : i32
    %c0_i32_0 = arith.constant 0 : i32
    %c0_i32_1 = arith.constant 0 : i32
    return %arg0, %c0_i32, %c0_i32_0 : i32, i32, i32
  }
  func.func @transform_2(%arg0: i32) -> (i32, i32) {
    %c0_i32 = arith.constant 0 : i32
    %c0_i32_0 = arith.constant 0 : i32
    %c0_i32_1 = arith.constant 0 : i32
    return %c0_i32, %c0_i32_0 : i32, i32
  }
  func.func @transform_3(%arg0: i32) -> (i32, i32) {
    %c0_i32 = arith.constant 0 : i32
    %c0_i32_0 = arith.constant 0 : i32
    %c0_i32_1 = arith.constant 0 : i32
    return %c0_i32, %c0_i32_0 : i32, i32
  }
  func.func @transform_4(%arg0: i32) -> (i32, i32) {
    %c0_i32 = arith.constant 0 : i32
    %c0_i32_0 = arith.constant 0 : i32
    %c0_i32_1 = arith.constant 0 : i32
    return %c0_i32, %c0_i32_0 : i32, i32
  }
  func.func @transform_5(%arg0: i32) -> (i32, i32) {
    %c0_i32 = arith.constant 0 : i32
    %c0_i32_0 = arith.constant 0 : i32
    %c0_i32_1 = arith.constant 0 : i32
    return %c0_i32, %c0_i32_0 : i32, i32
  }
  func.func @transform_6(%arg0: i32) -> (i32, i32) {
    %c0_i32 = arith.constant 0 : i32
    %c0_i32_0 = arith.constant 0 : i32
    %c0_i32_1 = arith.constant 0 : i32
    return %c0_i32, %c0_i32_0 : i32, i32
  }
  func.func @transform_7(%arg0: i32) -> (i32, i32) {
    %c0_i32 = arith.constant 0 : i32
    %c0_i32_0 = arith.constant 0 : i32
    %c0_i32_1 = arith.constant 0 : i32
    return %c0_i32, %c0_i32_0 : i32, i32
  }
  func.func @transform_8(%arg0: i32) -> (i32, i32) {
    %c0_i32 = arith.constant 0 : i32
    %c0_i32_0 = arith.constant 0 : i32
    %c0_i32_1 = arith.constant 0 : i32
    return %c0_i32, %c0_i32_0 : i32, i32
  }
  func.func @transform_9(%arg0: i32) -> (i32, i32) {
    %c0_i32 = arith.constant 0 : i32
    %c0_i32_0 = arith.constant 0 : i32
    %c0_i32_1 = arith.constant 0 : i32
    return %c0_i32, %c0_i32_0 : i32, i32
  }
  func.func @transform_10(%arg0: i32) -> (i32, i32) {
    %c0_i32 = arith.constant 0 : i32
    %c0_i32_0 = arith.constant 0 : i32
    %c0_i32_1 = arith.constant 0 : i32
    return %c0_i32, %c0_i32_0 : i32, i32
  }
  func.func @transform_11(%arg0: i32) -> (i32, i32) {
    %c0_i32 = arith.constant 0 : i32
    %c0_i32_0 = arith.constant 0 : i32
    %c0_i32_1 = arith.constant 0 : i32
    return %c0_i32, %c0_i32_0 : i32, i32
  }
  func.func @transform_12(%arg0: i32) -> (i32, i32) {
    %c0_i32 = arith.constant 0 : i32
    %c0_i32_0 = arith.constant 0 : i32
    %c0_i32_1 = arith.constant 0 : i32
    return %c0_i32, %c0_i32_0 : i32, i32
  }
  func.func @transform_13(%arg0: i32) -> (i32, i32) {
    %c0_i32 = arith.constant 0 : i32
    %c0_i32_0 = arith.constant 0 : i32
    %c0_i32_1 = arith.constant 0 : i32
    return %c0_i32, %c0_i32_0 : i32, i32
  }
  func.func @transform_14(%arg0: i32) -> (i32, i32, i32) {
    %c0_i32 = arith.constant 0 : i32
    %c0_i32_0 = arith.constant 0 : i32
    %c0_i32_1 = arith.constant 0 : i32
    %c0_i32_2 = arith.constant 0 : i32
    return %c0_i32, %c0_i32_0, %c0_i32_1 : i32, i32, i32
  }
  func.func @transform_15(%arg0: i32) -> (i32, i32, i32) {
    %c0_i32 = arith.constant 0 : i32
    %c0_i32_0 = arith.constant 0 : i32
    %c0_i32_1 = arith.constant 0 : i32
    return %arg0, %c0_i32, %c0_i32_0 : i32, i32, i32
  }
}

</mosaic_0001>

<bundles_post_ra>
// kernel: tpu_custom_call.1
= control target key start
LH: loop header
LB: loop body
LE: loop exit
PB: predicated region body
PF: predicated region fallthrough
CT: control target
= control target key end

     0   :  { %s9767_s0 = inlined_call_operand.vmem [shape: bf16[2,32,256], index: 0, kind: input, shape index: {}]   ;;  %s9768_s1 = inlined_call_operand.vmem [shape: bf16[2,3,64], index: 1, kind: input, shape index: {}]   ;;  %s9769_s2 = inlined_call_operand.vmem [shape: bf16[64,256], index: 2, kind: input, shape index: {}]   ;;  %s9770_s3 = inlined_call_operand.vmem [shape: bf16[64,32], index: 3, kind: input, shape index: {}]   ;;  %s9771_s4 = inlined_call_operand.vmem [shape: bf16[64,3], index: 4, kind: input, shape index: {}]   ;;  %s9772_s5 = inlined_call_operand.vmem [shape: f32[64,1], index: 5, kind: input, shape index: {}]   ;;  %s9773_s6 = inlined_call_operand.vmem [shape: f32[32,2], index: 6, kind: input, shape index: {}]   ;;  %s9774_s7 = inlined_call_operand.vmem [shape: f32[32,2], index: 7, kind: input, shape index: {}]   ;;  %s9775_s8 = inlined_call_operand.vmem [shape: f32[32,576], index: 8, kind: input, shape index: {}]   ;;  %s9776_s9 = inlined_call_operand.vmem [shape: bf16[256,576], index: 9, kind: input, shape index: {}]   ;;  %s9777_s10 = inlined_call_operand.vmem [shape: bf16[576,64], index: 10, kind: input, shape index: {}]   ;;  %s9778_s11 = inlined_call_operand.vmem [shape: bf16[96,32], index: 11, kind: input, shape index: {}]   ;;  %s9779_s12 = inlined_call_operand.vmem [shape: f32[512,32], index: 12, kind: input, shape index: {}]   ;;  %s9780_s13 = inlined_call_operand.vmem [shape: bf16[288,32], index: 13, kind: input, shape index: {}]   ;;  %s9781_s14 = inlined_call_operand.vmem [shape: bf16[9,64,256], index: 14, kind: input, shape index: {}]   ;;  %s9782_s15 = inlined_call_operand.hbm [shape: f32[2,32,256], index: 15, kind: output, shape index: {}]  }
   0x1   :  { %9829 = sst [smem:[#allocation41_spill]] %s9782_s15 }
   0x2   :  { %20 = vsyncpa [#allocation3], 0 }
   0x3   :  { %22 = vsyncpa [#allocation3 + $0x1], 0  ;;  %s7461_s18 = smov 0   ;;  %s7463_s19 = smov 0  }
   0x4   :  { %s7465_s20 = smov 0   ;;  %s7467_s21 = smov 0  }
   0x5 LB: > { %9830 = sst [smem:[#allocation5_spill]] %s7362_s18  ;;  %s7482_s22 = sadd.s32 4294967295, %s7374_s21   ;;  %s7374_s21 = sphi %s7467_s21, %s9924_s21   ;;  %s7370_s20 = sphi %s7465_s20, %s9929_s20   ;;  %s7366_s19 = sphi %s7463_s19, %s9928_s19   ;;  %s7362_s18 = sphi %s7461_s18, %s9927_s18  }
   0x6   : > { %9831 = sst [smem:[#allocation6_spill]] %s7370_s20  ;;  %s5814_s23 = sadd.s32 4294967294, %s7374_s21  }
   0x7   : > { %9832 = sst [smem:[#allocation7_spill]] %s7374_s21  ;;  %s7486_s24 = sadd.s32 1, %s7374_s21  }
   0x8   : > { %9833 = sst [smem:[#allocation8_spill]] %s7486_s24  ;;  %s360_s25 = sadd.s32 1, %s7370_s20 }
   0x9   : > { %s357_s26 = ssub.s32 %s7374_s21, %s7486_s24  ;;  %p370_p0 = scmp.ne.s32.totalorder %s7370_s20, %s7366_s19 }
   0xa   : > { %p358_p1 = scmp.eq.s32.totalorder %s357_s26, 0  ;;  %p371_p2 = scmp.eq.s32.totalorder %s7482_s22, 1 }
   0xb   : > { %p376_p3 = scmp.ne.s32.totalorder %s7366_s19, %s7362_s18  ;;  %p377_p4 = scmp.eq.s32.totalorder %s5814_s23, 1 }
   0xc   : > { %s7497_s27 = scalar_select %p358_p1, %s7370_s20, %s360_s25  }
   0xd   : > { %p7499_p5 = por %p371_p2, %p370_p0  ;;  %p7503_p6 = por %p377_p4, %p376_p3 }
   0xe   : > { %9834 = sst [smem:[#allocation9_spill]] %s7497_s27  ;;  %p5817_p7 = scmp.ge.s32.totalorder %s7374_s21, 1 }
   0xf   : > { %s9835_s28 = scalar_select %p7499_p5, 1, 0 }
  0x10   : > { %s9837_s29 = scalar_select %p7503_p6, 1, 0 }
  0x11   : > { %9836 = sst [smem:[#allocation10_spill]] %s9835_s28  ;;  %p449_p8 = scmp.lt.s32.totalorder %s7374_s21, 3 }
  0x12   : > { %9838 = sst [smem:[#allocation11_spill]] %s9837_s29 }
  0x13   : > { %p450_p9 = pnand %p5817_p7, %p449_p8 }
  0x15   : > { %453 = sbr.rel (%p450_p9) target bundleno = 3215 (0xc8f), region = 80 }
  0x1a   : > { %v6696_v0 = vld [vmem:[%s9769_s2 + $0x34] ss:$8 sps:$4 sm:$0xff]   ;;  %p501_p10 = scmp.lt.s32.totalorder %s7482_s22, 1  ;;  %v6698_v1 = vld [vmem:[%s9769_s2 + $0x30] ss:$8 sps:$4 sm:$0xff]   ;;  %v9792_v2 = vmov 0  }
  0x1b   : > { %600 = vmatprep.mubr.bf16.mxu0 %v9792_v2  ;;  %702 = vmatprep.mubr.bf16.mxu1 %v9792_v2  ;;  %v6699_v3 = vld [vmem:[%s9769_s2 + $0x24] ss:$8 sps:$4 sm:$0xff]   ;;  %v6701_v4 = vld [vmem:[%s9769_s2 + $0x20] ss:$8 sps:$4 sm:$0xff]   ;;  %v6702_v5 = vld [vmem:[%s9769_s2 + $0x14] ss:$8 sps:$4 sm:$0xff]  }
  0x1c   : > { %576 = vmatprep.subr.bf16.mxu0 %v6696_v0  ;;  %s502_s27 = scalar_select %p501_p10, %s7482_s22, 1  ;;  %6694 = vset.pattern.permute.xlu0 %v9792_v2  ;;  %v6704_v6 = vld [vmem:[%s9769_s2 + $0x10] ss:$8 sps:$4 sm:$0xff]   ;;  %v6705_v7 = vld [vmem:[%s9769_s2 + $0x4] ss:$8 sps:$4 sm:$0xff]   ;;  %vm564_vm0 = vcmask 523264  }
  0x1d   : > { %577 = vmatpush1.bf16.msra.mxu0 %v6698_v1  ;;  %6695 = vset.pattern.permute.xlu1 %v9792_v2  ;;  %v6707_v8 = vld [vmem:[%s9769_s2] ss:$8 sps:$4 sm:$0xff]   ;;  %vm783_vm1 = vcmask 261120   ;;  %v6719_v16 = vld [vmem:[%s9770_s3 + $0x10] sm:$0xff]   ;;  %v6721_v17 = vld [vmem:[%s9770_s3 + $0x18] sm:$0xff]   ;;  %vm660_vm2 = vcmask 1040384  }
  0x1e   : > { %578 = vmatprep.subr.bf16.mxu0 %v6699_v3  ;;  %s6252_s20 = sshll.u32 %s502_s27, 5  ;;  %s5821_s16 = sshll.u32 %s502_s27, 1  ;;  %v6714_v14 = vld [vmem:[%s9770_s3] sm:$0xff]   ;;  %v6716_v15 = vld [vmem:[%s9770_s3 + $0x8] sm:$0xff]   ;;  %v871_v19 = vld [vmem:[%s9772_s5 + $0x10] sm:$0xff]  ;;  %vm661_vm3 = vcmask 1041408  }
  0x1f   : > { %s505_s25 = scalar_lea.vmem %s9767_s0, %s6252_s20  ;;  %s509_s24 = scalar_lea.vmem %s9768_s1, %s5821_s16  ;;  %v869_v18 = vld [vmem:[%s9772_s5] sm:$0xff]  ;;  %889 = vperm.xlu1 %6695, %v871_v19   ;;  %v870_v20 = vld [vmem:[%s9772_s5 + $0x8] sm:$0xff]  ;;  %v872_v21 = vld [vmem:[%s9772_s5 + $0x18] sm:$0xff]  ;;  %v7377_v27 = vmov 65535   ;;  %vm647_vm4 = vcmask 23552   ;;  %vm1014_vm5 = vcmask 15360  }
  0x20   : > { %v6710_v9 = vld [vmem:[%s505_s25 + $0x14] ss:$8 sps:$4 sm:$0xff]   ;;  %v515_v10 = vld [vmem:[%s509_s24] sm:$0x3]  ;;  %v6708_v11 = vld [vmem:[%s505_s25 + $0x10] ss:$8 sps:$4 sm:$0xff]   ;;  %879 = vperm.xlu0 %6694, %v869_v18  }
  0x21   : > { %579 = vmatpush1.bf16.msra.mxu0 %v6701_v4  ;;  %v6713_v12 = vld [vmem:[%s505_s25 + $0x4] ss:$8 sps:$4 sm:$0xff]   ;;  %v6711_v13 = vld [vmem:[%s505_s25] ss:$8 sps:$4 sm:$0xff]   ;;  %v875_v24 = vld [vmem:[%s9772_s5 + $0x30] sm:$0xff]  ;;  %v662_v28 = vsel %vm660_vm2, 4294967295, %v7377_v27 }
  0x22   : > { %580 = vmatprep.subr.bf16.mxu0 %v6702_v5  ;;  %v873_v22 = vld [vmem:[%s9772_s5 + $0x20] sm:$0xff]  ;;  %v874_v23 = vld [vmem:[%s9772_s5 + $0x28] sm:$0xff]  ;;  %v876_v25 = vld [vmem:[%s9772_s5 + $0x38] sm:$0xff]  ;;  %v663_v32 = vsel %vm661_vm3, %v662_v28, 0  ;;  %s498_s23 = sand.u32 1, %s7366_s19   ;;  %s6253_s20 = sshll.u32 %s7482_s22, 10 }
  0x23   : > { %894 = vperm.xlu1 %6695, %v872_v21   ;;  %v6715_v37 = vld [vmem:[%s9771_s4] sm:$0xff]   ;;  %v6717_v38 = vld [vmem:[%s9771_s4 + $0x8] sm:$0xff]   ;;  %v6718_v39 = vld [vmem:[%s9771_s4 + $0x10] sm:$0xff]   ;;  %s5818_s24 = sshll.u32 %s498_s23, 6  ;;  %s9920_s29 = sld [smem:[#allocation41_spill]] }
  0x24   : > { %884 = vperm.xlu0 %6694, %v870_v20   ;;  %v6720_v40 = vld [vmem:[%s9771_s4 + $0x18] sm:$0xff]   ;;  %s9701_s15 = scalar_lea.vmem [#allocation2], %s5818_s24  ;;  %s9727_s22 = scalar_lea.sflag [#allocation3], %s498_s23 }
  0x25   : > { %581 = vmatpush1.bf16.msra.mxu0 %v6704_v6  ;;  %s5740_s21 = sshll.u32 %s9701_s15, 4  ;;  %s7378_s30 = smov [#allocation2]   ;;  %s9721_s21 = int_to_ptr.vmem [resolvable:$true] %s5740_s21 }
  0x26   : > { %582 = vmatprep.subr.bf16.mxu0 %v6705_v7  ;;  %s7314_s26 = scalar_lea.vmem %s9721_s21, 1024  ;;  %s7318_s16 = sshll.u32 %s7378_s30, 4  ;;  %s7319_s16 = int_to_ptr.vmem [resolvable:$false] %s7318_s16 }
  0x27   : > { %904 = vperm.xlu1 %6695, %v874_v23   ;;  %p7315_p11 = scmp.ne.s32.totalorder %s9721_s21, %s7314_s26  ;;  %s7320_s17 = scalar_lea.vmem %s7319_s16, 2048 }
  0x28   : > { %899 = vperm.xlu0 %6694, %v873_v22   ;;  %p7321_p0 = scmp.lt.s32.totalorder %s9721_s21, %s7319_s16  ;;  %p7322_p1 = scmp.lt.s32.totalorder %s7320_s17, %s7314_s26 }
  0x29   : > { %583 = vmatpush1.bf16.msra.mxu0 %v6707_v8  ;;  %s9719_s25 = scalar_lea.hbm %s9920_s29, %s6253_s20  ;;  %p7316_p12 = pnand %p7315_p11, %p7499_p5 }
  0x2a   : > { %808 = vmatprep.subr.bf16.mxu0 %v6710_v9  ;;  %p7323_p2 = por %p7322_p1, %p7321_p0 }
  0x2b   : > { %914 = vperm.xlu1 %6695, %v876_v25   ;;  %p7317_p13 = pneg %p7316_p12 }
  0x2c   : > { %5830 = vmatmul.mubr.msk.bf16.vlgmr.msra.gmra.mxu0 %vm564_vm0, %v515_v10  ;;  %909 = vperm.xlu0 %6694, %v875_v24  }
  0x2d   : > { %809 = vmatpush1.bf16.msra.mxu0 %v6708_v11  ;;  %828 = vmatprep.mubr.bf16.mxu0 %v9792_v2  ;;  %p7324_p3 = pnand %p7323_p2, %p7317_p13 }
  0x2e   : > { %810 = vmatprep.subr.bf16.mxu0 %v6713_v12 }
  0x31   : > { %811 = vmatpush1.bf16.msra.mxu0 %v6711_v13 }
  0x34   : > { %5847 = vmatmul.mubr.msk.bf16.vlgmr.msra.gmra.mxu0 %vm783_vm1, %v6714_v14 }
  0x35   : > { %838 = vmatprep.mubr.bf16.mxu0 %v9792_v2 }
  0x3c   : > { %5848 = vmatmul.mubr.msk.bf16.gmra.mxu0 %vm783_vm1, %v6716_v15 }
  0x3d   : > { %848 = vmatprep.mubr.bf16.mxu0 %v9792_v2 }
  0x44   : > { %5849 = vmatmul.mubr.msk.bf16.gmra.mxu0 %vm783_vm1, %v6719_v16 }
  0x45   : > { %858 = vmatprep.mubr.bf16.mxu0 %v9792_v2 }
  0x4c   : > { %5850 = vmatmul.mubr.msk.bf16.gmra.mxu0 %vm783_vm1, %v6721_v17 }
  0x9a   : > { %v890_v59 = vpop.permute.xlu1 %889 }
  0x9b   : > { %v880_v45 = vpop.permute.xlu0 %879 }
  0x9e   : > { %v895_v11 = vpop.permute.xlu1 %894 }
  0x9f   : > { %v885_v57 = vpop.permute.xlu0 %884 }
  0xec   : > { %v602_v26 = vpop.f32.mrf.mxu0 }
  0xed   : > { %v625_v29 = vpack.c.bf16 %v602_v26, %v602_v26 }
  0xee   : > { %v604_v30 = vpop.f32.mrf.mxu0 }
  0xef   : > { %v626_v31 = vpack.c.bf16 %v604_v30, %v604_v30  ;;  %v665_v36 = vand.u32 %v663_v32, %v625_v29 }
  0xf0   : > { %v606_v33 = vpop.f32.mrf.mxu0 }
  0xf1   : > { %v668_v34 = vand.u32 %v663_v32, %v626_v31 }
  0xf2   : > { %v607_v35 = vpop.f32.mrf.mxu0 }
  0xf3   : > { %684 = vmatprep.subr.bf16.mxu1 %v668_v34 }
  0xf4   : > { %685 = vmatpush1.bf16.msra.mxu1 %v665_v36  ;;  %v830_v41 = vpop.f32.mrf.mxu0 }
  0xf6   : > { %v832_v42 = vpop.f32.mrf.mxu0 }
  0xf7   : > { %5835 = vmatmul.mubr.msk.bf16.vlgmr.msra.gmra.mxu1 %vm647_vm4, %v6715_v37 }
  0xf8   : > { %712 = vmatprep.mubr.bf16.mxu1 %v9792_v2  ;;  %v834_v43 = vpop.f32.mrf.mxu0 }
  0xfa   : > { %v836_v44 = vpop.f32.mrf.mxu0 }
  0xfc   : > { %v840_v47 = vpop.f32.mrf.mxu0 }
  0xfe   : > { %v842_v53 = vpop.f32.mrf.mxu0 }
  0xff   : > { %5836 = vmatmul.mubr.msk.bf16.gmra.mxu1 %vm647_vm4, %v6717_v38 }
 0x100   : > { %722 = vmatprep.mubr.bf16.mxu1 %v9792_v2  ;;  %v844_v63 = vpop.f32.mrf.mxu0 }
 0x102   : > { %v846_v9 = vpop.f32.mrf.mxu0 }
 0x104   : > { %v850_v16 = vpop.f32.mrf.mxu0 }
 0x106   : > { %v852_v24 = vpop.f32.mrf.mxu0 }
 0x107   : > { %5837 = vmatmul.mubr.msk.bf16.gmra.mxu1 %vm647_vm4, %v6718_v39 }
 0x108   : > { %732 = vmatprep.mubr.bf16.mxu1 %v9792_v2  ;;  %v854_v30 = vpop.f32.mrf.mxu0 }
 0x10a   : > { %v856_v36 = vpop.f32.mrf.mxu0 }
 0x10f   : > { %5838 = vmatmul.mubr.msk.bf16.gmra.mxu1 %vm647_vm4, %v6720_v40 }
 0x1b7   : > { %v704_v46 = vpop.f32.mrf.mxu1 }
 0x1b8   : > { %v831_v48 = vadd.f32 %v830_v41, %v704_v46 }
 0x1b9   : > { %v706_v49 = vpop.f32.mrf.mxu1 }
 0x1ba   : > { %v917_v50 = vadd.f32 %v880_v45, %v831_v48  ;;  %v833_v51 = vadd.f32 %v832_v42, %v706_v49  ;;  %v860_v42 = vpop.f32.mrf.mxu0 }
 0x1bb   : > { %v708_v52 = vpop.f32.mrf.mxu1 }
 0x1bc   : > { %v5851_v54 = vmul.f32 -1.442695, %v917_v50  ;;  %v918_v55 = vadd.f32 %v880_v45, %v833_v51  ;;  %v835_v56 = vadd.f32 %v834_v43, %v708_v52  ;;  %v862_v50 = vpop.f32.mrf.mxu0  ;;  %v900_v51 = vpop.permute.xlu0 %899 }
 0x1bd   : > { %v710_v58 = vpop.f32.mrf.mxu1 }
 0x1be   : > { %7002 = vpow2.f32 %v5851_v54  ;;  %v5852_v60 = vmul.f32 -1.442695, %v918_v55  ;;  %v919_v61 = vadd.f32 %v885_v57, %v835_v56  ;;  %v837_v62 = vadd.f32 %v836_v44, %v710_v58 }
 0x1bf   : > { %v714_v0 = vpop.f32.mrf.mxu1 }
 0x1c0   : > { %7004 = vpow2.f32 %v5852_v60  ;;  %v5853_v1 = vmul.f32 -1.442695, %v919_v61  ;;  %v920_v3 = vadd.f32 %v885_v57, %v837_v62  ;;  %v841_v4 = vadd.f32 %v840_v47, %v714_v0  ;;  %v864_v60 = vpop.f32.mrf.mxu0  ;;  %v905_v0 = vpop.permute.xlu1 %904 }
 0x1c1   : > { %v716_v5 = vpop.f32.mrf.mxu1 }
 0x1c2   : > { %7006 = vpow2.f32 %v5853_v1  ;;  %v5854_v6 = vmul.f32 -1.442695, %v920_v3  ;;  %v921_v7 = vadd.f32 %v890_v59, %v841_v4  ;;  %v843_v8 = vadd.f32 %v842_v53, %v716_v5 }
 0x1c3   : > { %v718_v10 = vpop.f32.mrf.mxu1 }
 0x1c4   : > { %7008 = vpow2.f32 %v5854_v6  ;;  %v5855_v12 = vmul.f32 -1.442695, %v921_v7  ;;  %v922_v13 = vadd.f32 %v890_v59, %v843_v8  ;;  %v845_v14 = vadd.f32 %v844_v63, %v718_v10  ;;  %v910_v10 = vpop.permute.xlu0 %909 }
 0x1c5   : > { %v720_v15 = vpop.f32.mrf.mxu1 }
 0x1c6   : > { %7010 = vpow2.f32 %v5855_v12  ;;  %v5856_v17 = vmul.f32 -1.442695, %v922_v13  ;;  %v923_v18 = vadd.f32 %v895_v11, %v845_v14  ;;  %v847_v19 = vadd.f32 %v846_v9, %v720_v15  ;;  %v866_v9 = vpop.f32.mrf.mxu0 }
 0x1c7   : > { %v724_v20 = vpop.f32.mrf.mxu1 }
 0x1c8   : > { %7012 = vpow2.f32 %v5856_v17  ;;  %v5857_v21 = vmul.f32 -1.442695, %v923_v18  ;;  %v924_v22 = vadd.f32 %v895_v11, %v847_v19  ;;  %v851_v45 = vadd.f32 %v850_v16, %v724_v20 }
 0x1c9   : > { %v726_v23 = vpop.f32.mrf.mxu1 }
 0x1ca   : > { %7014 = vpow2.f32 %v5857_v21  ;;  %v5858_v25 = vmul.f32 -1.442695, %v924_v22  ;;  %v853_v47 = vadd.f32 %v852_v24, %v726_v23  ;;  %v925_v54 = vadd.f32 %v900_v51, %v851_v45  ;;  %v915_v23 = vpop.permute.xlu1 %914  ;;  %v6740_v45 = vld [vmem:[%s9776_s9 + $0xa0] ss:$20 sps:$4 sm:$0xff]  }
 0x1cb   : > { %v7003_v26 = vpop.eup %7002  ;;  %v728_v29 = vpop.f32.mrf.mxu1 }
 0x1cc   : > { %v957_v27 = vadd.f32 1.0, %v7003_v26  ;;  %7016 = vpow2.f32 %v5858_v25  ;;  %v926_v55 = vadd.f32 %v900_v51, %v853_v47  ;;  %v855_v56 = vadd.f32 %v854_v30, %v728_v29  ;;  %v6748_v47 = vld [vmem:[%s9776_s9 + $0x7c] ss:$20 sps:$4 sm:$0xff]   ;;  %v6754_v51 = vld [vmem:[%s9776_s9 + $0x54] ss:$20 sps:$4 sm:$0xff]  }
 0x1cd   : > { %v7005_v28 = vpop.eup %7004  ;;  %v730_v35 = vpop.f32.mrf.mxu1 }
 0x1ce   : > { %7018 = vrcp.f32 %v957_v27  ;;  %v958_v31 = vadd.f32 1.0, %v7005_v28  ;;  %v857_v57 = vadd.f32 %v856_v36, %v730_v35  ;;  %v927_v3 = vadd.f32 %v905_v0, %v855_v56  ;;  %v6730_v35 = vld [vmem:[%s9776_s9 + $0xf4] ss:$20 sps:$4 sm:$0xff]   ;;  %v6733_v36 = vld [vmem:[%s9776_s9 + $0xfc] ss:$20 sps:$4 sm:$0xff]  }
 0x1cf   : > { %v7007_v32 = vpop.eup %7006  ;;  %v734_v41 = vpop.f32.mrf.mxu1  ;;  %v6763_v56 = vld [vmem:[%s9776_s9 + $0x34] ss:$20 sps:$4 sm:$0xff]  }
 0x1d0   : > { %7020 = vrcp.f32 %v958_v31  ;;  %v959_v33 = vadd.f32 1.0, %v7007_v32  ;;  %v861_v1 = vadd.f32 %v860_v42, %v734_v41  ;;  %v928_v4 = vadd.f32 %v905_v0, %v857_v57  ;;  %v6722_v31 = vld [vmem:[%s9776_s9 + $0x118] ss:$20 sps:$4 sm:$0xff]   ;;  %v6724_v32 = vld [vmem:[%s9776_s9 + $0x11c] ss:$20 sps:$4 sm:$0xff]  }
 0x1d1   : > { %v7009_v34 = vpop.eup %7008  ;;  %v736_v49 = vpop.f32.mrf.mxu1  ;;  %1597 = vmatprep.subr.bf16.mxu1 %v6724_v32  ;;  %v6734_v41 = vld [vmem:[%s9776_s9 + $0xc8] ss:$20 sps:$4 sm:$0xff]   ;;  %v6737_v42 = vld [vmem:[%s9776_s9 + $0xd0] ss:$20 sps:$4 sm:$0xff]  }
 0x1d2   : > { %7022 = vrcp.f32 %v959_v33  ;;  %v960_v37 = vadd.f32 1.0, %v7009_v34  ;;  %v863_v5 = vadd.f32 %v862_v50, %v736_v49  ;;  %v929_v14 = vadd.f32 %v910_v10, %v861_v1  ;;  %v6725_v33 = vld [vmem:[%s9776_s9 + $0x120] ss:$20 sps:$4 sm:$0xff]   ;;  %v6727_v34 = vld [vmem:[%s9776_s9 + $0x124] ss:$20 sps:$4 sm:$0xff]   ;;  %1598 = vmatpush1.bf16.msra.mxu1 %v6722_v31 }
 0x1d3   : > { %v7011_v38 = vpop.eup %7010  ;;  %v738_v59 = vpop.f32.mrf.mxu1  ;;  %1650 = vmatprep.subr.bf16.mxu0 %v6727_v34  ;;  %1599 = vmatprep.subr.bf16.mxu1 %v6730_v35  ;;  %v6746_v49 = vld [vmem:[%s9776_s9 + $0x78] ss:$20 sps:$4 sm:$0xff]   ;;  %v6749_v50 = vld [vmem:[%s9776_s9 + $0x80] ss:$20 sps:$4 sm:$0xff]   ;;  %v6758_v57 = vld [vmem:[%s9776_s9 + $0x28] ss:$20 sps:$4 sm:$0xff]  }
 0x1d4   : > { %7024 = vrcp.f32 %v960_v37  ;;  %v961_v39 = vadd.f32 1.0, %v7011_v38  ;;  %v930_v15 = vadd.f32 %v910_v10, %v863_v5  ;;  %v865_v16 = vadd.f32 %v864_v60, %v738_v59  ;;  %v6728_v37 = vld [vmem:[%s9776_s9 + $0xf0] ss:$20 sps:$4 sm:$0xff]   ;;  %1651 = vmatpush1.bf16.msra.mxu0 %v6725_v33  ;;  %v6731_v38 = vld [vmem:[%s9776_s9 + $0xf8] ss:$20 sps:$4 sm:$0xff]  }
 0x1d5   : > { %v7013_v40 = vpop.eup %7012  ;;  %v740_v8 = vpop.f32.mrf.mxu1  ;;  %1652 = vmatprep.subr.bf16.mxu0 %v6733_v36  ;;  %v1007_v60 = vld [vmem:[%s9773_s6 + $0x8] sm:$0xff]  ;;  %v1008_v5 = vld [vmem:[%s9773_s6 + $0x10] sm:$0xff]  ;;  %v1029_v34 = vld [vmem:[%s9774_s7] sm:$0xff] }
 0x1d6   : > { %7026 = vrcp.f32 %v961_v39  ;;  %v962_v43 = vadd.f32 1.0, %v7013_v40  ;;  %v867_v17 = vadd.f32 %v866_v9, %v740_v8  ;;  %v931_v24 = vadd.f32 %v915_v23, %v865_v16  ;;  %v6736_v39 = vld [vmem:[%s9776_s9 + $0xcc] ss:$20 sps:$4 sm:$0xff]   ;;  %v6739_v40 = vld [vmem:[%s9776_s9 + $0xd4] ss:$20 sps:$4 sm:$0xff]   ;;  %1600 = vmatpush1.bf16.msra.mxu1 %v6728_v37  ;;  %v1032_v36 = vld [vmem:[%s9774_s7 + $0x18] sm:$0xff] }
 0x1d7   : > { %v7015_v44 = vpop.eup %7014  ;;  %1601 = vmatprep.subr.bf16.mxu1 %v6736_v39  ;;  %v1030_v33 = vld [vmem:[%s9774_s7 + $0x8] sm:$0xff]  ;;  %v1031_v37 = vld [vmem:[%s9774_s7 + $0x10] sm:$0xff] }
 0x1d8   : > { %7028 = vrcp.f32 %v962_v43  ;;  %v963_v46 = vadd.f32 1.0, %v7015_v44  ;;  %v932_v25 = vadd.f32 %v915_v23, %v867_v17  ;;  %1653 = vmatpush1.bf16.msra.mxu0 %v6731_v38  ;;  %v6742_v43 = vld [vmem:[%s9776_s9 + $0xa4] ss:$20 sps:$4 sm:$0xff]   ;;  %v6745_v44 = vld [vmem:[%s9776_s9 + $0xac] ss:$20 sps:$4 sm:$0xff]  }
 0x1d9   : > { %v7017_v48 = vpop.eup %7016  ;;  %1654 = vmatprep.subr.bf16.mxu0 %v6739_v40 }
 0x1da   : > { %7030 = vrcp.f32 %v963_v46  ;;  %v964_v52 = vadd.f32 1.0, %v7017_v48  ;;  %1602 = vmatpush1.bf16.msra.mxu1 %v6734_v41  ;;  %v6743_v46 = vld [vmem:[%s9776_s9 + $0xa8] ss:$20 sps:$4 sm:$0xff]   ;;  %v6751_v48 = vld [vmem:[%s9776_s9 + $0x84] ss:$20 sps:$4 sm:$0xff]  }
 0x1db   : > { %v7019_v53 = vpop.eup %7018  ;;  %1603 = vmatprep.subr.bf16.mxu1 %v6742_v43 }
 0x1dc   : > { %7032 = vrcp.f32 %v964_v52  ;;  %v7605_v61 = vmul.f32 %v7019_v53, %v925_v54  ;;  %1655 = vmatpush1.bf16.msra.mxu0 %v6737_v42  ;;  %v6757_v52 = vld [vmem:[%s9776_s9 + $0x5c] ss:$20 sps:$4 sm:$0xff]   ;;  %v6755_v54 = vld [vmem:[%s9776_s9 + $0x58] ss:$20 sps:$4 sm:$0xff]  }
 0x1dd   : > { %v7021_v58 = vpop.eup %7020  ;;  %1656 = vmatprep.subr.bf16.mxu0 %v6745_v44  ;;  %v6752_v53 = vld [vmem:[%s9776_s9 + $0x50] ss:$20 sps:$4 sm:$0xff]  }
 0x1de   : > { %v7607_v62 = vmul.f32 %v7021_v58, %v926_v55  ;;  %1604 = vmatpush1.bf16.msra.mxu1 %v6740_v45  ;;  %v6760_v55 = vld [vmem:[%s9776_s9 + $0x2c] ss:$20 sps:$4 sm:$0xff]   ;;  %v6761_v58 = vld [vmem:[%s9776_s9 + $0x30] ss:$20 sps:$4 sm:$0xff]  }
 0x1df   : > { %v7023_v63 = vpop.eup %7022  ;;  %1605 = vmatprep.subr.bf16.mxu1 %v6748_v47  ;;  %v6764_v47 = vld [vmem:[%s9776_s9] ss:$20 sps:$4 sm:$0xff]  }
 0x1e0   : > { %v989_v6 = vadd.f32 %v7607_v62, %v7605_v61  ;;  %v7611_v11 = vmul.f32 %v7023_v63, %v927_v3  ;;  %1657 = vmatpush1.bf16.msra.mxu0 %v6743_v46  ;;  %v1006_v3 = vld [vmem:[%s9773_s6] sm:$0xff] }
 0x1e1   : > { %v7025_v7 = vpop.eup %7024  ;;  %1658 = vmatprep.subr.bf16.mxu0 %v6751_v48  ;;  %v6766_v46 = vld [vmem:[%s9776_s9 + $0x4] ss:$20 sps:$4 sm:$0xff]   ;;  %v6769_v48 = vld [vmem:[%s9776_s9 + $0xc] ss:$20 sps:$4 sm:$0xff]  }
 0x1e2   : > { %990 = vadd.xlane.f32.xlu0 %v989_v6  ;;  %v7613_v12 = vmul.f32 %v7025_v7, %v928_v4  ;;  %1606 = vmatpush1.bf16.msra.mxu1 %v6746_v49  ;;  %v6767_v49 = vld [vmem:[%s9776_s9 + $0x8] ss:$20 sps:$4 sm:$0xff]  }
 0x1e3   : > { %v7027_v13 = vpop.eup %7026  ;;  %1607 = vmatprep.subr.bf16.mxu1 %v6754_v51  ;;  %v6770_v51 = vld [vmem:[%s9776_s9 + $0x258] ss:$20 sps:$4 sm:$0xff]  }
 0x1e4   : > { %v992_v18 = vadd.f32 %v7613_v12, %v7611_v11  ;;  %v7617_v20 = vmul.f32 %v7027_v13, %v929_v14  ;;  %1659 = vmatpush1.bf16.msra.mxu0 %v6749_v50  ;;  %v1009_v13 = vld [vmem:[%s9773_s6 + $0x18] sm:$0xff] }
 0x1e5   : > { %v7029_v19 = vpop.eup %7028  ;;  %1660 = vmatprep.subr.bf16.mxu0 %v6757_v52  ;;  %v6772_v50 = vld [vmem:[%s9776_s9 + $0x25c] ss:$20 sps:$4 sm:$0xff]   ;;  %v6775_v52 = vld [vmem:[%s9776_s9 + $0x264] ss:$20 sps:$4 sm:$0xff]  }
 0x1e6   : > { %993 = vadd.xlane.f32.xlu1 %v992_v18  ;;  %v7619_v21 = vmul.f32 %v7029_v19, %v930_v15  ;;  %1608 = vmatpush1.bf16.msra.mxu1 %v6752_v53  ;;  %v6773_v53 = vld [vmem:[%s9776_s9 + $0x260] ss:$20 sps:$4 sm:$0xff]  }
 0x1e7   : > { %v7031_v22 = vpop.eup %7030  ;;  %1609 = vmatprep.subr.bf16.mxu1 %v6760_v55  ;;  %v6776_v55 = vld [vmem:[%s9776_s9 + $0x230] ss:$20 sps:$4 sm:$0xff]  }
 0x1e8   : > { %v995_v26 = vadd.f32 %v7619_v21, %v7617_v20  ;;  %v7623_v28 = vmul.f32 %v7031_v22, %v931_v24  ;;  %1661 = vmatpush1.bf16.msra.mxu0 %v6755_v54  ;;  %v6778_v54 = vld [vmem:[%s9776_s9 + $0x234] ss:$20 sps:$4 sm:$0xff]  }
 0x1e9   : > { %v7033_v27 = vpop.eup %7032  ;;  %1662 = vmatprep.subr.bf16.mxu0 %v6763_v56  ;;  %v6781_v56 = vld [vmem:[%s9776_s9 + $0x23c] ss:$20 sps:$4 sm:$0xff]  }
 0x1ea   : > { %996 = vadd.xlane.f32.xlu0 %v995_v26  ;;  %v7625_v29 = vmul.f32 %v7033_v27, %v932_v25  ;;  %1610 = vmatpush1.bf16.msra.mxu1 %v6758_v57  ;;  %v6779_v57 = vld [vmem:[%s9776_s9 + $0x238] ss:$20 sps:$4 sm:$0xff]  }
 0x1eb   : > { %1611 = vmatprep.subr.bf16.mxu1 %v6766_v46 }
 0x1ec   : > { %v998_v30 = vadd.f32 %v7625_v29, %v7623_v28  ;;  %1663 = vmatpush1.bf16.msra.mxu0 %v6761_v58  ;;  %v6784_v58 = vld [vmem:[%s9776_s9 + $0x20c] ss:$20 sps:$4 sm:$0xff]  }
 0x1ed   : > { %1664 = vmatprep.subr.bf16.mxu0 %v6769_v48 }
 0x1ee   : > { %999 = vadd.xlane.f32.xlu0 %v998_v30  ;;  %1612 = vmatpush1.bf16.msra.mxu1 %v6764_v47 }
 0x1ef   : > { %1613 = vmatprep.subr.bf16.mxu1 %v6772_v50 }
 0x1f0   : > { %1665 = vmatpush1.bf16.msra.mxu0 %v6767_v49 }
 0x1f1   : > { %1666 = vmatprep.subr.bf16.mxu0 %v6775_v52 }
 0x1f2   : > { %1614 = vmatpush2.bf16.msra.mxu1 %v6770_v51 }
 0x1f3   : > { %1615 = vmatprep.subr.bf16.mxu1 %v6778_v54  ;;  %v6819_v54 = vld [vmem:[%s9776_s9 + $0x128] ss:$20 sps:$4 sm:$0xff]  }
 0x1f4   : > { %1667 = vmatpush2.bf16.msra.mxu0 %v6773_v53 }
 0x1f5   : > { %1668 = vmatprep.subr.bf16.mxu0 %v6781_v56 }
 0x1f6   : > { %1616 = vmatpush2.bf16.msra.mxu1 %v6776_v55  ;;  %v6836_v55 = vld [vmem:[%s9777_s10 + $0x38] sm:$0xff]  }
 0x1f7   : > { %1617 = vmatprep.subr.bf16.mxu1 %v6784_v58  ;;  %v6840_v58 = vld [vmem:[%s9777_s10 + $0x30] sm:$0xff]  }
 0x1f8   : > { %1669 = vmatpush2.bf16.msra.mxu0 %v6779_v57 }
 0x26b   : > { %v991_v59 = vpop.xlane.xlu0 %990 }
 0x26c   : > { %v1002_v0 = vmul.f32 0.00390625, %v991_v59  ;;  %v6782_v59 = vld [vmem:[%s9776_s9 + $0x208] ss:$20 sps:$4 sm:$0xff]  }
 0x26d   : > { %1618 = vmatpush2.bf16.msra.mxu1 %v6782_v59 }
 0x26e   : > { %v1010_v7 = vmul.f32 %v1006_v3, %v1002_v0  ;;  %v6790_v0 = vld [vmem:[%s9776_s9 + $0x1e4] ss:$20 sps:$4 sm:$0xff]   ;;  %v6793_v3 = vld [vmem:[%s9776_s9 + $0x1ec] ss:$20 sps:$4 sm:$0xff]  }
 0x26f   : > { %v994_v63 = vpop.xlane.xlu1 %993  ;;  %1619 = vmatprep.subr.bf16.mxu1 %v6790_v0  ;;  %v6823_v0 = vld [vmem:[%s9776_s9 + $0xd8] ss:$20 sps:$4 sm:$0xff]  }
 0x270   : > { %v1003_v1 = vmul.f32 0.00390625, %v994_v63  ;;  %v1015_v15 = vsel %vm1014_vm5, %v1010_v7, 0.0  ;;  %v6785_v63 = vld [vmem:[%s9776_s9 + $0x210] ss:$20 sps:$4 sm:$0xff]  }
 0x271   : > { %v6799_v7 = vld [vmem:[%s9776_s9 + $0x1c4] ss:$20 sps:$4 sm:$0xff]  }
 0x272   : > { %v1011_v4 = vmul.f32 %v1007_v60, %v1003_v1  ;;  %v6787_v60 = vld [vmem:[%s9776_s9 + $0x214] ss:$20 sps:$4 sm:$0xff]  }
 0x273   : > { %v997_v6 = vpop.xlane.xlu0 %996  ;;  %1670 = vmatprep.subr.bf16.mxu0 %v6787_v60  ;;  %v6788_v1 = vld [vmem:[%s9776_s9 + $0x1e0] ss:$20 sps:$4 sm:$0xff]  }
 0x274   : > { %v1004_v8 = vmul.f32 0.00390625, %v997_v6  ;;  %v1016_v9 = vsel %vm1014_vm5, %v1011_v4, 0.0  ;;  %1671 = vmatpush2.bf16.msra.mxu0 %v6785_v63  ;;  %v6791_v4 = vld [vmem:[%s9776_s9 + $0x1e8] ss:$20 sps:$4 sm:$0xff]   ;;  %1620 = vmatpush2.bf16.msra.mxu1 %v6788_v1  ;;  %v6794_v6 = vld [vmem:[%s9776_s9 + $0x1b8] ss:$20 sps:$4 sm:$0xff]  }
 0x275   : > { %v1017_v18 = vadd.f32 %v1016_v9, %v1015_v15  ;;  %1672 = vmatprep.subr.bf16.mxu0 %v6793_v3  ;;  %v6800_v9 = vld [vmem:[%s9776_s9 + $0x190] ss:$20 sps:$4 sm:$0xff]   ;;  %v6808_v15 = vld [vmem:[%s9776_s9 + $0x16c] ss:$20 sps:$4 sm:$0xff]  }
 0x276   : > { %v1012_v10 = vmul.f32 %v1008_v5, %v1004_v8  ;;  %v6796_v5 = vld [vmem:[%s9776_s9 + $0x1bc] ss:$20 sps:$4 sm:$0xff]   ;;  %v6797_v8 = vld [vmem:[%s9776_s9 + $0x1c0] ss:$20 sps:$4 sm:$0xff]   ;;  %v6842_v63 = vld [vmem:[%s9777_s10 + $0x68] sm:$0xff]  }
 0x277   : > { %v1000_v14 = vpop.xlane.xlu0 %999  ;;  %1621 = vmatprep.subr.bf16.mxu1 %v6796_v5  ;;  %v6846_v3 = vld [vmem:[%s9777_s10 + $0x60] sm:$0xff]   ;;  %v6826_v5 = vld [vmem:[%s9776_s9 + $0x1c8] ss:$20 sps:$4 sm:$0xff]  }
 0x278   : > { %v1018_v16 = vsel %vm1014_vm5, %v1012_v10, 0.0  ;;  %v1005_v17 = vmul.f32 0.00390625, %v1000_v14  ;;  %1673 = vmatpush2.bf16.msra.mxu0 %v6791_v4  ;;  %1622 = vmatpush2.bf16.msra.mxu1 %v6794_v6  ;;  %v6802_v10 = vld [vmem:[%s9776_s9 + $0x194] ss:$20 sps:$4 sm:$0xff]   ;;  %v6805_v14 = vld [vmem:[%s9776_s9 + $0x19c] ss:$20 sps:$4 sm:$0xff]  }
 0x279   : > { %v1019_v22 = vadd.f32 %v1018_v16, %v1017_v18  ;;  %1674 = vmatprep.subr.bf16.mxu0 %v6799_v7  ;;  %1623 = vmatprep.subr.bf16.mxu1 %v6802_v10  ;;  %v6811_v16 = vld [vmem:[%s9776_s9 + $0x174] ss:$20 sps:$4 sm:$0xff]   ;;  %v6809_v18 = vld [vmem:[%s9776_s9 + $0x170] ss:$20 sps:$4 sm:$0xff]   ;;  %v6850_v7 = vld [vmem:[%s9777_s10 + $0x58] sm:$0xff]  }
 0x27a   : > { %v1013_v19 = vmul.f32 %v1009_v13, %v1005_v17  ;;  %v6803_v13 = vld [vmem:[%s9776_s9 + $0x198] ss:$20 sps:$4 sm:$0xff]   ;;  %v6806_v17 = vld [vmem:[%s9776_s9 + $0x168] ss:$20 sps:$4 sm:$0xff]   ;;  %v6825_v4 = vld [vmem:[%s9776_s9 + $0xb0] ss:$20 sps:$4 sm:$0xff]  }
 0x27b   : > { %v6848_v6 = vld [vmem:[%s9777_s10 + $0x20] sm:$0xff]   ;;  %v6852_v10 = vld [vmem:[%s9777_s10 + $0x18] sm:$0xff]  }
 0x27c   : > { %v1020_v23 = vsel %vm1014_vm5, %v1013_v19, 0.0  ;;  %1675 = vmatpush2.bf16.msra.mxu0 %v6797_v8  ;;  %1624 = vmatpush2.bf16.msra.mxu1 %v6800_v9  ;;  %v6814_v19 = vld [vmem:[%s9776_s9 + $0x144] ss:$20 sps:$4 sm:$0xff]   ;;  %v6827_v8 = vld [vmem:[%s9776_s9 + $0x88] ss:$20 sps:$4 sm:$0xff]  }
 0x27d   : > { %v1021_v24 = vadd.f32 %v1020_v23, %v1019_v22  ;;  %1676 = vmatprep.subr.bf16.mxu0 %v6805_v14  ;;  %1625 = vmatprep.subr.bf16.mxu1 %v6808_v15  ;;  %v6817_v22 = vld [vmem:[%s9776_s9 + $0x14c] ss:$20 sps:$4 sm:$0xff]  }
 0x27e   : > { %v6812_v23 = vld [vmem:[%s9776_s9 + $0x140] ss:$20 sps:$4 sm:$0xff]   ;;  %v6830_v14 = vld [vmem:[%s9776_s9 + $0x178] ss:$20 sps:$4 sm:$0xff]  }
 0x27f   : > { %v1022_v25 = vrot.slane %v1021_v24, 4  ;;  %v6828_v9 = vld [vmem:[%s9776_s9 + $0x1a0] ss:$20 sps:$4 sm:$0xff]   ;;  %v6831_v15 = vld [vmem:[%s9776_s9 + $0x38] ss:$20 sps:$4 sm:$0xff]  }
 0x280   : > { %1677 = vmatpush2.bf16.msra.mxu0 %v6803_v13  ;;  %1626 = vmatpush2.bf16.msra.mxu1 %v6806_v17  ;;  %v6829_v13 = vld [vmem:[%s9776_s9 + $0x60] ss:$20 sps:$4 sm:$0xff]   ;;  %v6833_v17 = vld [vmem:[%s9776_s9 + $0x10] ss:$20 sps:$4 sm:$0xff]  }
 0x281   : > { %v1023_v26 = vadd.f32 %v1022_v25, %v1021_v24  ;;  %1678 = vmatprep.subr.bf16.mxu0 %v6811_v16  ;;  %1627 = vmatprep.subr.bf16.mxu1 %v6814_v19  ;;  %v6815_v24 = vld [vmem:[%s9776_s9 + $0x148] ss:$20 sps:$4 sm:$0xff]   ;;  %v6832_v16 = vld [vmem:[%s9776_s9 + $0x150] ss:$20 sps:$4 sm:$0xff]  }
 0x282   : > { %v6818_v25 = vld [vmem:[%s9776_s9 + $0x268] ss:$20 sps:$4 sm:$0xff]  }
 0x283   : > { %v1024_v27 = vrot.slane %v1023_v26, 2  ;;  %v6837_v19 = vld [vmem:[%s9777_s10 + $0xb8] sm:$0xff]  }
 0x284   : > { %1679 = vmatpush2.bf16.msra.mxu0 %v6809_v18  ;;  %1628 = vmatpush2.bf16.msra.mxu1 %v6812_v23  ;;  %v6835_v18 = vld [vmem:[%s9777_s10 + $0xf8] sm:$0xff]   ;;  %v6841_v23 = vld [vmem:[%s9777_s10 + $0xb0] sm:$0xff]  }
 0x285   : > { %v1025_v30 = vadd.f32 %v1024_v27, %v1023_v26  ;;  %1680 = vmatprep.subr.bf16.mxu0 %v6817_v22  ;;  %6254 = vmatprep.subr.bf16.mxu1 %v6818_v25  ;;  %v6834_v26 = vld [vmem:[%s9777_s10 + $0x78] sm:$0xff]   ;;  %v6839_v22 = vld [vmem:[%s9777_s10 + $0xf0] sm:$0xff]   ;;  %v6845_v25 = vld [vmem:[%s9777_s10 + $0xa8] sm:$0xff]  }
 0x287   : > { %v1026_v31 = vrot.slane %v1025_v30, 1 }
 0x288   : > { %1681 = vmatpush2.bf16.msra.mxu0 %v6815_v24  ;;  %v6843_v24 = vld [vmem:[%s9777_s10 + $0xe8] sm:$0xff]  }
 0x289   : > { %v1027_v32 = vadd.f32 %v1026_v31, %v1025_v30  ;;  %6282 = vmatprep.subr.bf16.mxu0 %v6834_v26  ;;  %v6847_v26 = vld [vmem:[%s9777_s10 + $0xe0] sm:$0xff]  }
 0x28b   : > { %v1028_v35 = vmax.f32 %v1027_v32, 0.0 }
 0x28d   : > { %v1034_v38 = vmul.f32 %v1030_v33, %v1028_v35  ;;  %v1033_v39 = vmul.f32 %v1029_v34, %v1028_v35  ;;  %v1036_v42 = vmul.f32 %v1032_v36, %v1028_v35  ;;  %v1035_v43 = vmul.f32 %v1031_v37, %v1028_v35 }
 0x28f   : > { %v1040_v40 = vsel %vm1014_vm5, %v1034_v38, 0.0  ;;  %v1037_v41 = vsel %vm1014_vm5, %v1033_v39, 0.0  ;;  %v1046_v44 = vsel %vm1014_vm5, %v1036_v42, 0.0  ;;  %v1043_v45 = vsel %vm1014_vm5, %v1035_v43, 0.0 }
 0x290   : > { %1041 = vadd.xlane.f32.xlu0 %v1040_v40  ;;  %1038 = vadd.xlane.f32.xlu1 %v1037_v41 }
 0x294   : > { %1047 = vadd.xlane.f32.xlu0 %v1046_v44  ;;  %1044 = vadd.xlane.f32.xlu1 %v1043_v45 }
 0x319   : > { %v1042_v27 = vpop.xlane.xlu0 %1041  ;;  %v1039_v30 = vpop.xlane.xlu1 %1038 }
 0x31a   : > { %v5860_v31 = vmul.f32 -1.442695, %v1042_v27  ;;  %v5859_v32 = vmul.f32 -1.442695, %v1039_v30  ;;  %v6849_v27 = vld [vmem:[%s9777_s10 + $0xa0] sm:$0xff]   ;;  %v6851_v30 = vld [vmem:[%s9777_s10 + $0xd8] sm:$0xff]  }
 0x31c   : > { %7034 = vpow2.f32 %v5860_v31  ;;  %v6853_v31 = vld [vmem:[%s9777_s10 + $0x98] sm:$0xff]  }
 0x31d   : > { %7036 = vpow2.f32 %v5859_v32  ;;  %v1048_v33 = vpop.xlane.xlu0 %1047  ;;  %v1045_v34 = vpop.xlane.xlu1 %1044  ;;  %v6854_v32 = vld [vmem:[%s9777_s10 + $0x50] sm:$0xff]  }
 0x31e   : > { %v5862_v35 = vmul.f32 -1.442695, %v1048_v33  ;;  %v5861_v36 = vmul.f32 -1.442695, %v1045_v34  ;;  %v6855_v33 = vld [vmem:[%s9777_s10 + $0xd0] sm:$0xff]  }
 0x31f   : > { %v6856_v34 = vld [vmem:[%s9777_s10 + $0x10] sm:$0xff]  }
 0x320   : > { %7038 = vpow2.f32 %v5862_v35  ;;  %v6857_v35 = vld [vmem:[%s9777_s10 + $0x90] sm:$0xff]  }
 0x321   : > { %7040 = vpow2.f32 %v5861_v36  ;;  %v6858_v36 = vld [vmem:[%s9777_s10 + $0x48] sm:$0xff]  }
 0x329   : > { %v7035_v37 = vpop.eup %7034 }
 0x32a   : > { %v7037_v38 = vpop.eup %7036  ;;  %v1062_v39 = vadd.f32 1.0, %v7035_v37  ;;  %v6859_v37 = vld [vmem:[%s9777_s10 + $0xc8] sm:$0xff]  }
 0x32b   : > { %v1061_v40 = vadd.f32 1.0, %v7037_v38  ;;  %v6860_v38 = vld [vmem:[%s9777_s10 + $0x8] sm:$0xff]  }
 0x32c   : > { %7042 = vrcp.f32 %v1062_v39  ;;  %v6861_v39 = vld [vmem:[%s9777_s10 + $0x88] sm:$0xff]  }
 0x32d   : > { %v7039_v41 = vpop.eup %7038  ;;  %7044 = vrcp.f32 %v1061_v40  ;;  %v6862_v40 = vld [vmem:[%s9777_s10 + $0x40] sm:$0xff]  }
 0x32e   : > { %v7041_v42 = vpop.eup %7040  ;;  %v1064_v43 = vadd.f32 1.0, %v7039_v41  ;;  %v6863_v41 = vld [vmem:[%s9777_s10 + $0xc0] sm:$0xff]  }
 0x32f   : > { %v1063_v44 = vadd.f32 1.0, %v7041_v42  ;;  %v6864_v42 = vld [vmem:[%s9777_s10] sm:$0xff]  }
 0x330   : > { %7046 = vrcp.f32 %v1064_v43  ;;  %v6865_v43 = vld [vmem:[%s9777_s10 + $0x80] sm:$0xff]  }
 0x331   : > { %7048 = vrcp.f32 %v1063_v44  ;;  %v6866_v44 = vld [vmem:[%s9777_s10 + $0x118] sm:$0xff]  }
 0x339   : > { %v7043_v45 = vpop.eup %7042 }
 0x33a   : > { %v7045_v46 = vpop.eup %7044  ;;  %v1076_v47 = vmul.f32 %v7043_v45, %v7613_v12  ;;  %v1075_v48 = vmul.f32 %v7043_v45, %v7611_v11 }
 0x33b   : > { %v1074_v49 = vmul.f32 %v7045_v46, %v7607_v62  ;;  %v1073_v50 = vmul.f32 %v7045_v46, %v7605_v61  ;;  %v6820_v62 = vld [vmem:[%s9776_s9 + $0x240] ss:$20 sps:$4 sm:$0xff]  }
 0x33c   : > { %v6838_v61 = vld [vmem:[%s9777_s10 + $0x70] sm:$0xff]  }
 0x33d   : > { %v7047_v51 = vpop.eup %7046  ;;  %v1082_v52 = vpack.c.bf16 %v1076_v47, %v1074_v49  ;;  %v7863_v53 = vpack.c.bf16 %v1075_v48, %v1073_v50  ;;  %v1753_v49 = vld [vmem:[%s9775_s8 + $0x8] sm:$0xff] }
 0x33e   : > { %v7049_v56 = vpop.eup %7048  ;;  %v1080_v12 = vmul.f32 %v7047_v51, %v7625_v29  ;;  %v6821_v29 = vld [vmem:[%s9776_s9 + $0x100] ss:$20 sps:$4 sm:$0xff]   ;;  %v1079_v60 = vmul.f32 %v7047_v51, %v7623_v28  ;;  %v6844_v28 = vld [vmem:[%s9777_s10 + $0x28] sm:$0xff]   ;;  %v1759_v51 = vld [vmem:[%s9775_s8 + $0x38] sm:$0xff] }
 0x33f   : > { %1629 = vmatprep.mubr.bf16.mxu1 %v1082_v52  ;;  %1682 = vmatprep.mubr.bf16.mxu0 %v1082_v52  ;;  %v1078_v11 = vmul.f32 %v7049_v56, %v7619_v21  ;;  %v6822_v21 = vld [vmem:[%s9776_s9 + $0x218] ss:$20 sps:$4 sm:$0xff]   ;;  %v1077_v59 = vmul.f32 %v7049_v56, %v7617_v20  ;;  %v6824_v20 = vld [vmem:[%s9776_s9 + $0x1f0] ss:$20 sps:$4 sm:$0xff]  }
 0x340   : > { %1630 = vmatmul.mubr.bf16.vlgmr.msra.gmra.mxu1 %v7863_v53  ;;  %1683 = vmatmul.mubr.bf16.vlgmr.msra.gmra.mxu0 %v7863_v53  ;;  %v1757_v50 = vld [vmem:[%s9775_s8 + $0x28] sm:$0xff]  ;;  %v1760_v56 = vld [vmem:[%s9775_s8 + $0x40] sm:$0xff] }
 0x341   : > { %6255 = vmatpush3.bf16.msra.mxu1 %v6819_v54  ;;  %v1084_v57 = vpack.c.bf16 %v1080_v12, %v1078_v11  ;;  %6283 = vmatpush3.bf16.msra.mxu0 %v6836_v55  ;;  %v1083_v1 = vpack.c.bf16 %v1079_v60, %v1077_v59  ;;  %v1758_v55 = vld [vmem:[%s9775_s8 + $0x30] sm:$0xff]  ;;  %v1752_v12 = vld [vmem:[%s9775_s8] sm:$0xff] }
 0x342   : > { %6256 = vmatprep.subr.bf16.mxu1 %v6820_v62  ;;  %6284 = vmatprep.subr.bf16.mxu0 %v6838_v61  ;;  %v1754_v62 = vld [vmem:[%s9775_s8 + $0x10] sm:$0xff] }
 0x343   : > { %1639 = vmatprep.mubr.bf16.mxu1 %v1084_v57  ;;  %1692 = vmatprep.mubr.bf16.mxu0 %v1084_v57 }
 0x345   : > { %6257 = vmatpush3.bf16.msra.mxu1 %v6821_v29  ;;  %6285 = vmatpush3.bf16.msra.mxu0 %v6840_v58 }
 0x346   : > { %6258 = vmatprep.subr.bf16.mxu1 %v6822_v21  ;;  %6286 = vmatprep.subr.bf16.mxu0 %v6842_v63 }
 0x348   : > { %1640 = vmatmul.mubr.bf16.gmra.mxu1 %v1083_v1  ;;  %1693 = vmatmul.mubr.bf16.gmra.mxu0 %v1083_v1 }
 0x349   : > { %6259 = vmatpush3.bf16.msra.mxu1 %v6823_v0  ;;  %1735 = vmatprep.mubr.bf16.mxu1 %v1082_v52  ;;  %v1755_v52 = vld [vmem:[%s9775_s8 + $0x18] sm:$0xff] }
 0x34a   : > { %6260 = vmatprep.subr.bf16.mxu1 %v6824_v20  ;;  %6287 = vmatpush3.bf16.msra.mxu0 %v6844_v28 }
 0x34b   : > { %6288 = vmatprep.subr.bf16.mxu0 %v6846_v3 }
 0x34d   : > { %6261 = vmatpush3.bf16.msra.mxu1 %v6825_v4 }
 0x34e   : > { %6262 = vmatprep.subr.bf16.mxu1 %v6826_v5  ;;  %6289 = vmatpush3.bf16.msra.mxu0 %v6848_v6 }
 0x34f   : > { %6290 = vmatprep.subr.bf16.mxu0 %v6850_v7 }
 0x351   : > { %6263 = vmatpush3.bf16.msra.mxu1 %v6827_v8  ;;  %v6867_v8 = vld [vmem:[%s9777_s10 + $0x110] sm:$0xff]  }
 0x352   : > { %6264 = vmatprep.subr.bf16.mxu1 %v6828_v9  ;;  %6291 = vmatpush3.bf16.msra.mxu0 %v6852_v10  ;;  %v1763_v9 = vld [vmem:[%s9775_s8 + $0x58] sm:$0xff] }
 0x353   : > { %6292 = vmatprep.subr.bf16.mxu0 %v6854_v32  ;;  %v1767_v10 = vld [vmem:[%s9775_s8 + $0x78] sm:$0xff] }
 0x355   : > { %6265 = vmatpush3.bf16.msra.mxu1 %v6829_v13  ;;  %v1769_v13 = vld [vmem:[%s9775_s8 + $0x88] sm:$0xff] }
 0x356   : > { %6266 = vmatprep.subr.bf16.mxu1 %v6830_v14  ;;  %6293 = vmatpush3.bf16.msra.mxu0 %v6856_v34  ;;  %v1765_v14 = vld [vmem:[%s9775_s8 + $0x68] sm:$0xff] }
 0x357   : > { %6294 = vmatprep.subr.bf16.mxu0 %v6858_v36 }
 0x359   : > { %6267 = vmatpush3.bf16.msra.mxu1 %v6831_v15 }
 0x35a   : > { %6268 = vmatprep.subr.bf16.mxu1 %v6832_v16  ;;  %6295 = vmatpush3.bf16.msra.mxu0 %v6860_v38 }
 0x35b   : > { %6296 = vmatprep.subr.bf16.mxu0 %v6862_v40  ;;  %v6869_v40 = vld [vmem:[%s9777_s10 + $0x100] sm:$0xff]  }
 0x35d   : > { %6269 = vmatpush3.bf16.msra.mxu1 %v6833_v17  ;;  %v1768_v17 = vld [vmem:[%s9775_s8 + $0x80] sm:$0xff] }
 0x35e   : > { %6310 = vmatprep.subr.bf16.mxu1 %v6835_v18  ;;  %6297 = vmatpush3.bf16.msra.mxu0 %v6864_v42  ;;  %v1770_v18 = vld [vmem:[%s9775_s8 + $0x90] sm:$0xff] }
 0x35f   : > { %6442 = vmatprep.subr.bf16.mxu0 %v6866_v44 }
 0x360   : > { %1736 = vmatmul.mubr.bf16.vlgmr.msra.gmra.mxu1 %v7863_v53 }
 0x361   : > { %1743 = vmatprep.mubr.bf16.mxu1 %v1084_v57  ;;  %6311 = vmatpush3.bf16.msra.mxu1 %v6837_v19  ;;  %v1762_v19 = vld [vmem:[%s9775_s8 + $0x50] sm:$0xff] }
 0x362   : > { %6312 = vmatprep.subr.bf16.mxu1 %v6839_v22  ;;  %v1764_v22 = vld [vmem:[%s9775_s8 + $0x60] sm:$0xff] }
 0x365   : > { %6313 = vmatpush3.bf16.msra.mxu1 %v6841_v23 }
 0x366   : > { %6314 = vmatprep.subr.bf16.mxu1 %v6843_v24 }
 0x368   : > { %1744 = vmatmul.mubr.bf16.gmra.mxu1 %v1083_v1 }
 0x369   : > { %6315 = vmatpush3.bf16.msra.mxu1 %v6845_v25 }
 0x36a   : > { %6316 = vmatprep.subr.bf16.mxu1 %v6847_v26 }
 0x36d   : > { %6317 = vmatpush3.bf16.msra.mxu1 %v6849_v27  ;;  %v6868_v27 = vld [vmem:[%s9777_s10 + $0x108] sm:$0xff]  }
 0x36e   : > { %6318 = vmatprep.subr.bf16.mxu1 %v6851_v30 }
 0x371   : > { %6319 = vmatpush3.bf16.msra.mxu1 %v6853_v31 }
 0x372   : > { %6320 = vmatprep.subr.bf16.mxu1 %v6855_v33 }
 0x375   : > { %6321 = vmatpush3.bf16.msra.mxu1 %v6857_v35 }
 0x376   : > { %6322 = vmatprep.subr.bf16.mxu1 %v6859_v37 }
 0x379   : > { %6323 = vmatpush3.bf16.msra.mxu1 %v6861_v39 }
 0x37a   : > { %6324 = vmatprep.subr.bf16.mxu1 %v6863_v41 }
 0x37d   : > { %6325 = vmatpush3.bf16.msra.mxu1 %v6865_v43 }
 0x400   : > { %v1631_v45 = vpop.f32.mrf.mxu1  ;;  %v1684_v46 = vpop.f32.mrf.mxu0 }
 0x401   : > { %v1772_v63 = vmul.f32 %v1752_v12, %v1631_v45  ;;  %v1774_v0 = vmul.f32 %v1754_v62, %v1684_v46  ;;  %v1756_v45 = vld [vmem:[%s9775_s8 + $0x20] sm:$0xff]  ;;  %v1771_v62 = vld [vmem:[%s9775_s8 + $0x98] sm:$0xff] }
 0x402   : > { %v1633_v47 = vpop.f32.mrf.mxu1  ;;  %v1686_v48 = vpop.f32.mrf.mxu0 }
 0x403   : > { %v1773_v58 = vmul.f32 %v1753_v49, %v1633_v47  ;;  %v1775_v21 = vmul.f32 %v1755_v52, %v1686_v48  ;;  %v1761_v47 = vld [vmem:[%s9775_s8 + $0x48] sm:$0xff] }
 0x404   : > { %v1635_v53 = vpop.f32.mrf.mxu1  ;;  %v1688_v54 = vpop.f32.mrf.mxu0 }
 0x405   : > { %v1777_v61 = vmul.f32 %v1757_v50, %v1635_v53  ;;  %v1779_v11 = vmul.f32 %v1759_v51, %v1688_v54 }
 0x406   : > { %v1637_v57 = vpop.f32.mrf.mxu1  ;;  %v1690_v29 = vpop.f32.mrf.mxu0 }
 0x407   : > { %v1778_v59 = vmul.f32 %v1758_v55, %v1637_v57  ;;  %v1780_v60 = vmul.f32 %v1760_v56, %v1690_v29  ;;  %v1792_v4 = vpack.c.bf16 %v1777_v61, %v1772_v63  ;;  %v1794_v5 = vpack.c.bf16 %v1779_v11, %v1774_v0  ;;  %v1766_v56 = vld [vmem:[%s9775_s8 + $0x70] sm:$0xff] }
 0x408   : > { %v1641_v1 = vpop.f32.mrf.mxu1  ;;  %v1694_v20 = vpop.f32.mrf.mxu0 }
 0x409   : > { %v1793_v28 = vpack.c.bf16 %v1778_v59, %v1773_v58  ;;  %v1795_v3 = vpack.c.bf16 %v1780_v60, %v1775_v21  ;;  %v1782_v34 = vmul.f32 %v1762_v19, %v1641_v1  ;;  %v1784_v35 = vmul.f32 %v1764_v22, %v1694_v20  ;;  %v6870_v58 = vld [vmem:[%s9778_s11] sm:$0xff]  }
 0x40a   : > { %v1643_v6 = vpop.f32.mrf.mxu1  ;;  %v1696_v7 = vpop.f32.mrf.mxu0 }
 0x40b   : > { %2128 = vmatprep.mubr.bf16.mxu0 %v1793_v28  ;;  %2177 = vmatprep.mubr.bf16.mxu1 %v1795_v3  ;;  %v1783_v30 = vmul.f32 %v1763_v9, %v1643_v6  ;;  %v1785_v31 = vmul.f32 %v1765_v14, %v1696_v7 }
 0x40c   : > { %v1645_v15 = vpop.f32.mrf.mxu1  ;;  %v1698_v16 = vpop.f32.mrf.mxu0  ;;  %2129 = vmatmul.mubr.bf16.vlgmr.msra.gmra.mxu0 %v1792_v4  ;;  %2178 = vmatmul.mubr.bf16.vlgmr.msra.gmra.mxu1 %v1794_v5 }
 0x40d   : > { %6443 = vmatpush3.bf16.msra.mxu0 %v6866_v44  ;;  %v1787_v23 = vmul.f32 %v1767_v10, %v1645_v15  ;;  %v1789_v24 = vmul.f32 %v1769_v13, %v1698_v16 }
 0x40e   : > { %v1647_v25 = vpop.f32.mrf.mxu1  ;;  %v1700_v26 = vpop.f32.mrf.mxu0  ;;  %6444 = vmatprep.subr.bf16.mxu0 %v6867_v8 }
 0x40f   : > { %v1788_v32 = vmul.f32 %v1768_v17, %v1647_v25  ;;  %v1790_v33 = vmul.f32 %v1770_v18, %v1700_v26  ;;  %v1797_v38 = vpack.c.bf16 %v1787_v23, %v1782_v34  ;;  %v1799_v39 = vpack.c.bf16 %v1789_v24, %v1784_v35 }
 0x411   : > { %v1798_v36 = vpack.c.bf16 %v1788_v32, %v1783_v30  ;;  %v1800_v37 = vpack.c.bf16 %v1790_v33, %v1785_v31  ;;  %6445 = vmatpush3.bf16.msra.mxu0 %v6867_v8 }
 0x412   : > { %6446 = vmatprep.subr.bf16.mxu0 %v6868_v27 }
 0x413   : > { %2136 = vmatprep.mubr.bf16.mxu0 %v1798_v36  ;;  %2185 = vmatprep.mubr.bf16.mxu1 %v1800_v37 }
 0x414   : > { %2137 = vmatmul.mubr.bf16.gmra.mxu0 %v1797_v38  ;;  %2186 = vmatmul.mubr.bf16.gmra.mxu1 %v1799_v39  ;;  %v6871_v39 = vld [vmem:[%s9778_s11 + $0x8] sm:$0xff]  }
 0x415   : > { %6447 = vmatpush3.bf16.msra.mxu0 %v6868_v27 }
 0x416   : > { %6448 = vmatprep.subr.bf16.mxu0 %v6869_v40 }
 0x419   : > { %6449 = vmatpush3.bf16.msra.mxu0 %v6869_v40  ;;  %v6872_v40 = vld [vmem:[%s9778_s11 + $0x10] sm:$0xff]  }
 0x420   : > { %v6270_v41 = vpop.f32.mrf.mxu1 }
 0x422   : > { %v6271_v42 = vpop.f32.mrf.mxu1 }
 0x423   : > { %v6272_v44 = vadd.f32 %v6271_v42, %v6270_v41  ;;  %v6873_v41 = vld [vmem:[%s9778_s11 + $0x18] sm:$0xff]  }
 0x424   : > { %v6273_v43 = vpop.f32.mrf.mxu1 }
 0x425   : > { %v1776_v50 = vmul.f32 %v6272_v44, %v1756_v45 }
 0x426   : > { %v6274_v46 = vpop.f32.mrf.mxu1 }
 0x427   : > { %v6275_v48 = vadd.f32 %v6274_v46, %v6273_v43 }
 0x428   : > { %v6276_v49 = vpop.f32.mrf.mxu1 }
 0x429   : > { %v1781_v51 = vmul.f32 %v6275_v48, %v1761_v47 }
 0x42a   : > { %v6277_v52 = vpop.f32.mrf.mxu1 }
 0x42b   : > { %v1796_v53 = vpack.c.bf16 %v1781_v51, %v1776_v50  ;;  %v6278_v55 = vadd.f32 %v6277_v52, %v6276_v49 }
 0x42c   : > { %v6279_v54 = vpop.f32.mrf.mxu1 }
 0x42d   : > { %6450 = vmatprep.mubr.msk.bf16.mxu0 %vm564_vm0, %v1796_v53  ;;  %v1786_v11 = vmul.f32 %v6278_v55, %v1766_v56  ;;  %v2450_v53 = vld [vmem:[%s9779_s12] sm:$0xff] }
 0x42e   : > { %v6280_v12 = vpop.f32.mrf.mxu1 }
 0x42f   : > { %v6281_v61 = vadd.f32 %v6280_v12, %v6279_v54  ;;  %v2451_v54 = vld [vmem:[%s9779_s12 + $0x8] sm:$0xff] }
 0x431   : > { %v1791_v57 = vmul.f32 %v6281_v61, %v1771_v62 }
 0x433   : > { %v1801_v29 = vpack.c.bf16 %v1791_v57, %v1786_v11  ;;  %v2452_v11 = vld [vmem:[%s9779_s12 + $0x10] sm:$0xff]  ;;  %v2453_v57 = vld [vmem:[%s9779_s12 + $0x18] sm:$0xff] }
 0x435   : > { %6451 = vmatmul.mubr.msk.bf16.vlgmr.msra.gmra.mxu0 %vm564_vm0, %v1801_v29 }
 0x436   : > { %6458 = vmatprep.mubr.msk.bf16.mxu0 %vm783_vm1, %v6870_v58 }
 0x4cc   : > { %v6298_v21 = vpop.f32.mrf.mxu0  ;;  %v6326_v59 = vpop.f32.mrf.mxu1 }
 0x4ce   : > { %v6299_v60 = vpop.f32.mrf.mxu0  ;;  %v6327_v63 = vpop.f32.mrf.mxu1 }
 0x4cf   : > { %v6300_v18 = vadd.f32 %v6299_v60, %v6298_v21  ;;  %v6328_v19 = vadd.f32 %v6327_v63, %v6326_v59  ;;  %v2454_v63 = vld [vmem:[%s9779_s12 + $0x20] sm:$0xff] }
 0x4d0   : > { %v6301_v0 = vpop.f32.mrf.mxu0  ;;  %v6329_v1 = vpop.f32.mrf.mxu1 }
 0x4d1   : > { %v2180_v31 = vadd.f32 %v6328_v19, %v6300_v18 }
 0x4d2   : > { %v6302_v20 = vpop.f32.mrf.mxu0  ;;  %v6330_v28 = vpop.f32.mrf.mxu1 }
 0x4d3   : > { %v6303_v22 = vadd.f32 %v6302_v20, %v6301_v0  ;;  %v6331_v23 = vadd.f32 %v6330_v28, %v6329_v1  ;;  %v2486_v0 = vld [vmem:[%s9779_s12 + $0x120] sm:$0xff]  ;;  %v2455_v28 = vld [vmem:[%s9779_s12 + $0x28] sm:$0xff] }
 0x4d4   : > { %v6304_v3 = vpop.f32.mrf.mxu0  ;;  %v6332_v4 = vpop.f32.mrf.mxu1  ;;  %v2494_v1 = vld [vmem:[%s9779_s12 + $0x160] sm:$0xff] }
 0x4d5   : > { %v2183_v33 = vadd.f32 %v6331_v23, %v6303_v22  ;;  %v2502_v20 = vld [vmem:[%s9779_s12 + $0x1a0] sm:$0xff] }
 0x4d6   : > { %v6305_v5 = vpop.f32.mrf.mxu0  ;;  %v6333_v6 = vpop.f32.mrf.mxu1 }
 0x4d7   : > { %v6306_v13 = vadd.f32 %v6305_v5, %v6304_v3  ;;  %v6334_v14 = vadd.f32 %v6333_v6, %v6332_v4  ;;  %v2487_v3 = vld [vmem:[%s9779_s12 + $0x128] sm:$0xff]  ;;  %v2510_v4 = vld [vmem:[%s9779_s12 + $0x1e0] sm:$0xff] }
 0x4d8   : > { %v6307_v7 = vpop.f32.mrf.mxu0  ;;  %v6335_v8 = vpop.f32.mrf.mxu1  ;;  %v2495_v5 = vld [vmem:[%s9779_s12 + $0x168] sm:$0xff] }
 0x4d9   : > { %v2188_v25 = vadd.f32 %v6334_v14, %v6306_v13  ;;  %v2503_v6 = vld [vmem:[%s9779_s12 + $0x1a8] sm:$0xff] }
 0x4da   : > { %v6308_v9 = vpop.f32.mrf.mxu0  ;;  %v6336_v10 = vpop.f32.mrf.mxu1 }
 0x4db   : > { %v6309_v15 = vadd.f32 %v6308_v9, %v6307_v7  ;;  %v6337_v16 = vadd.f32 %v6336_v10, %v6335_v8  ;;  %v2511_v7 = vld [vmem:[%s9779_s12 + $0x1e8] sm:$0xff] }
 0x4dd   : > { %v2191_v26 = vadd.f32 %v6337_v16, %v6309_v15 }
 0x4f5   : > { %v6452_v17 = vpop.f32.mrf.mxu0 }
 0x4f6   : > { %v2237_v30 = vadd.f32 %v6452_v17, %v2188_v25 }
 0x4f7   : > { %v2228_v24 = vpop.f32.mrf.mxu0 }
 0x4f8   : > { %v2229_v35 = vadd.f32 %v2228_v24, %v2180_v31  ;;  %v2459_v31 = vld [vmem:[%s9779_s12 + $0x48] sm:$0xff] }
 0x4f9   : > { %v6453_v27 = vpop.f32.mrf.mxu0 }
 0x4fa   : > { %v2240_v32 = vadd.f32 %v6453_v27, %v2191_v26 }
 0x4fb   : > { %v2231_v34 = vpop.f32.mrf.mxu0 }
 0x4fc   : > { %v2256_v36 = vpack.c.bf16 %v2240_v32, %v2237_v30  ;;  %v2232_v37 = vadd.f32 %v2231_v34, %v2183_v33  ;;  %v2456_v32 = vld [vmem:[%s9779_s12 + $0x30] sm:$0xff]  ;;  %v2457_v33 = vld [vmem:[%s9779_s12 + $0x38] sm:$0xff]  ;;  %v2458_v34 = vld [vmem:[%s9779_s12 + $0x40] sm:$0xff] }
 0x4fe   : > { %v2255_v38 = vpack.c.bf16 %v2232_v37, %v2229_v35  ;;  %6454 = vmatprep.subr.bf16.mxu0 %v2256_v36 }
 0x4ff   : > { %6455 = vmatpush3.bf16.msra.mxu0 %v2256_v36 }
 0x500   : > { %6456 = vmatprep.subr.bf16.mxu0 %v2255_v38 }
 0x503   : > { %6457 = vmatpush3.bf16.msra.mxu0 %v2255_v38 }
 0x506   : > { %6459 = vmatmul.mubr.msk.bf16.vlgmr.msra.gmra.mxu0 %vm783_vm1, %v6871_v39 }
 0x507   : > { %6462 = vmatprep.mubr.msk.bf16.mxu0 %vm783_vm1, %v6872_v40 }
 0x50e   : > { %6463 = vmatmul.mubr.msk.bf16.gmra.mxu0 %vm783_vm1, %v6873_v41 }
 0x5c6   : > { %v6460_v42 = vpop.f32.mrf.mxu0 }
 0x5c8   : > { %v2339_v43 = vpop.f32.mrf.mxu0 }
 0x5c9   : > { %2386 = vxpose.xlu1.b32.start [1/4] (short) (narrow) %v2339_v43, 64  ;;  %v2463_v43 = vld [vmem:[%s9779_s12 + $0x68] sm:$0xff] }
 0x5ca   : > { %v6461_v44 = vpop.f32.mrf.mxu0 }
 0x5cc   : > { %v2342_v45 = vpop.f32.mrf.mxu0 }
 0x5cd   : > { %2387 = vxpose.xlu1.b32.cont [2/4] (short) (narrow) %v2342_v45, 64 }
 0x5ce   : > { %v6464_v46 = vpop.f32.mrf.mxu0 }
 0x5d0   : > { %v2355_v47 = vpop.f32.mrf.mxu0 }
 0x5d1   : > { %2388 = vxpose.xlu1.b32.cont [3/4] (short) (narrow) %v6460_v42, 64  ;;  %v2461_v42 = vld [vmem:[%s9779_s12 + $0x58] sm:$0xff] }
 0x5d2   : > { %v6465_v48 = vpop.f32.mrf.mxu0 }
 0x5d3   : > { %v2611_v49 = vpack.c.bf16 %v6465_v48, %v6464_v46  ;;  %v2462_v46 = vld [vmem:[%s9779_s12 + $0x60] sm:$0xff] }
 0x5d4   : > { %v2358_v50 = vpop.f32.mrf.mxu0 }
 0x5d5   : > { %2389 = vxpose.xlu1.b32.end [4/4] (short) (narrow) %v6461_v44, 64  ;;  %6470 = vmatprep.subr.bf16.mxu1 %v2611_v49  ;;  %v2610_v51 = vpack.c.bf16 %v2358_v50, %v2355_v47  ;;  %v2460_v44 = vld [vmem:[%s9779_s12 + $0x50] sm:$0xff] }
 0x5d6   : > { %6471 = vmatpush3.bf16.msra.mxu1 %v2611_v49 }
 0x5d7   : > { %6472 = vmatprep.subr.bf16.mxu1 %v2610_v51 }
 0x5da   : > { %6473 = vmatpush3.bf16.msra.mxu1 %v2610_v51 }
 0x645   : > { %v8100_v52 = vpop.trf.xlu1 }
 0x646   : > { %v2514_v56 = vmul.f32 %v2450_v53, %v8100_v52  ;;  %v2522_v39 = vmul.f32 %v2458_v34, %v8100_v52  ;;  %v2465_v53 = vld [vmem:[%s9779_s12 + $0x78] sm:$0xff] }
 0x649   : > { %v8108_v55 = vpop.trf.xlu1 }
 0x64a   : > { %v2515_v12 = vmul.f32 %v2451_v54, %v8108_v55  ;;  %v2523_v36 = vmul.f32 %v2459_v31, %v8108_v55  ;;  %v2467_v54 = vld [vmem:[%s9779_s12 + $0x88] sm:$0xff] }
 0x64c   : > { %v2578_v62 = vpack.c.bf16 %v2515_v12, %v2514_v56  ;;  %v2582_v41 = vpack.c.bf16 %v2523_v36, %v2522_v39  ;;  %v2464_v56 = vld [vmem:[%s9779_s12 + $0x70] sm:$0xff]  ;;  %v2477_v39 = vld [vmem:[%s9779_s12 + $0xd8] sm:$0xff] }
 0x64d   : > { %v8112_v61 = vpop.trf.xlu1 }
 0x64e   : > { %6474 = vmatprep.mubr.msk.bf16.mxu1 %vm783_vm1, %v2578_v62  ;;  %v2516_v58 = vmul.f32 %v2452_v11, %v8112_v61  ;;  %v2524_v48 = vmul.f32 %v2460_v44, %v8112_v61  ;;  %v2466_v62 = vld [vmem:[%s9779_s12 + $0x80] sm:$0xff]  ;;  %v2531_v11 = vmul.f32 %v2467_v54, %v8108_v55 }
 0x651   : > { %v8121_v29 = vpop.trf.xlu1 }
 0x652   : > { %v2517_v21 = vmul.f32 %v2453_v57, %v8121_v29  ;;  %v2525_v45 = vmul.f32 %v2461_v42, %v8121_v29  ;;  %v2541_v42 = vmul.f32 %v2477_v39, %v8121_v29 }
 0x654   : > { %v2579_v59 = vpack.c.bf16 %v2517_v21, %v2516_v58  ;;  %v2583_v50 = vpack.c.bf16 %v2525_v45, %v2524_v48  ;;  %v2530_v58 = vmul.f32 %v2466_v62, %v8100_v52 }
 0x655   : > { %v8125_v60 = vpop.trf.xlu1 }
 0x656   : > { %6475 = vmatmul.mubr.msk.bf16.vlgmr.msra.gmra.mxu1 %vm783_vm1, %v2579_v59  ;;  %v2518_v9 = vmul.f32 %v2454_v63, %v8125_v60  ;;  %v8162_v10 = vmul.f32 %v2486_v0, %v8125_v60  ;;  %v8166_v14 = vmul.f32 %v2494_v1, %v8125_v60  ;;  %v8169_v15 = vmul.f32 %v2502_v20, %v8125_v60  ;;  %v2469_v63 = vld [vmem:[%s9779_s12 + $0x98] sm:$0xff]  ;;  %v2471_v0 = vld [vmem:[%s9779_s12 + $0xa8] sm:$0xff]  ;;  %v2468_v1 = vld [vmem:[%s9779_s12 + $0x90] sm:$0xff] }
 0x657   : > { %v8172_v16 = vmul.f32 %v2510_v4, %v8125_v60  ;;  %v2526_v49 = vmul.f32 %v2462_v46, %v8125_v60  ;;  %v2586_v59 = vpack.c.bf16 %v2531_v11, %v2530_v58  ;;  %v2533_v20 = vmul.f32 %v2469_v63, %v8121_v29  ;;  %v2485_v11 = vld [vmem:[%s9779_s12 + $0x118] sm:$0xff] }
 0x658   : > { %v2532_v4 = vmul.f32 %v2468_v1, %v8112_v61  ;;  %v2549_v58 = vmul.f32 %v2485_v11, %v8121_v29  ;;  %v2489_v63 = vld [vmem:[%s9779_s12 + $0x138] sm:$0xff]  ;;  %v2488_v1 = vld [vmem:[%s9779_s12 + $0x130] sm:$0xff] }
 0x659   : > { %v8158_v8 = vpop.trf.xlu1 }
 0x65a   : > { %v2519_v13 = vmul.f32 %v2455_v28, %v8158_v8  ;;  %v8175_v17 = vmul.f32 %v2487_v3, %v8158_v8  ;;  %v8178_v18 = vmul.f32 %v2495_v5, %v8158_v8  ;;  %v8181_v19 = vmul.f32 %v2503_v6, %v8158_v8  ;;  %v2470_v28 = vld [vmem:[%s9779_s12 + $0xa0] sm:$0xff] }
 0x65b   : > { %v8184_v22 = vmul.f32 %v2511_v7, %v8158_v8  ;;  %v2527_v47 = vmul.f32 %v2463_v43, %v8158_v8  ;;  %v2535_v3 = vmul.f32 %v2471_v0, %v8158_v8  ;;  %v2534_v5 = vmul.f32 %v2470_v28, %v8125_v60  ;;  %v2478_v43 = vld [vmem:[%s9779_s12 + $0xe0] sm:$0xff]  ;;  %v2491_v0 = vld [vmem:[%s9779_s12 + $0x148] sm:$0xff] }
 0x65c   : > { %v2580_v23 = vpack.c.bf16 %v2519_v13, %v2518_v9  ;;  %v2596_v25 = vpack.c.bf16 %v8175_v17, %v8162_v10  ;;  %v2600_v26 = vpack.c.bf16 %v8178_v18, %v8166_v14  ;;  %v2604_v27 = vpack.c.bf16 %v8181_v19, %v8169_v15  ;;  %v2473_v9 = vld [vmem:[%s9779_s12 + $0xb8] sm:$0xff]  ;;  %v2475_v13 = vld [vmem:[%s9779_s12 + $0xc8] sm:$0xff]  ;;  %v2490_v28 = vld [vmem:[%s9779_s12 + $0x140] sm:$0xff] }
 0x65d   : > { %v8186_v24 = vpop.trf.xlu1  ;;  %v2608_v30 = vpack.c.bf16 %v8184_v22, %v8172_v16  ;;  %v2584_v51 = vpack.c.bf16 %v2527_v47, %v2526_v49  ;;  %v2587_v6 = vpack.c.bf16 %v2533_v20, %v2532_v4  ;;  %v2588_v7 = vpack.c.bf16 %v2535_v3, %v2534_v5  ;;  %v2481_v49 = vld [vmem:[%s9779_s12 + $0xf8] sm:$0xff]  ;;  %v6875_v19 = vld [vmem:[%s9778_s11 + $0x28] sm:$0xff]  }
 0x65e   : > { %6478 = vmatprep.mubr.msk.bf16.mxu1 %vm783_vm1, %v2580_v23  ;;  %v2520_v37 = vmul.f32 %v2456_v32, %v8186_v24  ;;  %v2528_v57 = vmul.f32 %v2464_v56, %v8186_v24  ;;  %v2472_v23 = vld [vmem:[%s9779_s12 + $0xb0] sm:$0xff]  ;;  %v2474_v32 = vld [vmem:[%s9779_s12 + $0xc0] sm:$0xff]  ;;  %v2542_v46 = vmul.f32 %v2478_v43, %v8125_v60  ;;  %v2555_v3 = vmul.f32 %v2491_v0, %v8108_v55  ;;  %v2493_v17 = vld [vmem:[%s9779_s12 + $0x158] sm:$0xff] }
 0x65f   : > { %v2536_v34 = vmul.f32 %v2472_v23, %v8186_v24  ;;  %v2538_v36 = vmul.f32 %v2474_v32, %v8100_v52  ;;  %v2552_v4 = vmul.f32 %v2488_v1, %v8186_v24  ;;  %v2554_v5 = vmul.f32 %v2490_v28, %v8100_v52  ;;  %v2497_v23 = vld [vmem:[%s9779_s12 + $0x178] sm:$0xff]  ;;  %v2496_v32 = vld [vmem:[%s9779_s12 + $0x170] sm:$0xff] }
 0x660   : > { %v2501_v18 = vld [vmem:[%s9779_s12 + $0x198] sm:$0xff] }
 0x661   : > { %v8209_v35 = vpop.trf.xlu1  ;;  %v2598_v10 = vpack.c.bf16 %v2555_v3, %v2554_v5  ;;  %v2505_v43 = vld [vmem:[%s9779_s12 + $0x1b8] sm:$0xff] }
 0x662   : > { %v2521_v38 = vmul.f32 %v2457_v33, %v8209_v35  ;;  %v2529_v12 = vmul.f32 %v2465_v53, %v8209_v35  ;;  %v2537_v31 = vmul.f32 %v2473_v9, %v8209_v35  ;;  %v2539_v33 = vmul.f32 %v2475_v13, %v8108_v55 }
 0x663   : > { %v2545_v60 = vmul.f32 %v2481_v49, %v8209_v35  ;;  %v2553_v20 = vmul.f32 %v2489_v63, %v8209_v35 }
 0x664   : > { %v2581_v40 = vpack.c.bf16 %v2521_v38, %v2520_v37  ;;  %v2585_v21 = vpack.c.bf16 %v2529_v12, %v2528_v57  ;;  %v2589_v37 = vpack.c.bf16 %v2537_v31, %v2536_v34  ;;  %v2590_v38 = vpack.c.bf16 %v2539_v33, %v2538_v36  ;;  %v2484_v57 = vld [vmem:[%s9779_s12 + $0x110] sm:$0xff]  ;;  %v2499_v31 = vld [vmem:[%s9779_s12 + $0x188] sm:$0xff]  ;;  %v2498_v34 = vld [vmem:[%s9779_s12 + $0x180] sm:$0xff] }
 0x665   : > { %v2561_v33 = vmul.f32 %v2497_v23, %v8209_v35  ;;  %v2563_v36 = vmul.f32 %v2499_v31, %v8108_v55 }
 0x666   : > { %6479 = vmatmul.mubr.msk.bf16.gmra.mxu1 %vm783_vm1, %v2581_v40  ;;  %v2479_v40 = vld [vmem:[%s9779_s12 + $0xe8] sm:$0xff] }
 0x667   : > { %6482 = vmatprep.mubr.msk.bf16.mxu1 %vm783_vm1, %v2582_v41  ;;  %v2476_v41 = vld [vmem:[%s9779_s12 + $0xd0] sm:$0xff]  ;;  %v2543_v44 = vmul.f32 %v2479_v40, %v8158_v8  ;;  %v2565_v40 = vmul.f32 %v2501_v18, %v8121_v29 }
 0x668   : > { %v2540_v45 = vmul.f32 %v2476_v41, %v8112_v61  ;;  %v2480_v8 = vld [vmem:[%s9779_s12 + $0xf0] sm:$0xff] }
 0x669   : > { %v2592_v48 = vpack.c.bf16 %v2543_v44, %v2542_v46  ;;  %v2544_v54 = vmul.f32 %v2480_v8, %v8186_v24  ;;  %v2507_v44 = vld [vmem:[%s9779_s12 + $0x1c8] sm:$0xff]  ;;  %v2569_v46 = vmul.f32 %v2505_v43, %v8209_v35 }
 0x66a   : > { %v2591_v47 = vpack.c.bf16 %v2541_v42, %v2540_v45  ;;  %v2504_v45 = vld [vmem:[%s9779_s12 + $0x1b0] sm:$0xff]  ;;  %v2571_v49 = vmul.f32 %v2507_v44, %v8108_v55 }
 0x66b   : > { %v2593_v12 = vpack.c.bf16 %v2545_v60, %v2544_v54  ;;  %v2568_v15 = vmul.f32 %v2504_v45, %v8186_v24  ;;  %v2509_v60 = vld [vmem:[%s9779_s12 + $0x1d8] sm:$0xff] }
 0x66c   : > { %v2513_v54 = vld [vmem:[%s9779_s12 + $0x1f8] sm:$0xff] }
 0x66e   : > { %6483 = vmatmul.mubr.msk.bf16.gmra.mxu1 %vm783_vm1, %v2583_v50  ;;  %v2483_v50 = vld [vmem:[%s9779_s12 + $0x108] sm:$0xff] }
 0x66f   : > { %6486 = vmatprep.mubr.msk.bf16.mxu1 %vm783_vm1, %v2584_v51  ;;  %v2482_v51 = vld [vmem:[%s9779_s12 + $0x100] sm:$0xff]  ;;  %v2547_v53 = vmul.f32 %v2483_v50, %v8108_v55  ;;  %v2605_v50 = vpack.c.bf16 %v2569_v46, %v2568_v15  ;;  %v2508_v55 = vld [vmem:[%s9779_s12 + $0x1d0] sm:$0xff] }
 0x670   : > { %v2546_v56 = vmul.f32 %v2482_v51, %v8100_v52  ;;  %v2573_v51 = vmul.f32 %v2509_v60, %v8121_v29 }
 0x672   : > { %v2594_v62 = vpack.c.bf16 %v2547_v53, %v2546_v56  ;;  %v2512_v56 = vld [vmem:[%s9779_s12 + $0x1f0] sm:$0xff] }
 0x676   : > { %6487 = vmatmul.mubr.msk.bf16.gmra.mxu1 %vm783_vm1, %v2585_v21  ;;  %v2548_v21 = vmul.f32 %v2484_v57, %v8112_v61 }
 0x677   : > { %6490 = vmatprep.mubr.msk.bf16.mxu1 %vm783_vm1, %v2586_v59 }
 0x678   : > { %v2595_v59 = vpack.c.bf16 %v2549_v58, %v2548_v21 }
 0x67e   : > { %6491 = vmatmul.mubr.msk.bf16.gmra.mxu1 %vm783_vm1, %v2587_v6  ;;  %v2597_v6 = vpack.c.bf16 %v2553_v20, %v2552_v4 }
 0x67f   : > { %6494 = vmatprep.mubr.msk.bf16.mxu1 %vm783_vm1, %v2588_v7  ;;  %v2557_v7 = vmul.f32 %v2493_v17, %v8121_v29  ;;  %v2577_v29 = vmul.f32 %v2513_v54, %v8209_v35 }
 0x686   : > { %6495 = vmatmul.mubr.msk.bf16.gmra.mxu1 %vm783_vm1, %v2589_v37  ;;  %v2560_v37 = vmul.f32 %v2496_v32, %v8186_v24 }
 0x687   : > { %6498 = vmatprep.mubr.msk.bf16.mxu1 %vm783_vm1, %v2590_v38  ;;  %v2562_v38 = vmul.f32 %v2498_v34, %v8100_v52 }
 0x688   : > { %v2601_v39 = vpack.c.bf16 %v2561_v33, %v2560_v37 }
 0x689   : > { %v2602_v14 = vpack.c.bf16 %v2563_v36, %v2562_v38 }
 0x68e   : > { %6499 = vmatmul.mubr.msk.bf16.gmra.mxu1 %vm783_vm1, %v2591_v47  ;;  %v2506_v47 = vld [vmem:[%s9779_s12 + $0x1c0] sm:$0xff] }
 0x68f   : > { %6502 = vmatprep.mubr.msk.bf16.mxu1 %vm783_vm1, %v2592_v48  ;;  %v6874_v48 = vld [vmem:[%s9778_s11 + $0x20] sm:$0xff]  }
 0x690   : > { %6466 = vmatprep.mubr.msk.bf16.mxu0 %vm783_vm1, %v6874_v48 }
 0x691   : > { %6467 = vmatmul.mubr.msk.bf16.gmra.mxu0 %vm783_vm1, %v6875_v19 }
 0x696   : > { %6503 = vmatmul.mubr.msk.bf16.gmra.mxu1 %vm783_vm1, %v2593_v12 }
 0x697   : > { %6506 = vmatprep.mubr.msk.bf16.mxu1 %vm783_vm1, %v2594_v62 }
 0x69e   : > { %6507 = vmatmul.mubr.msk.bf16.gmra.mxu1 %vm783_vm1, %v2595_v59 }
 0x69f   : > { %6510 = vmatprep.mubr.msk.bf16.mxu1 %vm783_vm1, %v2596_v25  ;;  %v2492_v25 = vld [vmem:[%s9779_s12 + $0x150] sm:$0xff] }
 0x6a0   : > { %v2556_v9 = vmul.f32 %v2492_v25, %v8112_v61 }
 0x6a2   : > { %v2599_v13 = vpack.c.bf16 %v2557_v7, %v2556_v9 }
 0x6a6   : > { %6511 = vmatmul.mubr.msk.bf16.gmra.mxu1 %vm783_vm1, %v2597_v6 }
 0x6a7   : > { %6514 = vmatprep.mubr.msk.bf16.mxu1 %vm783_vm1, %v2598_v10 }
 0x6ae   : > { %6515 = vmatmul.mubr.msk.bf16.gmra.mxu1 %vm783_vm1, %v2599_v13 }
 0x6af   : > { %6518 = vmatprep.mubr.msk.bf16.mxu1 %vm783_vm1, %v2600_v26  ;;  %v2500_v26 = vld [vmem:[%s9779_s12 + $0x190] sm:$0xff] }
 0x6b0   : > { %v2564_v41 = vmul.f32 %v2500_v26, %v8112_v61 }
 0x6b2   : > { %v2603_v42 = vpack.c.bf16 %v2565_v40, %v2564_v41 }
 0x6b6   : > { %6519 = vmatmul.mubr.msk.bf16.gmra.mxu1 %vm783_vm1, %v2601_v39 }
 0x6b7   : > { %6522 = vmatprep.mubr.msk.bf16.mxu1 %vm783_vm1, %v2602_v14 }
 0x6be   : > { %6523 = vmatmul.mubr.msk.bf16.gmra.mxu1 %vm783_vm1, %v2603_v42 }
 0x6bf   : > { %6526 = vmatprep.mubr.msk.bf16.mxu1 %vm783_vm1, %v2604_v27  ;;  %v2570_v27 = vmul.f32 %v2506_v47, %v8100_v52  ;;  %v2572_v52 = vmul.f32 %v2508_v55, %v8112_v61  ;;  %v2576_v61 = vmul.f32 %v2512_v56, %v8186_v24 }
 0x6c1   : > { %v2606_v8 = vpack.c.bf16 %v2571_v49, %v2570_v27  ;;  %v2607_v53 = vpack.c.bf16 %v2573_v51, %v2572_v52  ;;  %v2609_v12 = vpack.c.bf16 %v2577_v29, %v2576_v61 }
 0x6c6   : > { %6527 = vmatmul.mubr.msk.bf16.gmra.mxu1 %vm783_vm1, %v2605_v50 }
 0x6c7   : > { %6530 = vmatprep.mubr.msk.bf16.mxu1 %vm783_vm1, %v2606_v8 }
 0x6ce   : > { %6531 = vmatmul.mubr.msk.bf16.gmra.mxu1 %vm783_vm1, %v2607_v53 }
 0x6cf   : > { %6534 = vmatprep.mubr.msk.bf16.mxu1 %vm783_vm1, %v2608_v30 }
 0x6d6   : > { %6535 = vmatmul.mubr.msk.bf16.gmra.mxu1 %vm783_vm1, %v2609_v12 }
 0x716   : > { %v8448_v62 = vpop.f32.mrf.mxu1 }
 0x717   : > { %v3003_v11 = vsel %vm564_vm0, %v8448_v62, -inf }
 0x718   : > { %3004 = vmax.xlane.f32.xlu0 %v3003_v11  ;;  %v8452_v16 = vpop.f32.mrf.mxu1 }
 0x719   : > { %v2997_v22 = vsel %vm564_vm0, %v8452_v16, -inf }
 0x71a   : > { %v8456_v30 = vpop.f32.mrf.mxu1 }
 0x71b   : > { %v3006_v24 = vsel %vm564_vm0, %v8456_v30, -inf }
 0x71c   : > { %2998 = vmax.xlane.f32.xlu0 %v2997_v22  ;;  %v8460_v35 = vpop.f32.mrf.mxu1 }
 0x71d   : > { %v3000_v57 = vsel %vm564_vm0, %v8460_v35, -inf }
 0x720   : > { %3007 = vmax.xlane.f32.xlu0 %v3006_v24 }
 0x724   : > { %3001 = vmax.xlane.f32.xlu0 %v3000_v57 }
 0x726   : > { %v8464_v58 = vpop.f32.mrf.mxu1 }
 0x727   : > { %v3015_v21 = vsel %vm564_vm0, %v8464_v58, -inf }
 0x728   : > { %3016 = vmax.xlane.f32.xlu0 %v3015_v21  ;;  %v8468_v59 = vpop.f32.mrf.mxu1 }
 0x729   : > { %v3009_v0 = vsel %vm564_vm0, %v8468_v59, -inf }
 0x72a   : > { %v8470_v63 = vpop.f32.mrf.mxu1 }
 0x72b   : > { %v3018_v28 = vsel %vm564_vm0, %v8470_v63, -inf }
 0x72c   : > { %3010 = vmax.xlane.f32.xlu0 %v3009_v0  ;;  %v8474_v1 = vpop.f32.mrf.mxu1 }
 0x72d   : > { %v3012_v5 = vsel %vm564_vm0, %v8474_v1, -inf }
 0x72e   : > { %v8476_v20 = vpop.f32.mrf.mxu1 }
 0x72f   : > { %v3027_v17 = vsel %vm564_vm0, %v8476_v20, -inf }
 0x730   : > { %3019 = vmax.xlane.f32.xlu0 %v3018_v28  ;;  %v8480_v3 = vpop.f32.mrf.mxu1 }
 0x731   : > { %v3021_v9 = vsel %vm564_vm0, %v8480_v3, -inf }
 0x732   : > { %v8482_v4 = vpop.f32.mrf.mxu1 }
 0x733   : > { %v3030_v31 = vsel %vm564_vm0, %v8482_v4, -inf }
 0x734   : > { %3013 = vmax.xlane.f32.xlu0 %v3012_v5  ;;  %v8486_v6 = vpop.f32.mrf.mxu1 }
 0x735   : > { %v3024_v36 = vsel %vm564_vm0, %v8486_v6, -inf }
 0x736   : > { %v8488_v10 = vpop.f32.mrf.mxu1 }
 0x737   : > { %v3039_v39 = vsel %vm564_vm0, %v8488_v10, -inf }
 0x738   : > { %3028 = vmax.xlane.f32.xlu0 %v3027_v17  ;;  %v8492_v25 = vpop.f32.mrf.mxu1 }
 0x739   : > { %v3033_v26 = vsel %vm564_vm0, %v8492_v25, -inf }
 0x73a   : > { %v8494_v7 = vpop.f32.mrf.mxu1 }
 0x73b   : > { %v3042_v42 = vsel %vm564_vm0, %v8494_v7, -inf }
 0x73c   : > { %3022 = vmax.xlane.f32.xlu0 %v3021_v9  ;;  %v8498_v13 = vpop.f32.mrf.mxu1 }
 0x73d   : > { %v3036_v45 = vsel %vm564_vm0, %v8498_v13, -inf }
 0x73e   : > { %v8500_v23 = vpop.f32.mrf.mxu1 }
 0x73f   : > { %v3051_v48 = vsel %vm564_vm0, %v8500_v23, -inf }
 0x740   : > { %3031 = vmax.xlane.f32.xlu0 %v3030_v31  ;;  %v8504_v32 = vpop.f32.mrf.mxu1 }
 0x741   : > { %v3045_v33 = vsel %vm564_vm0, %v8504_v32, -inf }
 0x742   : > { %3046 = vmax.xlane.f32.xlu1 %v3045_v33  ;;  %v8508_v34 = vpop.f32.mrf.mxu1 }
 0x743   : > { %v3054_v27 = vsel %vm564_vm0, %v8508_v34, -inf }
 0x744   : > { %3025 = vmax.xlane.f32.xlu0 %v3024_v36  ;;  %v8512_v37 = vpop.f32.mrf.mxu1 }
 0x745   : > { %v3048_v60 = vsel %vm564_vm0, %v8512_v37, -inf }
 0x746   : > { %v8514_v38 = vpop.f32.mrf.mxu1 }
 0x747   : > { %v3063_v53 = vsel %vm564_vm0, %v8514_v38, -inf }
 0x748   : > { %3040 = vmax.xlane.f32.xlu0 %v3039_v39  ;;  %v8518_v14 = vpop.f32.mrf.mxu1 }
 0x749   : > { %v3057_v61 = vsel %vm564_vm0, %v8518_v14, -inf }
 0x74a   : > { %v8520_v18 = vpop.f32.mrf.mxu1 }
 0x74b   : > { %v3066_v24 = vsel %vm564_vm0, %v8520_v18, -inf }
 0x74c   : > { %3034 = vmax.xlane.f32.xlu0 %v3033_v26  ;;  %v8524_v40 = vpop.f32.mrf.mxu1 }
 0x74d   : > { %v3060_v28 = vsel %vm564_vm0, %v8524_v40, -inf }
 0x74e   : > { %v8526_v41 = vpop.f32.mrf.mxu1 }
 0x74f   : > { %v3075_v31 = vsel %vm564_vm0, %v8526_v41, -inf }
 0x750   : > { %3043 = vmax.xlane.f32.xlu0 %v3042_v42  ;;  %v8530_v43 = vpop.f32.mrf.mxu1 }
 0x751   : > { %v3069_v26 = vsel %vm564_vm0, %v8530_v43, -inf }
 0x752   : > { %v8532_v44 = vpop.f32.mrf.mxu1 }
 0x754   : > { %3037 = vmax.xlane.f32.xlu0 %v3036_v45  ;;  %v8536_v46 = vpop.f32.mrf.mxu1 }
 0x756   : > { %v8538_v47 = vpop.f32.mrf.mxu1 }
 0x757   : > { %v3087_v49 = vsel %vm564_vm0, %v8538_v47, -inf }
 0x758   : > { %3052 = vmax.xlane.f32.xlu0 %v3051_v48  ;;  %3088 = vmax.xlane.f32.xlu1 %v3087_v49  ;;  %v8544_v15 = vpop.f32.mrf.mxu1  ;;  %v3078_v49 = vsel %vm564_vm0, %v8532_v44, -inf }
 0x75a   : > { %v8546_v19 = vpop.f32.mrf.mxu1 }
 0x75c   : > { %3055 = vmax.xlane.f32.xlu0 %v3054_v27  ;;  %v8550_v50 = vpop.f32.mrf.mxu1 }
 0x75e   : > { %v8552_v8 = vpop.f32.mrf.mxu1 }
 0x75f   : > { %v3099_v55 = vsel %vm564_vm0, %v8552_v8, -inf }
 0x760   : > { %3049 = vmax.xlane.f32.xlu0 %v3048_v60  ;;  %3100 = vmax.xlane.f32.xlu1 %v3099_v55  ;;  %v8558_v51 = vpop.f32.mrf.mxu1 }
 0x761   : > { %v3093_v54 = vsel %vm564_vm0, %v8558_v51, -inf }
 0x762   : > { %v8560_v52 = vpop.f32.mrf.mxu1 }
 0x764   : > { %3064 = vmax.xlane.f32.xlu0 %v3063_v53  ;;  %3094 = vmax.xlane.f32.xlu1 %v3093_v54  ;;  %v8566_v56 = vpop.f32.mrf.mxu1  ;;  %v3072_v53 = vsel %vm564_vm0, %v8536_v46, -inf }
 0x766   : > { %v8568_v29 = vpop.f32.mrf.mxu1 }
 0x767   : > { %v3111_v12 = vsel %vm564_vm0, %v8568_v29, -inf }
 0x768   : > { %3058 = vmax.xlane.f32.xlu0 %v3057_v61  ;;  %3112 = vmax.xlane.f32.xlu1 %v3111_v12  ;;  %v8574_v11 = vpop.f32.mrf.mxu1 }
 0x769   : > { %v3105_v57 = vsel %vm564_vm0, %v8574_v11, -inf }
 0x76a   : > { %v8576_v22 = vpop.f32.mrf.mxu1 }
 0x76c   : > { %3067 = vmax.xlane.f32.xlu0 %v3066_v24  ;;  %3106 = vmax.xlane.f32.xlu1 %v3105_v57  ;;  %v8582_v21 = vpop.f32.mrf.mxu1  ;;  %v3081_v24 = vsel %vm564_vm0, %v8544_v15, -inf }
 0x76e   : > { %v8584_v0 = vpop.f32.mrf.mxu1 }
 0x76f   : > { %v3123_v5 = vsel %vm564_vm0, %v8584_v0, -inf }
 0x770   : > { %3061 = vmax.xlane.f32.xlu0 %v3060_v28  ;;  %3124 = vmax.xlane.f32.xlu1 %v3123_v5  ;;  %v8590_v17 = vpop.f32.mrf.mxu1 }
 0x771   : > { %v3117_v33 = vsel %vm564_vm0, %v8590_v17, -inf }
 0x772   : > { %v8592_v9 = vpop.f32.mrf.mxu1 }
 0x774   : > { %3076 = vmax.xlane.f32.xlu0 %v3075_v31  ;;  %3118 = vmax.xlane.f32.xlu1 %v3117_v33  ;;  %v8598_v36 = vpop.f32.mrf.mxu1  ;;  %v3090_v31 = vsel %vm564_vm0, %v8546_v19, -inf }
 0x776   : > { %v8600_v39 = vpop.f32.mrf.mxu1 }
 0x777   : > { %v3135_v42 = vsel %vm564_vm0, %v8600_v39, -inf }
 0x778   : > { %3070 = vmax.xlane.f32.xlu0 %v3069_v26  ;;  %3136 = vmax.xlane.f32.xlu1 %v3135_v42  ;;  %v8606_v45 = vpop.f32.mrf.mxu1 }
 0x779   : > { %v3129_v27 = vsel %vm564_vm0, %v8606_v45, -inf }
 0x77a   : > { %v8608_v48 = vpop.f32.mrf.mxu1 }
 0x77c   : > { %3079 = vmax.xlane.f32.xlu0 %v3078_v49  ;;  %3130 = vmax.xlane.f32.xlu1 %v3129_v27  ;;  %v8614_v60 = vpop.f32.mrf.mxu1  ;;  %v3084_v49 = vsel %vm564_vm0, %v8550_v50, -inf }
 0x77e   : > { %v8616_v55 = vpop.f32.mrf.mxu1 }
 0x77f   : > { %9839 = vst [vmem:[#allocation12_spill] sm:$0xff] %v8616_v55  ;;  %v3147_v54 = vsel %vm564_vm0, %v8616_v55, -inf }
 0x780   : > { %3073 = vmax.xlane.f32.xlu0 %v3072_v53  ;;  %3148 = vmax.xlane.f32.xlu1 %v3147_v54  ;;  %v8622_v61 = vpop.f32.mrf.mxu1 }
 0x781   : > { %v3141_v57 = vsel %vm564_vm0, %v8622_v61, -inf }
 0x782   : > { %v8624_v12 = vpop.f32.mrf.mxu1 }
 0x784   : > { %3082 = vmax.xlane.f32.xlu0 %v3081_v24  ;;  %3142 = vmax.xlane.f32.xlu1 %v3141_v57  ;;  %v8630_v28 = vpop.f32.mrf.mxu1  ;;  %v3102_v24 = vsel %vm564_vm0, %v8560_v52, -inf }
 0x786   : > { %v8632_v5 = vpop.f32.mrf.mxu1 }
 0x787   : > { %9840 = vst [vmem:[#allocation13_spill] sm:$0xff] %v8632_v5  ;;  %v3159_v33 = vsel %vm564_vm0, %v8632_v5, -inf }
 0x788   : > { %3091 = vmax.xlane.f32.xlu0 %v3090_v31  ;;  %3160 = vmax.xlane.f32.xlu1 %v3159_v33  ;;  %v8638_v26 = vpop.f32.mrf.mxu1  ;;  %v3096_v33 = vsel %vm564_vm0, %v8566_v56, -inf }
 0x789   : > { %9841 = vst [vmem:[#allocation14_spill] sm:$0xff] %v8638_v26  ;;  %v3153_v27 = vsel %vm564_vm0, %v8638_v26, -inf  ;;  %v3138_v26 = vsel %vm564_vm0, %v8608_v48, -inf }
 0x78a   : > { %v8640_v42 = vpop.f32.mrf.mxu1 }
 0x78c   : > { %3085 = vmax.xlane.f32.xlu0 %v3084_v49  ;;  %3154 = vmax.xlane.f32.xlu1 %v3153_v27  ;;  %v8646_v53 = vpop.f32.mrf.mxu1  ;;  %v3114_v49 = vsel %vm564_vm0, %v8576_v22, -inf  ;;  %v3108_v27 = vsel %vm564_vm0, %v8582_v21, -inf }
 0x78e   : > { %v8648_v54 = vpop.f32.mrf.mxu1 }
 0x78f   : > { %9842 = vst [vmem:[#allocation15_spill] sm:$0xff] %v8648_v54 }
 0x790   : > { %3103 = vmax.xlane.f32.xlu0 %v3102_v24  ;;  %v8652_v57 = vpop.f32.mrf.mxu1  ;;  %v3126_v24 = vsel %vm564_vm0, %v8592_v9, -inf }
 0x791   : > { %9843 = vst [vmem:[#allocation16_spill] sm:$0xff] %v8652_v57  ;;  %v3165_v31 = vsel %vm564_vm0, %v8652_v57, -inf }
 0x792   : > { %3166 = vmax.xlane.f32.xlu1 %v3165_v31  ;;  %v3120_v31 = vsel %vm564_vm0, %v8598_v36, -inf }
 0x794   : > { %3097 = vmax.xlane.f32.xlu0 %v3096_v33 }
 0x798   : > { %3115 = vmax.xlane.f32.xlu0 %v3114_v49 }
 0x79c   : > { %3109 = vmax.xlane.f32.xlu0 %v3108_v27 }
 0x7a0   : > { %3127 = vmax.xlane.f32.xlu0 %v3126_v24 }
 0x7a1   : > { %v3005_v2 = vpop.xlane.xlu0 %3004 }
 0x7a2   : > { %v3191_v57 = vsub.f32 %v8448_v62, %v3005_v2  ;;  %v3132_v2 = vsel %vm564_vm0, %v8614_v60, -inf }
 0x7a4   : > { %v3257_v5 = vmul.f32 1.442695, %v3191_v57  ;;  %3121 = vmax.xlane.f32.xlu0 %v3120_v31 }
 0x7a5   : > { %v2999_v33 = vpop.xlane.xlu0 %2998 }
 0x7a6   : > { %7050 = vpow2.f32 %v3257_v5  ;;  %v3189_v49 = vsub.f32 %v8452_v16, %v2999_v33  ;;  %v3150_v16 = vsel %vm564_vm0, %v8624_v12, -inf }
 0x7a8   : > { %v3253_v27 = vmul.f32 1.442695, %v3189_v49  ;;  %3139 = vmax.xlane.f32.xlu0 %v3138_v26 }
 0x7a9   : > { %v3008_v55 = vpop.xlane.xlu0 %3007 }
 0x7aa   : > { %7052 = vpow2.f32 %v3253_v27  ;;  %v3192_v24 = vsub.f32 %v8456_v30, %v3008_v55  ;;  %v3144_v30 = vsel %vm564_vm0, %v8630_v28, -inf }
 0x7ac   : > { %3133 = vmax.xlane.f32.xlu0 %v3132_v2  ;;  %v3259_v57 = vmul.f32 1.442695, %v3192_v24 }
 0x7ad   : > { %v3002_v62 = vpop.xlane.xlu0 %3001 }
 0x7ae   : > { %v3190_v31 = vsub.f32 %v8460_v35, %v3002_v62  ;;  %7054 = vpow2.f32 %v3259_v57  ;;  %v8688_v62 = vpop.f32.mrf.mxu1 }
 0x7af   : > { %9844 = vst [vmem:[#allocation17_spill] sm:$0xff] %v8688_v62 }
 0x7b0   : > { %3151 = vmax.xlane.f32.xlu0 %v3150_v16  ;;  %v3255_v49 = vmul.f32 1.442695, %v3190_v31 }
 0x7b1   : > { %v3017_v5 = vpop.xlane.xlu0 %3016 }
 0x7b2   : > { %v3195_v33 = vsub.f32 %v8464_v58, %v3017_v5  ;;  %v3162_v58 = vsel %vm564_vm0, %v8640_v42, -inf }
 0x7b3   : > { %v8677_v26 = vpop.eup %7050 }
 0x7b4   : > { %v3265_v55 = vmul.f32 1.442695, %v3195_v33  ;;  %3145 = vmax.xlane.f32.xlu0 %v3144_v30  ;;  %v3387_v27 = vsel %vm564_vm0, %v8677_v26, 0.0  ;;  %v8695_v33 = vpop.f32.mrf.mxu1 }
 0x7b5   : > { %v3011_v35 = vpop.xlane.xlu0 %3010  ;;  %3388 = vadd.xlane.f32.xlu1 %v3387_v27  ;;  %v3168_v27 = vsel %vm564_vm0, %v8695_v33, -inf }
 0x7b6   : > { %7056 = vpow2.f32 %v3265_v55  ;;  %v3193_v24 = vsub.f32 %v8468_v59, %v3011_v35  ;;  %v3156_v59 = vsel %vm564_vm0, %v8646_v53, -inf }
 0x7b7   : > { %v8684_v2 = vpop.eup %7052  ;;  %7058 = vpow2.f32 %v3255_v49 }
 0x7b8   : > { %v3261_v57 = vmul.f32 1.442695, %v3193_v24  ;;  %3163 = vmax.xlane.f32.xlu0 %v3162_v58  ;;  %v3381_v31 = vsel %vm564_vm0, %v8684_v2, 0.0 }
 0x7b9   : > { %v3020_v16 = vpop.xlane.xlu0 %3019  ;;  %3382 = vadd.xlane.f32.xlu1 %v3381_v31 }
 0x7ba   : > { %7060 = vpow2.f32 %v3261_v57  ;;  %v3196_v5 = vsub.f32 %v8470_v63, %v3020_v16 }
 0x7bb   : > { %v8700_v35 = vpop.eup %7054 }
 0x7bc   : > { %v3267_v49 = vmul.f32 1.442695, %v3196_v5  ;;  %3157 = vmax.xlane.f32.xlu0 %v3156_v59  ;;  %v3390_v31 = vsel %vm564_vm0, %v8700_v35, 0.0 }
 0x7bd   : > { %v3014_v30 = vpop.xlane.xlu0 %3013 }
 0x7be   : > { %7062 = vpow2.f32 %v3267_v49  ;;  %v3194_v55 = vsub.f32 %v8474_v1, %v3014_v30 }
 0x7c0   : > { %v3263_v24 = vmul.f32 1.442695, %v3194_v55  ;;  %3169 = vmax.xlane.f32.xlu0 %v3168_v27 }
 0x7c1   : > { %v3029_v58 = vpop.xlane.xlu0 %3028 }
 0x7c2   : > { %7064 = vpow2.f32 %v3263_v24  ;;  %v3199_v63 = vsub.f32 %v8476_v20, %v3029_v58 }
 0x7c3   : > { %v8703_v57 = vpop.eup %7056 }
 0x7c4   : > { %9845 = vst [vmem:[#allocation18_spill] sm:$0xff] %v8703_v57  ;;  %v8707_v16 = vpop.eup %7058  ;;  %v3273_v5 = vmul.f32 1.442695, %v3199_v63  ;;  %3391 = vadd.xlane.f32.xlu0 %v3390_v31  ;;  %v3399_v1 = vsel %vm564_vm0, %v8703_v57, 0.0 }
 0x7c5   : > { %v3023_v59 = vpop.xlane.xlu0 %3022  ;;  %3400 = vadd.xlane.f32.xlu1 %v3399_v1  ;;  %v3384_v20 = vsel %vm564_vm0, %v8707_v16, 0.0  ;;  %v8726_v1 = vpop.f32.mrf.mxu1 }
 0x7c6   : > { %7066 = vpow2.f32 %v3273_v5  ;;  %v3197_v49 = vsub.f32 %v8480_v3, %v3023_v59 }
 0x7c7   : > { %v8712_v30 = vpop.eup %7060 }
 0x7c8   : > { %9846 = vst [vmem:[#allocation19_spill] sm:$0xff] %v8712_v30  ;;  %v3269_v55 = vmul.f32 1.442695, %v3197_v49  ;;  %3385 = vadd.xlane.f32.xlu0 %v3384_v20  ;;  %v3393_v27 = vsel %vm564_vm0, %v8712_v30, 0.0 }
 0x7c9   : > { %v3032_v24 = vpop.xlane.xlu0 %3031  ;;  %3394 = vadd.xlane.f32.xlu1 %v3393_v27  ;;  %v3171_v27 = vsel %vm564_vm0, %v8648_v54, -inf }
 0x7ca   : > { %7068 = vpow2.f32 %v3269_v55  ;;  %v3200_v20 = vsub.f32 %v8482_v4, %v3032_v24  ;;  %v3174_v4 = vsel %vm564_vm0, %v8688_v62, -inf }
 0x7cb   : > { %v8718_v58 = vpop.eup %7062 }
 0x7cc   : > { %9847 = vst [vmem:[#allocation20_spill] sm:$0xff] %v8718_v58  ;;  %v3402_v63 = vsel %vm564_vm0, %v8718_v58, 0.0  ;;  %v3275_v30 = vmul.f32 1.442695, %v3200_v20 }
 0x7cd   : > { %v3026_v31 = vpop.xlane.xlu0 %3025  ;;  %3403 = vadd.xlane.f32.xlu0 %v3402_v63  ;;  %v8735_v63 = vpop.f32.mrf.mxu1 }
 0x7ce   : > { %7070 = vpow2.f32 %v3275_v30  ;;  %v3177_v20 = vsel %vm564_vm0, %v8735_v63, -inf }
 0x7cf   : > { %v8722_v3 = vpop.eup %7064  ;;  %v8744_v24 = vpop.f32.mrf.mxu1 }
 0x7d0   : > { %9848 = vst [vmem:[#allocation21_spill] sm:$0xff] %v8722_v3  ;;  %v3396_v5 = vsel %vm564_vm0, %v8722_v3, 0.0 }
 0x7d1   : > { %v3041_v59 = vpop.xlane.xlu0 %3040  ;;  %3397 = vadd.xlane.f32.xlu0 %v3396_v5  ;;  %v3198_v5 = vsub.f32 %v8486_v6, %v3026_v31 }
 0x7d3   : > { %v8728_v49 = vpop.eup %7066  ;;  %v3271_v54 = vmul.f32 1.442695, %v3198_v5 }
 0x7d4   : > { %9849 = vst [vmem:[#allocation22_spill] sm:$0xff] %v8728_v49  ;;  %v3411_v55 = vsel %vm564_vm0, %v8728_v49, 0.0 }
 0x7d5   : > { %v3035_v57 = vpop.xlane.xlu0 %3034  ;;  %3412 = vadd.xlane.f32.xlu1 %v3411_v55  ;;  %3172 = vmax.xlane.f32.xlu0 %v3171_v27  ;;  %v3203_v55 = vsub.f32 %v8488_v10, %v3041_v59  ;;  %v8749_v27 = vpop.f32.mrf.mxu1  ;;  %7072 = vpow2.f32 %v3271_v54  ;;  %v3183_v59 = vsel %vm564_vm0, %v8726_v1, -inf }
 0x7d6   : > { %v3180_v62 = vsel %vm564_vm0, %v8749_v27, -inf }
 0x7d7   : > { %v8737_v58 = vpop.eup %7068  ;;  %v3281_v31 = vmul.f32 1.442695, %v3203_v55 }
 0x7d8   : > { %9850 = vst [vmem:[#allocation23_spill] sm:$0xff] %v8737_v58  ;;  %v3405_v3 = vsel %vm564_vm0, %v8737_v58, 0.0  ;;  %v3201_v58 = vsub.f32 %v8492_v25, %v3035_v57  ;;  %v3186_v25 = vsel %vm564_vm0, %v8744_v24, -inf }
 0x7d9   : > { %v3044_v49 = vpop.xlane.xlu0 %3043  ;;  %3406 = vadd.xlane.f32.xlu1 %v3405_v3  ;;  %3175 = vmax.xlane.f32.xlu0 %v3174_v4  ;;  %7074 = vpow2.f32 %v3281_v31 }
 0x7da   : > { %v3277_v30 = vmul.f32 1.442695, %v3201_v58  ;;  %v3204_v10 = vsub.f32 %v8494_v7, %v3044_v49 }
 0x7db   : > { %v8760_v57 = vpop.eup %7070 }
 0x7dc   : > { %7076 = vpow2.f32 %v3277_v30  ;;  %v3283_v4 = vmul.f32 1.442695, %v3204_v10  ;;  %v3414_v58 = vsel %vm564_vm0, %v8760_v57, 0.0 }
 0x7dd   : > { %v3038_v6 = vpop.xlane.xlu0 %3037  ;;  %3178 = vmax.xlane.f32.xlu0 %v3177_v20  ;;  %v3047_v20 = vpop.xlane.xlu1 %3046 }
 0x7de   : > { %v3202_v54 = vsub.f32 %v8498_v13, %v3038_v6  ;;  %7078 = vpow2.f32 %v3283_v4  ;;  %v3205_v13 = vsub.f32 %v8504_v32, %v3047_v20 }
 0x7e1   : > { %v3053_v3 = vpop.xlane.xlu0 %3052  ;;  %3181 = vmax.xlane.f32.xlu0 %v3180_v62  ;;  %v3279_v62 = vmul.f32 1.442695, %v3202_v54  ;;  %v8784_v20 = vpop.xlane.xlu1 %3088 }
 0x7e2   : > { %v3207_v7 = vsub.f32 %v8500_v23, %v3053_v3  ;;  %v8765_v49 = vpop.eup %7072  ;;  %v3285_v23 = vmul.f32 1.442695, %v3205_v13 }
 0x7e3   : > { %7080 = vpow2.f32 %v3279_v62  ;;  %v3408_v30 = vsel %vm564_vm0, %v8765_v49, 0.0 }
 0x7e4   : > { %v3289_v6 = vmul.f32 1.442695, %v3207_v7 }
 0x7e5   : > { %v3056_v5 = vpop.xlane.xlu0 %3055  ;;  %3184 = vmax.xlane.f32.xlu0 %v3183_v59 }
 0x7e6   : > { %v8772_v10 = vpop.eup %7074  ;;  %7082 = vpow2.f32 %v3289_v6  ;;  %v3208_v3 = vsub.f32 %v8508_v34, %v3056_v5 }
 0x7e7   : > { %9851 = vst [vmem:[#allocation24_spill] sm:$0xff] %v8772_v10  ;;  %v3423_v4 = vsel %vm564_vm0, %v8772_v10, 0.0  ;;  %7084 = vpow2.f32 %v3285_v23 }
 0x7e8   : > { %v3291_v32 = vmul.f32 1.442695, %v3208_v3 }
 0x7e9   : > { %v3050_v55 = vpop.xlane.xlu0 %3049  ;;  %3187 = vmax.xlane.f32.xlu0 %v3186_v25  ;;  %v8777_v54 = vpop.eup %7076 }
 0x7ea   : > { %9852 = vst [vmem:[#allocation25_spill] sm:$0xff] %v8777_v54  ;;  %v3206_v62 = vsub.f32 %v8512_v37, %v3050_v55  ;;  %v3417_v7 = vsel %vm564_vm0, %v8777_v54, 0.0  ;;  %7086 = vpow2.f32 %v3291_v32  ;;  %v8791_v23 = vpop.xlane.xlu1 %3100 }
 0x7ec   : > { %v3287_v34 = vmul.f32 1.442695, %v3206_v62 }
 0x7ed   : > { %v8767_v31 = vpop.xlane.xlu0 %3064  ;;  %3415 = vadd.xlane.f32.xlu0 %v3414_v58  ;;  %v8782_v58 = vpop.eup %7078 }
 0x7ee   : > { %9853 = vst [vmem:[#allocation26_spill] sm:$0xff] %v8782_v58  ;;  %v3426_v6 = vsel %vm564_vm0, %v8782_v58, 0.0  ;;  %7088 = vpow2.f32 %v3287_v34 }
 0x7f1   : > { %v3059_v59 = vpop.xlane.xlu0 %3058  ;;  %3409 = vadd.xlane.f32.xlu0 %v3408_v30  ;;  %v8789_v30 = vpop.eup %7080 }
 0x7f2   : > { %v3209_v5 = vsub.f32 %v8518_v14, %v3059_v59  ;;  %v8798_v14 = vpop.xlane.xlu1 %3094  ;;  %v6468_v59 = vpop.f32.mrf.mxu0 }
 0x7f3   : > { %v8796_v32 = vpop.eup %7082 }
 0x7f4   : > { %v3293_v55 = vmul.f32 1.442695, %v3209_v5  ;;  %9854 = vst [vmem:[#allocation27_spill] sm:$0xff] %v8796_v32  ;;  %v3435_v34 = vsel %vm564_vm0, %v8796_v32, 0.0  ;;  %v8803_v5 = vpop.eup %7084 }
 0x7f5   : > { %v3068_v25 = vpop.xlane.xlu0 %3067  ;;  %3424 = vadd.xlane.f32.xlu0 %v3423_v4  ;;  %v3420_v4 = vsel %vm564_vm0, %v8789_v30, 0.0  ;;  %9855 = vst [vmem:[#allocation28_spill] sm:$0xff] %v8803_v5 }
 0x7f6   : > { %v3212_v3 = vsub.f32 %v8520_v18, %v3068_v25  ;;  %7090 = vpow2.f32 %v3293_v55  ;;  %v2371_v25 = vpop.f32.mrf.mxu0  ;;  %v8810_v55 = vpop.xlane.xlu1 %3112 }
 0x7f7   : > { %v8808_v54 = vpop.eup %7086 }
 0x7f9   : > { %v3062_v13 = vpop.xlane.xlu0 %3061  ;;  %3418 = vadd.xlane.f32.xlu0 %v3417_v7  ;;  %v3299_v7 = vmul.f32 1.442695, %v3212_v3 }
 0x7fa   : > { %v3210_v10 = vsub.f32 %v8524_v40, %v3062_v13  ;;  %v6469_v13 = vpop.f32.mrf.mxu0 }
 0x7fb   : > { %7092 = vpow2.f32 %v3299_v7  ;;  %v8815_v7 = vpop.eup %7088 }
 0x7fd   : > { %v3077_v37 = vpop.xlane.xlu0 %3076  ;;  %3427 = vadd.xlane.f32.xlu0 %v3426_v6  ;;  %v3295_v6 = vmul.f32 1.442695, %v3210_v10  ;;  %v3438_v10 = vsel %vm564_vm0, %v8808_v54, 0.0 }
 0x7fe   : > { %v3215_v58 = vsub.f32 %v8526_v41, %v3077_v37  ;;  %v8817_v37 = vpop.xlane.xlu1 %3106 }
 0x7ff   : > { %7094 = vpow2.f32 %v3295_v6 }
 0x800   : > { %v3305_v3 = vmul.f32 1.442695, %v3215_v58  ;;  %v3432_v58 = vsel %vm564_vm0, %v8815_v7, 0.0 }
 0x801   : > { %v3071_v62 = vpop.xlane.xlu0 %3070  ;;  %3421 = vadd.xlane.f32.xlu0 %v3420_v4  ;;  %v3429_v4 = vsel %vm564_vm0, %v8803_v5, 0.0 }
 0x802   : > { %v3213_v32 = vsub.f32 %v8530_v43, %v3071_v62  ;;  %7096 = vpow2.f32 %v3305_v3 }
 0x803   : > { %v8822_v43 = vpop.eup %7090 }
 0x804   : > { %v3301_v5 = vmul.f32 1.442695, %v3213_v32  ;;  %v8829_v32 = vpop.xlane.xlu1 %3124 }
 0x805   : > { %v3080_v18 = vpop.xlane.xlu0 %3079  ;;  %3436 = vadd.xlane.f32.xlu0 %v3435_v34  ;;  %v2374_v34 = vpop.f32.mrf.mxu0 }
 0x806   : > { %7098 = vpow2.f32 %v3301_v5 }
 0x808   : > { %v8827_v3 = vpop.eup %7092 }
 0x809   : > { %v3074_v40 = vpop.xlane.xlu0 %3073  ;;  %3430 = vadd.xlane.f32.xlu0 %v3429_v4  ;;  %v3216_v4 = vsub.f32 %v8532_v44, %v3080_v18  ;;  %v3219_v18 = vsub.f32 %v8538_v47, %v8784_v20  ;;  %v3450_v5 = vsel %vm564_vm0, %v8827_v3, 0.0 }
 0x80a   : > { %v3214_v6 = vsub.f32 %v8536_v46, %v3074_v40  ;;  %v8837_v40 = vpop.xlane.xlu1 %3118 }
 0x80c   : > { %2418 = vxpose.xlu1.b32.start [1/4] (short) (narrow) %v2371_v25, 64  ;;  %v3307_v25 = vmul.f32 1.442695, %v3216_v4  ;;  %v8835_v46 = vpop.eup %7094  ;;  %v3313_v4 = vmul.f32 1.442695, %v3219_v18 }
 0x80d   : > { %v3083_v41 = vpop.xlane.xlu0 %3082  ;;  %3439 = vadd.xlane.f32.xlu0 %v3438_v10  ;;  %v3441_v10 = vsel %vm564_vm0, %v8822_v43, 0.0 }
 0x80e   : > { %7100 = vpow2.f32 %v3307_v25  ;;  %v8849_v18 = vpop.xlane.xlu1 %3136 }
 0x80f   : > { %v8842_v47 = vpop.eup %7096 }
 0x810   : > { %2419 = vxpose.xlu1.b32.cont [2/4] (short) (narrow) %v2374_v34, 64  ;;  %v3303_v34 = vmul.f32 1.442695, %v3214_v6  ;;  %9856 = vst [vmem:[#allocation29_spill] sm:$0xff] %v8842_v47  ;;  %v3459_v6 = vsel %vm564_vm0, %v8842_v47, 0.0 }
 0x811   : > { %v3092_v62 = vpop.xlane.xlu0 %3091  ;;  %3433 = vadd.xlane.f32.xlu0 %v3432_v58  ;;  %v3217_v58 = vsub.f32 %v8544_v15, %v3083_v41 }
 0x812   : > { %7102 = vpow2.f32 %v3303_v34  ;;  %v3220_v25 = vsub.f32 %v8546_v19, %v3092_v62  ;;  %v8858_v62 = vpop.xlane.xlu1 %3130 }
 0x813   : > { %7104 = vpow2.f32 %v3313_v4 }
 0x814   : > { %2420 = vxpose.xlu1.b32.cont [3/4] (short) (narrow) %v6468_v59, 64  ;;  %v3315_v15 = vmul.f32 1.442695, %v3220_v25 }
 0x815   : > { %v3086_v44 = vpop.xlane.xlu0 %3085  ;;  %3442 = vadd.xlane.f32.xlu0 %v3441_v10  ;;  %v3444_v10 = vsel %vm564_vm0, %v8835_v46, 0.0 }
 0x816   : > { %v3218_v41 = vsub.f32 %v8550_v50, %v3086_v44 }
 0x818   : > { %2421 = vxpose.xlu1.b32.end [4/4] (short) (narrow) %v6469_v13, 64  ;;  %v3309_v13 = vmul.f32 1.442695, %v3217_v58  ;;  %v3311_v47 = vmul.f32 1.442695, %v3218_v41 }
 0x819   : > { %v3104_v59 = vpop.xlane.xlu0 %3103  ;;  %3451 = vadd.xlane.f32.xlu0 %v3450_v5  ;;  %v8847_v5 = vpop.eup %7098 }
 0x81a   : > { %9857 = vst [vmem:[#allocation30_spill] sm:$0xff] %v8847_v5  ;;  %7106 = vpow2.f32 %v3309_v13  ;;  %v3453_v4 = vsel %vm564_vm0, %v8847_v5, 0.0 }
 0x81b   : > { %v8856_v58 = vpop.eup %7100  ;;  %7108 = vpow2.f32 %v3315_v15 }
 0x81c   : > { %9858 = vst [vmem:[#allocation31_spill] sm:$0xff] %v8856_v58  ;;  %v3462_v13 = vsel %vm564_vm0, %v8856_v58, 0.0  ;;  %7110 = vpow2.f32 %v3311_v47  ;;  %v3224_v47 = vsub.f32 %v8560_v52, %v3104_v59 }
 0x81d   : > { %v3098_v20 = vpop.xlane.xlu0 %3097  ;;  %3445 = vadd.xlane.f32.xlu0 %v3444_v10  ;;  %v3223_v10 = vsub.f32 %v8552_v8, %v8791_v23  ;;  %v8874_v8 = vpop.xlane.xlu1 %3148 }
 0x81e   : > { %v3222_v41 = vsub.f32 %v8566_v56, %v3098_v20  ;;  %v3211_v20 = vsub.f32 %v8514_v38, %v8767_v31  ;;  %v3227_v38 = vsub.f32 %v8568_v29, %v8810_v55  ;;  %v3229_v29 = vsub.f32 %v8590_v17, %v8837_v40 }
 0x81f   : > { %v8864_v25 = vpop.eup %7102  ;;  %v3321_v44 = vmul.f32 1.442695, %v3223_v10  ;;  %v3233_v17 = vsub.f32 %v8606_v45, %v8858_v62 }
 0x820   : > { %v8872_v5 = vpop.eup %7104  ;;  %v3319_v58 = vmul.f32 1.442695, %v3222_v41 }
 0x821   : > { %v8851_v34 = vpop.xlane.xlu0 %3115  ;;  %3460 = vadd.xlane.f32.xlu0 %v3459_v6  ;;  %v3221_v6 = vsub.f32 %v8558_v51, %v8798_v14  ;;  %9859 = vst [vmem:[#allocation32_spill] sm:$0xff] %v8872_v5  ;;  %7112 = vpow2.f32 %v3321_v44  ;;  %v3471_v10 = vsel %vm564_vm0, %v8872_v5, 0.0  ;;  %v8883_v14 = vpop.xlane.xlu1 %3142  ;;  %v3297_v5 = vmul.f32 1.442695, %v3211_v20 }
 0x823   : > { %v3317_v15 = vmul.f32 1.442695, %v3221_v6 }
 0x825   : > { %v3110_v19 = vpop.xlane.xlu0 %3109  ;;  %3454 = vadd.xlane.f32.xlu0 %v3453_v4  ;;  %v3456_v4 = vsel %vm564_vm0, %v8864_v25, 0.0  ;;  %7114 = vpow2.f32 %v3317_v15  ;;  %v8900_v15 = vpop.xlane.xlu1 %3160 }
 0x826   : > { %7116 = vpow2.f32 %v3319_v58 }
 0x829   : > { %v8866_v50 = vpop.xlane.xlu0 %3127  ;;  %3463 = vadd.xlane.f32.xlu0 %v3462_v13  ;;  %v8879_v13 = vpop.eup %7106 }
 0x82a   : > { %v3465_v44 = vsel %vm564_vm0, %v8879_v13, 0.0  ;;  %v8888_v6 = vpop.eup %7108 }
 0x82b   : > { %v3474_v52 = vsel %vm564_vm0, %v8888_v6, 0.0  ;;  %v8898_v59 = vpop.eup %7110 }
 0x82d   : > { %v3122_v23 = vpop.xlane.xlu0 %3121  ;;  %3457 = vadd.xlane.f32.xlu0 %v3456_v4  ;;  %v3225_v4 = vsub.f32 %v8574_v11, %v8817_v37  ;;  %v3468_v11 = vsel %vm564_vm0, %v8898_v59, 0.0 }
 0x82e   : > { %v8909_v37 = vpop.eup %7112 }
 0x82f   : > { %v3325_v31 = vmul.f32 1.442695, %v3225_v4  ;;  %v3483_v55 = vsel %vm564_vm0, %v8909_v37, 0.0 }
 0x831   : > { %v8881_v51 = vpop.xlane.xlu0 %3139  ;;  %3472 = vadd.xlane.f32.xlu0 %v3471_v10  ;;  %v3323_v10 = vmul.f32 1.442695, %v3224_v47  ;;  %v3228_v47 = vsub.f32 %v8576_v22, %v8851_v34  ;;  %v3230_v22 = vsub.f32 %v8598_v36, %v3122_v23  ;;  %v3231_v34 = vsub.f32 %v8584_v0, %v8829_v32 }
 0x832   : > { %v3232_v36 = vsub.f32 %v8592_v9, %v8866_v50  ;;  %v3235_v9 = vsub.f32 %v8600_v39, %v8849_v18  ;;  %v3237_v18 = vsub.f32 %v8622_v61, %v8883_v14  ;;  %v9860_v61 = vld [vmem:[#allocation12_spill] sm:$0xff] }
 0x833   : > { %7118 = vpow2.f32 %v3323_v10  ;;  %v3335_v0 = vmul.f32 1.442695, %v3230_v22  ;;  %v3337_v32 = vmul.f32 1.442695, %v3231_v34  ;;  %v3236_v22 = vsub.f32 %v8608_v48, %v8881_v51 }
 0x834   : > { %7120 = vpow2.f32 %v3297_v5  ;;  %v3331_v5 = vmul.f32 1.442695, %v3228_v47  ;;  %v3345_v39 = vmul.f32 1.442695, %v3235_v9  ;;  %v3239_v14 = vsub.f32 %v9860_v61, %v8874_v8 }
 0x835   : > { %v8890_v56 = vpop.xlane.xlu0 %3133  ;;  %3466 = vadd.xlane.f32.xlu0 %v3465_v44  ;;  %v3226_v44 = vsub.f32 %v8582_v21, %v3110_v19  ;;  %v3329_v21 = vmul.f32 1.442695, %v3227_v38  ;;  %7122 = vpow2.f32 %v3325_v31  ;;  %v8921_v19 = vpop.eup %7114  ;;  %v3347_v48 = vmul.f32 1.442695, %v3236_v22 }
 0x836   : > { %v3477_v40 = vsel %vm564_vm0, %v8921_v19, 0.0  ;;  %v8934_v38 = vpop.eup %7116  ;;  %v3234_v47 = vsub.f32 %v8614_v60, %v8890_v56 }
 0x837   : > { %v3327_v20 = vmul.f32 1.442695, %v3226_v44  ;;  %v3333_v44 = vmul.f32 1.442695, %v3229_v29  ;;  %v3480_v45 = vsel %vm564_vm0, %v8934_v38, 0.0 }
 0x839   : > { %v8902_v41 = vpop.xlane.xlu0 %3151  ;;  %3475 = vadd.xlane.f32.xlu0 %v3474_v52  ;;  %v8915_v52 = vpop.xlane.xlu1 %3154  ;;  %7124 = vpow2.f32 %v3327_v20 }
 0x83a   : > { %7126 = vpow2.f32 %v3329_v21  ;;  %v3339_v21 = vmul.f32 1.442695, %v3232_v36 }
 0x83b   : > { %7128 = vpow2.f32 %v3331_v5  ;;  %v3343_v5 = vmul.f32 1.442695, %v3234_v47 }
 0x83c   : > { %7130 = vpow2.f32 %v3333_v44 }
 0x83d   : > { %v8911_v58 = vpop.xlane.xlu0 %3145  ;;  %3469 = vadd.xlane.f32.xlu0 %v3468_v11  ;;  %v8928_v10 = vpop.xlane.xlu1 %3166  ;;  %v3341_v11 = vmul.f32 1.442695, %v3233_v17  ;;  %7132 = vpow2.f32 %v3335_v0 }
 0x83e   : > { %7134 = vpow2.f32 %v3337_v32  ;;  %v3238_v51 = vsub.f32 %v8630_v28, %v8911_v58  ;;  %v3240_v28 = vsub.f32 %v8624_v12, %v8902_v41 }
 0x83f   : > { %7136 = vpow2.f32 %v3341_v11 }
 0x840   : > { %v8942_v62 = vpop.eup %7118  ;;  %v3351_v58 = vmul.f32 1.442695, %v3238_v51  ;;  %v3355_v22 = vmul.f32 1.442695, %v3240_v28 }
 0x841   : > { %v8923_v4 = vpop.xlane.xlu0 %3163  ;;  %3484 = vadd.xlane.f32.xlu0 %v3483_v55  ;;  %v3389_v23 = vpop.xlane.xlu1 %3388  ;;  %v3486_v50 = vsel %vm564_vm0, %v8942_v62, 0.0 }
 0x842   : > { %v8948_v29 = vpop.eup %7120  ;;  %7138 = vrcp.f32 %v3389_v23  ;;  %v3349_v23 = vmul.f32 1.442695, %v3237_v18 }
 0x843   : > { %v8954_v55 = vpop.eup %7122  ;;  %7140 = vpow2.f32 %v3339_v21  ;;  %v3447_v34 = vsel %vm564_vm0, %v8948_v29, 0.0 }
 0x844   : > { %v3489_v17 = vsel %vm564_vm0, %v8954_v55, 0.0 }
 0x845   : > { %v8936_v31 = vpop.xlane.xlu0 %3157  ;;  %3478 = vadd.xlane.f32.xlu0 %v3477_v40  ;;  %v3383_v60 = vpop.xlane.xlu1 %3382 }
 0x846   : > { %v8960_v44 = vpop.eup %7124 }
 0x847   : > { %v8966_v40 = vpop.eup %7126  ;;  %v3492_v0 = vsel %vm564_vm0, %v8960_v44, 0.0 }
 0x848   : > { %v8972_v32 = vpop.eup %7128  ;;  %v3495_v11 = vsel %vm564_vm0, %v8966_v40, 0.0 }
 0x849   : > { %v8946_v20 = vpop.xlane.xlu0 %3169  ;;  %3481 = vadd.xlane.f32.xlu0 %v3480_v45  ;;  %v8978_v45 = vpop.eup %7130  ;;  %v3498_v21 = vsel %vm564_vm0, %v8972_v32, 0.0 }
 0x84a   : > { %v8986_v9 = vpop.eup %7132 }
 0x84b   : > { %v8988_v8 = vpop.eup %7134  ;;  %v3504_v18 = vsel %vm564_vm0, %v8986_v9, 0.0 }
 0x84c   : > { %v8994_v12 = vpop.eup %7136 }
 0x84d   : > { %v3392_v56 = vpop.xlane.xlu0 %3391  ;;  %3487 = vadd.xlane.f32.xlu0 %v3486_v50  ;;  %v3353_v50 = vmul.f32 1.442695, %v3239_v14 }
 0x84e   : > { %7142 = vrcp.f32 %v3392_v56  ;;  %v3501_v56 = vsel %vm564_vm0, %v8978_v45, 0.0 }
 0x84f   : > { %3448 = vadd.xlane.f32.xlu1 %v3447_v34  ;;  %7144 = vrcp.f32 %v3383_v60  ;;  %v7139_v41 = vpop.eup %7138  ;;  %v3242_v34 = vsub.f32 %v8646_v53, %v8936_v31  ;;  %v3244_v31 = vsub.f32 %v8640_v42, %v8923_v4  ;;  %v3513_v42 = vsel %vm564_vm0, %v8994_v12, 0.0 }
 0x850   : > { %7146 = vpow2.f32 %v3343_v5  ;;  %v9861_v5 = vld [vmem:[#allocation14_spill] sm:$0xff]  ;;  %v9009_v53 = vmul.f32 %v7139_v41, %v8677_v26  ;;  %v3246_v41 = vsub.f32 %v8695_v33, %v8946_v20  ;;  %v9865_v20 = vld [vmem:[#allocation17_spill] sm:$0xff] }
 0x851   : > { %v3386_v36 = vpop.xlane.xlu0 %3385  ;;  %3490 = vadd.xlane.f32.xlu0 %v3489_v17  ;;  %v3241_v60 = vsub.f32 %v9861_v5, %v8915_v52  ;;  %v9002_v17 = vpop.eup %7140  ;;  %v9862_v52 = vld [vmem:[#allocation13_spill] sm:$0xff] }
 0x852   : > { %7148 = vrcp.f32 %v3386_v36  ;;  %v3243_v36 = vsub.f32 %v9862_v52, %v8900_v15  ;;  %v3359_v15 = vmul.f32 1.442695, %v3242_v34  ;;  %v3510_v28 = vsel %vm564_vm0, %v9002_v17, 0.0 }
 0x853   : > { %3493 = vadd.xlane.f32.xlu1 %v3492_v0  ;;  %7150 = vpow2.f32 %v3345_v39  ;;  %v3357_v51 = vmul.f32 1.442695, %v3241_v60  ;;  %v3507_v0 = vsel %vm564_vm0, %v8988_v8, 0.0  ;;  %v3367_v33 = vmul.f32 1.442695, %v3246_v41 }
 0x854   : > { %7152 = vpow2.f32 %v3347_v48 }
 0x855   : > { %3496 = vadd.xlane.f32.xlu0 %v3495_v11  ;;  %7154 = vpow2.f32 %v3349_v23 }
 0x856   : > { %v8982_v47 = vpop.xlane.xlu0 %3403  ;;  %7156 = vpow2.f32 %v3351_v58 }
 0x857   : > { %3499 = vadd.xlane.f32.xlu1 %v3498_v21  ;;  %7158 = vpow2.f32 %v3353_v50  ;;  %v3361_v21 = vmul.f32 1.442695, %v3243_v36 }
 0x858   : > { %7160 = vpow2.f32 %v3355_v22 }
 0x859   : > { %3502 = vadd.xlane.f32.xlu0 %v3501_v56  ;;  %7162 = vpow2.f32 %v3357_v51  ;;  %v3363_v56 = vmul.f32 1.442695, %v3244_v31 }
 0x85a   : > { %v8998_v39 = vpop.xlane.xlu0 %3397  ;;  %7164 = vpow2.f32 %v3359_v15 }
 0x85b   : > { %3505 = vadd.xlane.f32.xlu1 %v3504_v18  ;;  %v7143_v48 = vpop.eup %7142  ;;  %7166 = vpow2.f32 %v3361_v21 }
 0x85c   : > { %v7145_v61 = vpop.eup %7144  ;;  %v9014_v14 = vmul.f32 %v7143_v48, %v8700_v35  ;;  %v9863_v35 = vld [vmem:[#allocation16_spill] sm:$0xff]  ;;  %7168 = vpow2.f32 %v3363_v56 }
 0x85d   : > { %3508 = vadd.xlane.f32.xlu0 %v3507_v0  ;;  %v9016_v23 = vpop.eup %7146  ;;  %v3245_v4 = vsub.f32 %v9863_v35, %v8928_v10  ;;  %v3637_v50 = vmul.f32 %v7145_v61, %v8684_v2  ;;  %v9864_v10 = vld [vmem:[#allocation15_spill] sm:$0xff] }
 0x85e   : > { %v3173_v11 = vpop.xlane.xlu0 %3172  ;;  %v3516_v34 = vsel %vm564_vm0, %v9016_v23, 0.0 }
 0x85f   : > { %v7149_v58 = vpop.eup %7148  ;;  %3511 = vadd.xlane.f32.xlu1 %v3510_v28  ;;  %v3365_v2 = vmul.f32 1.442695, %v3245_v4 }
 0x860   : > { %v3638_v5 = vmul.f32 %v7149_v58, %v8707_v16  ;;  %v9028_v60 = vpop.eup %7150  ;;  %v3247_v16 = vsub.f32 %v9864_v10, %v3173_v11 }
 0x861   : > { %3514 = vadd.xlane.f32.xlu0 %v3513_v42  ;;  %v9034_v52 = vpop.eup %7152  ;;  %v3519_v36 = vsel %vm564_vm0, %v9028_v60, 0.0  ;;  %7170 = vpow2.f32 %v3365_v2 }
 0x862   : > { %v3176_v22 = vpop.xlane.xlu0 %3175  ;;  %v3701_v18 = vpack.c.bf16 %v3638_v5, %v3637_v50  ;;  %v9040_v48 = vpop.eup %7154  ;;  %v3522_v61 = vsel %vm564_vm0, %v9034_v52, 0.0  ;;  %v3369_v15 = vmul.f32 1.442695, %v3247_v16  ;;  %7172 = vpow2.f32 %v3367_v33 }
 0x863   : > { %3517 = vadd.xlane.f32.xlu1 %v3516_v34  ;;  %v3248_v51 = vsub.f32 %v9865_v20, %v3176_v22  ;;  %v9045_v31 = vpop.eup %7156  ;;  %v3525_v28 = vsel %vm564_vm0, %v9040_v48, 0.0 }
 0x864   : > { %6546 = vmatprep.mubr.msk.bf16.mxu0 %vm564_vm0, %v3701_v18  ;;  %v9050_v58 = vpop.eup %7158  ;;  %v3528_v35 = vsel %vm564_vm0, %v9045_v31, 0.0  ;;  %7174 = vpow2.f32 %v3369_v15 }
 0x865   : > { %3520 = vadd.xlane.f32.xlu0 %v3519_v36  ;;  %9866 = vst [vmem:[#allocation12_spill] sm:$0xff] %v9050_v58  ;;  %v3371_v21 = vmul.f32 1.442695, %v3248_v51  ;;  %v9054_v4 = vpop.eup %7160 }
 0x866   : > { %v3179_v0 = vpop.xlane.xlu0 %3178  ;;  %9867 = vst [vmem:[#allocation14_spill] sm:$0xff] %v9054_v4  ;;  %v9059_v56 = vpop.eup %7162  ;;  %v3534_v34 = vsel %vm564_vm0, %v9054_v4, 0.0 }
 0x867   : > { %3523 = vadd.xlane.f32.xlu1 %v3522_v61  ;;  %v3249_v11 = vsub.f32 %v8735_v63, %v3179_v0  ;;  %v3531_v63 = vsel %vm564_vm0, %v9050_v58, 0.0  ;;  %9868 = vst [vmem:[#allocation13_spill] sm:$0xff] %v9059_v56  ;;  %7176 = vpow2.f32 %v3371_v21  ;;  %v9063_v18 = vpop.eup %7164 }
 0x868   : > { %9869 = vst [vmem:[#allocation16_spill] sm:$0xff] %v9063_v18  ;;  %v9068_v10 = vpop.eup %7166  ;;  %v3540_v33 = vsel %vm564_vm0, %v9063_v18, 0.0 }
 0x869   : > { %3526 = vadd.xlane.f32.xlu0 %v3525_v28  ;;  %v3373_v5 = vmul.f32 1.442695, %v3249_v11  ;;  %9870 = vst [vmem:[#allocation15_spill] sm:$0xff] %v9068_v10  ;;  %v9072_v20 = vpop.eup %7168  ;;  %v3543_v0 = vsel %vm564_vm0, %v9068_v10, 0.0 }
 0x86a   : > { %v3182_v42 = vpop.xlane.xlu0 %3181  ;;  %9871 = vst [vmem:[#allocation17_spill] sm:$0xff] %v9072_v20  ;;  %v3546_v28 = vsel %vm564_vm0, %v9072_v20, 0.0 }
 0x86b   : > { %v3250_v50 = vsub.f32 %v8749_v27, %v3182_v42  ;;  %3529 = vadd.xlane.f32.xlu1 %v3528_v35  ;;  %7178 = vpow2.f32 %v3373_v5  ;;  %v3537_v27 = vsel %vm564_vm0, %v9059_v56, 0.0 }
 0x86d   : > { %3532 = vadd.xlane.f32.xlu0 %v3531_v63  ;;  %v3375_v41 = vmul.f32 1.442695, %v3250_v50 }
 0x86e   : > { %v3185_v22 = vpop.xlane.xlu0 %3184  ;;  %v9079_v61 = vpop.eup %7170 }
 0x86f   : > { %v3251_v2 = vsub.f32 %v8726_v1, %v3185_v22  ;;  %3535 = vadd.xlane.f32.xlu1 %v3534_v34  ;;  %7180 = vpow2.f32 %v3375_v41  ;;  %v9075_v1 = vpop.xlane.xlu1 %3400  ;;  %9872 = vst [vmem:[#allocation33_spill] sm:$0xff] %v9079_v61  ;;  %v9085_v21 = vpop.eup %7172 }
 0x870   : > { %9873 = vst [vmem:[#allocation34_spill] sm:$0xff] %v9085_v21  ;;  %v3552_v5 = vsel %vm564_vm0, %v9085_v21, 0.0 }
 0x871   : > { %v3377_v16 = vmul.f32 1.442695, %v3251_v2  ;;  %3538 = vadd.xlane.f32.xlu0 %v3537_v27  ;;  %v9089_v42 = vpop.eup %7174 }
 0x872   : > { %v3188_v36 = vpop.xlane.xlu0 %3187  ;;  %9874 = vst [vmem:[#allocation35_spill] sm:$0xff] %v9089_v42  ;;  %v3555_v41 = vsel %vm564_vm0, %v9089_v42, 0.0 }
 0x873   : > { %v3252_v51 = vsub.f32 %v8744_v24, %v3188_v36  ;;  %3541 = vadd.xlane.f32.xlu1 %v3540_v33  ;;  %7182 = vpow2.f32 %v3377_v16  ;;  %v3549_v24 = vsel %vm564_vm0, %v9079_v61, 0.0  ;;  %v3395_v35 = vpop.xlane.xlu1 %3394 }
 0x874   : > { %v9093_v63 = vpop.eup %7176 }
 0x875   : > { %v3379_v15 = vmul.f32 1.442695, %v3252_v51  ;;  %3544 = vadd.xlane.f32.xlu0 %v3543_v0  ;;  %9875 = vst [vmem:[#allocation36_spill] sm:$0xff] %v9093_v63  ;;  %v3558_v27 = vsel %vm564_vm0, %v9093_v63, 0.0 }
 0x876   : > { %v9081_v11 = vpop.xlane.xlu0 %3415 }
 0x877   : > { %7184 = vpow2.f32 %v3379_v15  ;;  %3547 = vadd.xlane.f32.xlu1 %v3546_v28  ;;  %v3413_v34 = vpop.xlane.xlu1 %3412 }
 0x878   : > { %v9097_v22 = vpop.eup %7178  ;;  %7186 = vrcp.f32 %v8998_v39 }
 0x879   : > { %3550 = vadd.xlane.f32.xlu0 %v3549_v24  ;;  %9876 = vst [vmem:[#allocation37_spill] sm:$0xff] %v9097_v22  ;;  %v3561_v36 = vsel %vm564_vm0, %v9097_v22, 0.0  ;;  %7188 = vrcp.f32 %v3395_v35 }
 0x87a   : > { %v3410_v50 = vpop.xlane.xlu0 %3409  ;;  %7190 = vrcp.f32 %v8982_v47 }
 0x87b   : > { %3553 = vadd.xlane.f32.xlu1 %v3552_v5  ;;  %v3407_v28 = vpop.xlane.xlu1 %3406  ;;  %7192 = vrcp.f32 %v3410_v50 }
 0x87c   : > { %v9103_v16 = vpop.eup %7180  ;;  %7194 = vrcp.f32 %v9075_v1  ;;  %v9881_v1 = vld [vmem:[#allocation19_spill] sm:$0xff] }
 0x87d   : > { %3556 = vadd.xlane.f32.xlu0 %v3555_v41  ;;  %9877 = vst [vmem:[#allocation38_spill] sm:$0xff] %v9103_v16  ;;  %v3564_v0 = vsel %vm564_vm0, %v9103_v16, 0.0  ;;  %7196 = vrcp.f32 %v3407_v28 }
 0x87e   : > { %v9099_v2 = vpop.xlane.xlu0 %3424  ;;  %7198 = vrcp.f32 %v9081_v11 }
 0x87f   : > { %3559 = vadd.xlane.f32.xlu1 %v3558_v27 }
 0x880   : > { %v9107_v33 = vpop.eup %7182 }
 0x881   : > { %9878 = vst [vmem:[#allocation39_spill] sm:$0xff] %v9107_v33  ;;  %3562 = vadd.xlane.f32.xlu0 %v3561_v36  ;;  %v3567_v24 = vsel %vm564_vm0, %v9107_v33, 0.0 }
 0x882   : > { %v3419_v51 = vpop.xlane.xlu0 %3418 }
 0x883   : > { %3565 = vadd.xlane.f32.xlu1 %v3564_v0 }
 0x884   : > { %v9111_v15 = vpop.eup %7184 }
 0x885   : > { %9879 = vst [vmem:[#allocation40_spill] sm:$0xff] %v9111_v15  ;;  %3568 = vadd.xlane.f32.xlu0 %v3567_v24  ;;  %v3570_v5 = vsel %vm564_vm0, %v9111_v15, 0.0  ;;  %v7187_v35 = vpop.eup %7186 }
 0x886   : > { %v3428_v41 = vpop.xlane.xlu0 %3427 }
 0x887   : > { %3571 = vadd.xlane.f32.xlu1 %v3570_v5 }
 0x888   : > { %v2434_v27 = vpop.trf.xlu1 }
 0x88a   : > { %v3422_v26 = vpop.xlane.xlu0 %3421 }
 0x88b   : > { %7200 = vrcp.f32 %v3422_v26 }
 0x88c   : > { %v2435_v36 = vpop.trf.xlu1  ;;  %7202 = vrcp.f32 %v3413_v34  ;;  %v9883_v34 = vld [vmem:[#allocation20_spill] sm:$0xff] }
 0x88d   : > { %7204 = vrcp.f32 %v3419_v51 }
 0x88e   : > { %v9117_v22 = vpop.xlane.xlu0 %3436  ;;  %7206 = vrcp.f32 %v3428_v41 }
 0x890   : > { %v2436_v42 = vpop.trf.xlu1 }
 0x892   : > { %v3431_v16 = vpop.xlane.xlu0 %3430 }
 0x894   : > { %v2437_v0 = vpop.trf.xlu1 }
 0x895   : > { %v3734_v4 = vpack.c.bf16 %v2437_v0, %v2436_v42 }
 0x896   : > { %v9119_v63 = vpop.xlane.xlu0 %3439 }
 0x898   : > { %v2438_v61 = vpop.trf.xlu1 }
 0x89a   : > { %v3434_v10 = vpop.xlane.xlu0 %3433 }
 0x89b   : > { %7208 = vrcp.f32 %v3434_v10 }
 0x89c   : > { %v2439_v21 = vpop.trf.xlu1  ;;  %7210 = vrcp.f32 %v9099_v2 }
 0x89d   : > { %v3735_v58 = vpack.c.bf16 %v2439_v21, %v2438_v61  ;;  %v7189_v61 = vpop.eup %7188  ;;  %7212 = vrcp.f32 %v3431_v16 }
 0x89e   : > { %v9121_v33 = vpop.xlane.xlu0 %3442  ;;  %v7191_v42 = vpop.eup %7190  ;;  %7214 = vrcp.f32 %v9119_v63 }
 0x89f   : > { %v3644_v51 = vmul.f32 %v7191_v42, %v9883_v34 }
 0x8a0   : > { %v2440_v24 = vpop.trf.xlu1 }
 0x8a2   : > { %v9124_v15 = vpop.xlane.xlu0 %3451 }
 0x8a4   : > { %v2441_v5 = vpop.trf.xlu1 }
 0x8a5   : > { %v3736_v20 = vpack.c.bf16 %v2441_v5, %v2440_v24  ;;  %v3733_v24 = vpack.c.bf16 %v2435_v36, %v2434_v27  ;;  %v7193_v27 = vpop.eup %7192  ;;  %v9884_v5 = vld [vmem:[#allocation18_spill] sm:$0xff] }
 0x8a6   : > { %v3446_v56 = vpop.xlane.xlu0 %3445  ;;  %v7195_v26 = vpop.eup %7194  ;;  %v3646_v0 = vmul.f32 %v7193_v27, %v8765_v49 }
 0x8a7   : > { %6538 = vmatprep.subr.bf16.mxu0 %v3736_v20  ;;  %v7197_v11 = vpop.eup %7196  ;;  %7216 = vrcp.f32 %v3446_v56 }
 0x8a8   : > { %6539 = vmatpush3.bf16.msra.mxu0 %v3736_v20  ;;  %v9880_v20 = vld [vmem:[#allocation21_spill] sm:$0xff]  ;;  %7218 = vrcp.f32 %v9117_v22 }
 0x8a9   : > { %6540 = vmatprep.subr.bf16.mxu0 %v3735_v58  ;;  %v3642_v21 = vmul.f32 %v7187_v35, %v9880_v20  ;;  %v3643_v35 = vmul.f32 %v7195_v26, %v9884_v5  ;;  %7220 = vrcp.f32 %v9121_v33  ;;  %v9889_v33 = vld [vmem:[#allocation24_spill] sm:$0xff] }
 0x8aa   : > { %v9127_v18 = vpop.xlane.xlu0 %3460 }
 0x8ac   : > { %6541 = vmatpush3.bf16.msra.mxu0 %v3735_v58  ;;  %v3641_v58 = vmul.f32 %v7189_v61, %v9881_v1  ;;  %v7199_v61 = vpop.eup %7198 }
 0x8ad   : > { %6542 = vmatprep.subr.bf16.mxu0 %v3734_v4  ;;  %v7201_v1 = vpop.eup %7200  ;;  %v3648_v49 = vmul.f32 %v7199_v61, %v8760_v57 }
 0x8ae   : > { %v9130_v39 = vpop.xlane.xlu0 %3454  ;;  %v3703_v28 = vpack.c.bf16 %v3642_v21, %v3641_v58  ;;  %v7203_v41 = vpop.eup %7202  ;;  %v3650_v16 = vmul.f32 %v7201_v1, %v8789_v30  ;;  %v9886_v58 = vld [vmem:[#allocation22_spill] sm:$0xff] }
 0x8af   : > { %v7205_v10 = vpop.eup %7204  ;;  %v3647_v42 = vmul.f32 %v7203_v41, %v9886_v58  ;;  %v9888_v30 = vld [vmem:[#allocation26_spill] sm:$0xff]  ;;  %v9891_v58 = vld [vmem:[#allocation27_spill] sm:$0xff] }
 0x8b0   : > { %6543 = vmatpush3.bf16.msra.mxu0 %v3734_v4  ;;  %v9882_v4 = vpack.c.bf16 %v9014_v14, %v9009_v53  ;;  %v9885_v53 = vld [vmem:[#allocation23_spill] sm:$0xff]  ;;  %v7207_v26 = vpop.eup %7206 }
 0x8b1   : > { %6544 = vmatprep.subr.bf16.mxu0 %v3733_v24  ;;  %v3645_v14 = vmul.f32 %v7197_v11, %v9885_v53  ;;  %v3652_v63 = vmul.f32 %v7207_v26, %v9888_v30 }
 0x8b2   : > { %v9133_v47 = vpop.xlane.xlu0 %3463 }
 0x8b3   : > { %v3705_v21 = vpack.c.bf16 %v3646_v0, %v3645_v14 }
 0x8b4   : > { %6545 = vmatpush3.bf16.msra.mxu0 %v3733_v24  ;;  %v3704_v24 = vpack.c.bf16 %v3644_v51, %v3643_v35  ;;  %v7209_v51 = vpop.eup %7208  ;;  %v9890_v35 = vld [vmem:[#allocation28_spill] sm:$0xff] }
 0x8b5   : > { %v7211_v57 = vpop.eup %7210  ;;  %v3654_v0 = vmul.f32 %v7209_v51, %v8815_v7 }
 0x8b6   : > { %v9137_v50 = vpop.xlane.xlu0 %3457  ;;  %v7213_v56 = vpop.eup %7212  ;;  %v3651_v5 = vmul.f32 %v7211_v57, %v9889_v33 }
 0x8b7   : > { %6547 = vmatmul.mubr.msk.bf16.vlgmr.msra.gmra.mxu0 %vm564_vm0, %v9882_v4  ;;  %v3706_v4 = vpack.c.bf16 %v3648_v49, %v3647_v42  ;;  %v3653_v53 = vmul.f32 %v7213_v56, %v9890_v35  ;;  %7222 = vrcp.f32 %v9137_v50 }
 0x8b8   : > { %6550 = vmatprep.mubr.msk.bf16.mxu0 %vm564_vm0, %v3703_v28  ;;  %v9887_v28 = vld [vmem:[#allocation25_spill] sm:$0xff]  ;;  %v3708_v14 = vpack.c.bf16 %v3652_v63, %v3651_v5  ;;  %7224 = vrcp.f32 %v9124_v15 }
 0x8b9   : > { %v3649_v27 = vmul.f32 %v7205_v10, %v9887_v28  ;;  %7226 = vrcp.f32 %v9130_v39 }
 0x8ba   : > { %v9145_v36 = vpop.xlane.xlu0 %3472 }
 0x8bb   : > { %v3707_v34 = vpack.c.bf16 %v3650_v16, %v3649_v27 }
 0x8be   : > { %v3467_v20 = vpop.xlane.xlu0 %3466 }
 0x8bf   : > { %6551 = vmatmul.mubr.msk.bf16.gmra.mxu0 %vm564_vm0, %v3704_v24  ;;  %v7215_v24 = vpop.eup %7214 }
 0x8c0   : > { %6554 = vmatprep.mubr.msk.bf16.mxu0 %vm564_vm0, %v3705_v21  ;;  %v3709_v21 = vpack.c.bf16 %v3654_v0, %v3653_v53  ;;  %v7217_v1 = vpop.eup %7216  ;;  %v3656_v49 = vmul.f32 %v7215_v24, %v8808_v54 }
 0x8c1   : > { %v7219_v41 = vpop.eup %7218  ;;  %v3658_v7 = vmul.f32 %v7217_v1, %v8835_v46 }
 0x8c2   : > { %v3476_v2 = vpop.xlane.xlu0 %3475  ;;  %v7221_v10 = vpop.eup %7220  ;;  %v3655_v42 = vmul.f32 %v7219_v41, %v9891_v58 }
 0x8c3   : > { %v3657_v28 = vmul.f32 %v7221_v10, %v8822_v43 }
 0x8c4   : > { %v3710_v27 = vpack.c.bf16 %v3656_v49, %v3655_v42  ;;  %v7223_v15 = vpop.eup %7222 }
 0x8c5   : > { %v3711_v26 = vpack.c.bf16 %v3658_v7, %v3657_v28  ;;  %v7225_v57 = vpop.eup %7224  ;;  %v3662_v63 = vmul.f32 %v7223_v15, %v8864_v25 }
 0x8c6   : > { %v3470_v11 = vpop.xlane.xlu0 %3469  ;;  %v7227_v30 = vpop.eup %7226 }
 0x8c7   : > { %6555 = vmatmul.mubr.msk.bf16.gmra.mxu0 %vm564_vm0, %v3706_v4 }
 0x8c8   : > { %6558 = vmatprep.mubr.msk.bf16.mxu0 %vm564_vm0, %v3707_v34 }
 0x8ca   : > { %v9163_v22 = vpop.xlane.xlu0 %3484 }
 0x8ce   : > { %v3479_v61 = vpop.xlane.xlu0 %3478 }
 0x8cf   : > { %6559 = vmatmul.mubr.msk.bf16.gmra.mxu0 %vm564_vm0, %v3708_v14 }
 0x8d0   : > { %6562 = vmatprep.mubr.msk.bf16.mxu0 %vm564_vm0, %v3709_v21 }
 0x8d2   : > { %v3482_v16 = vpop.xlane.xlu0 %3481 }
 0x8d6   : > { %v3488_v4 = vpop.xlane.xlu0 %3487 }
 0x8d7   : > { %6563 = vmatmul.mubr.msk.bf16.gmra.mxu0 %vm564_vm0, %v3710_v27 }
 0x8d8   : > { %6566 = vmatprep.mubr.msk.bf16.mxu0 %vm564_vm0, %v3711_v26  ;;  %v3449_v54 = vpop.xlane.xlu1 %3448 }
 0x8d9   : > { %7228 = vrcp.f32 %v3449_v54 }
 0x8da   : > { %v3491_v46 = vpop.xlane.xlu0 %3490  ;;  %7230 = vrcp.f32 %v9133_v47 }
 0x8db   : > { %7232 = vrcp.f32 %v3470_v11  ;;  %v3660_v11 = vmul.f32 %v7225_v57, %v8827_v3 }
 0x8dc   : > { %v3494_v34 = vpop.xlane.xlu1 %3493  ;;  %7234 = vrcp.f32 %v9127_v18 }
 0x8dd   : > { %7236 = vrcp.f32 %v3467_v20  ;;  %v9892_v20 = vld [vmem:[#allocation30_spill] sm:$0xff] }
 0x8de   : > { %v3497_v43 = vpop.xlane.xlu0 %3496  ;;  %7238 = vrcp.f32 %v3476_v2  ;;  %v3661_v33 = vmul.f32 %v7227_v30, %v9892_v20 }
 0x8df   : > { %7240 = vrcp.f32 %v3482_v16 }
 0x8e0   : > { %v3500_v50 = vpop.xlane.xlu1 %3499  ;;  %7242 = vrcp.f32 %v9145_v36  ;;  %v3713_v53 = vpack.c.bf16 %v3662_v63, %v3661_v33 }
 0x8e1   : > { %7244 = vrcp.f32 %v3479_v61  ;;  %v9894_v61 = vld [vmem:[#allocation29_spill] sm:$0xff] }
 0x8e2   : > { %v3503_v51 = vpop.xlane.xlu0 %3502  ;;  %7246 = vrcp.f32 %v3488_v4  ;;  %v9895_v4 = vld [vmem:[#allocation32_spill] sm:$0xff] }
 0x8e3   : > { %7248 = vrcp.f32 %v3494_v34 }
 0x8e4   : > { %v3506_v56 = vpop.xlane.xlu1 %3505  ;;  %7250 = vrcp.f32 %v9163_v22 }
 0x8e5   : > { %7252 = vrcp.f32 %v3491_v46 }
 0x8e6   : > { %v7229_v39 = vpop.eup %7228  ;;  %v3509_v0 = vpop.xlane.xlu0 %3508  ;;  %7254 = vrcp.f32 %v3500_v50 }
 0x8e7   : > { %v3659_v47 = vmul.f32 %v7229_v39, %v8948_v29  ;;  %v7231_v35 = vpop.eup %7230  ;;  %v9893_v29 = vld [vmem:[#allocation31_spill] sm:$0xff]  ;;  %7256 = vrcp.f32 %v3506_v56 }
 0x8e8   : > { %v3512_v18 = vpop.xlane.xlu1 %3511  ;;  %v7233_v14 = vpop.eup %7232  ;;  %v3664_v21 = vmul.f32 %v7231_v35, %v9893_v29  ;;  %7258 = vrcp.f32 %v3497_v43 }
 0x8e9   : > { %v3712_v5 = vpack.c.bf16 %v3660_v11, %v3659_v47  ;;  %v7235_v2 = vpop.eup %7234  ;;  %v3666_v3 = vmul.f32 %v7233_v14, %v8898_v59  ;;  %7260 = vrcp.f32 %v3503_v51 }
 0x8ea   : > { %v7237_v36 = vpop.eup %7236  ;;  %v3515_v24 = vpop.xlane.xlu0 %3514  ;;  %v3663_v1 = vmul.f32 %v7235_v2, %v9894_v61  ;;  %7262 = vrcp.f32 %v3512_v18 }
 0x8eb   : > { %6567 = vmatmul.mubr.msk.bf16.gmra.mxu0 %vm564_vm0, %v3712_v5  ;;  %v3665_v41 = vmul.f32 %v7237_v36, %v8879_v13  ;;  %v7239_v16 = vpop.eup %7238 }
 0x8ec   : > { %6570 = vmatprep.mubr.msk.bf16.mxu0 %vm564_vm0, %v3713_v53  ;;  %v3518_v25 = vpop.xlane.xlu1 %3517  ;;  %v3714_v49 = vpack.c.bf16 %v3664_v21, %v3663_v1  ;;  %v7241_v58 = vpop.eup %7240  ;;  %v3668_v59 = vmul.f32 %v7239_v16, %v8888_v6 }
 0x8ed   : > { %v3715_v7 = vpack.c.bf16 %v3666_v3, %v3665_v41  ;;  %v7243_v28 = vpop.eup %7242  ;;  %v3670_v22 = vmul.f32 %v7241_v58, %v8934_v38  ;;  %7264 = vrcp.f32 %v3518_v25 }
 0x8ee   : > { %v3521_v42 = vpop.xlane.xlu0 %3520  ;;  %v7245_v27 = vpop.eup %7244  ;;  %v3667_v26 = vmul.f32 %v7243_v28, %v9895_v4  ;;  %7266 = vrcp.f32 %v3509_v0  ;;  %v9896_v4 = vld [vmem:[#allocation14_spill] sm:$0xff] }
 0x8ef   : > { %v3669_v54 = vmul.f32 %v7245_v27, %v8921_v19  ;;  %v7247_v15 = vpop.eup %7246  ;;  %7268 = vrcp.f32 %v3515_v24 }
 0x8f0   : > { %v3524_v10 = vpop.xlane.xlu1 %3523  ;;  %v3716_v34 = vpack.c.bf16 %v3668_v59, %v3667_v26  ;;  %v7249_v30 = vpop.eup %7248  ;;  %v3672_v43 = vmul.f32 %v7247_v15, %v8942_v62 }
 0x8f1   : > { %v3717_v57 = vpack.c.bf16 %v3670_v22, %v3669_v54  ;;  %v7251_v50 = vpop.eup %7250  ;;  %v3674_v51 = vmul.f32 %v7249_v30, %v8960_v44  ;;  %7270 = vrcp.f32 %v3524_v10 }
 0x8f2   : > { %v3527_v46 = vpop.xlane.xlu0 %3526  ;;  %v7253_v6 = vpop.eup %7252  ;;  %v3671_v56 = vmul.f32 %v7251_v50, %v8909_v37 }
 0x8f3   : > { %6571 = vmatmul.mubr.msk.bf16.gmra.mxu0 %vm564_vm0, %v3714_v49  ;;  %v3673_v39 = vmul.f32 %v7253_v6, %v8954_v55  ;;  %v7255_v47 = vpop.eup %7254 }
 0x8f4   : > { %6574 = vmatprep.mubr.msk.bf16.mxu0 %vm564_vm0, %v3715_v7  ;;  %v3530_v13 = vpop.xlane.xlu1 %3529  ;;  %v3718_v63 = vpack.c.bf16 %v3672_v43, %v3671_v56  ;;  %v7257_v20 = vpop.eup %7256  ;;  %v3676_v0 = vmul.f32 %v7255_v47, %v8972_v32  ;;  %v9900_v56 = vld [vmem:[#allocation17_spill] sm:$0xff] }
 0x8f5   : > { %v3719_v11 = vpack.c.bf16 %v3674_v51, %v3673_v39  ;;  %v7259_v18 = vpop.eup %7258  ;;  %7272 = vrcp.f32 %v3530_v13  ;;  %v3678_v37 = vmul.f32 %v7257_v20, %v8986_v9 }
 0x8f6   : > { %v3533_v19 = vpop.xlane.xlu0 %3532  ;;  %v7261_v62 = vpop.eup %7260  ;;  %7274 = vrcp.f32 %v3521_v42  ;;  %v3675_v55 = vmul.f32 %v7259_v18, %v8966_v40 }
 0x8f7   : > { %7276 = vrcp.f32 %v3527_v46  ;;  %v3677_v5 = vmul.f32 %v7261_v62, %v8978_v45  ;;  %v7263_v14 = vpop.eup %7262 }
 0x8f8   : > { %v3536_v38 = vpop.xlane.xlu1 %3535  ;;  %v3720_v53 = vpack.c.bf16 %v3676_v0, %v3675_v55  ;;  %v3680_v9 = vmul.f32 %v7263_v14, %v9002_v17  ;;  %v9905_v14 = vld [vmem:[#allocation38_spill] sm:$0xff] }
 0x8f9   : > { %v3721_v2 = vpack.c.bf16 %v3678_v37, %v3677_v5  ;;  %7278 = vrcp.f32 %v3536_v38 }
 0x8fa   : > { %v3539_v44 = vpop.xlane.xlu0 %3538  ;;  %v7265_v25 = vpop.eup %7264 }
 0x8fb   : > { %6575 = vmatmul.mubr.msk.bf16.gmra.mxu0 %vm564_vm0, %v3716_v34  ;;  %v7267_v24 = vpop.eup %7266  ;;  %v3682_v40 = vmul.f32 %v7265_v25, %v9016_v23  ;;  %v9899_v34 = vld [vmem:[#allocation13_spill] sm:$0xff]  ;;  %v9906_v25 = vld [vmem:[#allocation35_spill] sm:$0xff] }
 0x8fc   : > { %6578 = vmatprep.mubr.msk.bf16.mxu0 %vm564_vm0, %v3717_v57  ;;  %v3542_v33 = vpop.xlane.xlu1 %3541  ;;  %v7269_v32 = vpop.eup %7268  ;;  %v3679_v29 = vmul.f32 %v7267_v24, %v8988_v8  ;;  %v9907_v24 = vld [vmem:[#allocation37_spill] sm:$0xff] }
 0x8fd   : > { %7280 = vrcp.f32 %v3542_v33  ;;  %v3681_v21 = vmul.f32 %v7269_v32, %v8994_v12  ;;  %v9903_v33 = vld [vmem:[#allocation33_spill] sm:$0xff] }
 0x8fe   : > { %v3545_v36 = vpop.xlane.xlu0 %3544  ;;  %7282 = vrcp.f32 %v3533_v19  ;;  %v3722_v61 = vpack.c.bf16 %v3680_v9, %v3679_v29  ;;  %v7271_v1 = vpop.eup %7270 }
 0x8ff   : > { %7284 = vrcp.f32 %v3539_v44  ;;  %v3723_v41 = vpack.c.bf16 %v3682_v40, %v3681_v21  ;;  %v3684_v16 = vmul.f32 %v7271_v1, %v9034_v52  ;;  %v9908_v21 = vld [vmem:[#allocation40_spill] sm:$0xff] }
 0x900   : > { %v3548_v35 = vpop.xlane.xlu1 %3547 }
 0x901   : > { %7286 = vrcp.f32 %v3548_v35  ;;  %v9904_v35 = vld [vmem:[#allocation36_spill] sm:$0xff] }
 0x902   : > { %v3551_v3 = vpop.xlane.xlu0 %3550  ;;  %v7273_v10 = vpop.eup %7272 }
 0x903   : > { %6579 = vmatmul.mubr.msk.bf16.gmra.mxu0 %vm564_vm0, %v3718_v63  ;;  %v7275_v49 = vpop.eup %7274  ;;  %v3686_v8 = vmul.f32 %v7273_v10, %v9045_v31  ;;  %v9901_v63 = vld [vmem:[#allocation34_spill] sm:$0xff]  ;;  %v9910_v10 = vmov 0  }
 0x904   : > { %6582 = vmatprep.mubr.msk.bf16.mxu0 %vm564_vm0, %v3719_v11  ;;  %v3554_v45 = vpop.xlane.xlu1 %3553  ;;  %v7277_v17 = vpop.eup %7276  ;;  %v3683_v7 = vmul.f32 %v7275_v49, %v9028_v60  ;;  %v9897_v60 = vld [vmem:[#allocation16_spill] sm:$0xff]  ;;  %v9902_v11 = vld [vmem:[#allocation15_spill] sm:$0xff] }
 0x905   : > { %7288 = vrcp.f32 %v3554_v45  ;;  %v3685_v58 = vmul.f32 %v7277_v17, %v9040_v48  ;;  %v9898_v48 = vld [vmem:[#allocation12_spill] sm:$0xff]  ;;  %v4122_v17 = vlaneseq }
 0x906   : > { %7290 = vrcp.f32 %v3545_v36  ;;  %v3557_v12 = vpop.xlane.xlu0 %3556  ;;  %v3724_v42 = vpack.c.bf16 %v3684_v16, %v3683_v7  ;;  %v7279_v28 = vpop.eup %7278 }
 0x907   : > { %7292 = vrcp.f32 %v3551_v3  ;;  %v3725_v27 = vpack.c.bf16 %v3686_v8, %v3685_v58  ;;  %v3688_v26 = vmul.f32 %v7279_v28, %v9896_v4  ;;  %v4123_v8 = vshrl.u32 %v4122_v17, 7 }
 0x908   : > { %v3560_v23 = vpop.xlane.xlu1 %3559 }
 0x909   : > { %7294 = vrcp.f32 %v3560_v23  ;;  %v9247_v58 = vsub.s32 0, %v4123_v8  ;;  %v7309_v8 = vld [vmem:[%s9779_s12 + $0xc0] sm:$0xff] }
 0x90a   : > { %v7281_v59 = vpop.eup %7280  ;;  %v3563_v31 = vpop.xlane.xlu0 %3562 }
 0x90b   : > { %6583 = vmatmul.mubr.msk.bf16.gmra.mxu0 %vm564_vm0, %v3720_v53  ;;  %v7283_v13 = vpop.eup %7282  ;;  %v3690_v54 = vmul.f32 %v7281_v59, %v9897_v60 }
 0x90c   : > { %6586 = vmatprep.mubr.msk.bf16.mxu0 %vm564_vm0, %v3721_v2  ;;  %v3566_v22 = vpop.xlane.xlu1 %3565  ;;  %v7285_v52 = vpop.eup %7284  ;;  %v3687_v46 = vmul.f32 %v7283_v13, %v9898_v48 }
 0x90d   : > { %7296 = vrcp.f32 %v3566_v22  ;;  %v3689_v15 = vmul.f32 %v7285_v52, %v9899_v34  ;;  %v7307_v22 = vld [vmem:[%s9779_s12 + $0x40] sm:$0xff] }
 0x90e   : > { %7298 = vrcp.f32 %v3557_v12  ;;  %v3726_v57 = vpack.c.bf16 %v3688_v26, %v3687_v46  ;;  %v7287_v30 = vpop.eup %7286  ;;  %v3569_v51 = vpop.xlane.xlu0 %3568  ;;  %v4145_v13 = vrot.slane %v7307_v22, %v9247_v58 }
 0x90f   : > { %7300 = vrcp.f32 %v3563_v31  ;;  %v3727_v6 = vpack.c.bf16 %v3690_v54, %v3689_v15  ;;  %v3692_v39 = vmul.f32 %v7287_v30, %v9900_v56 }
 0x910   : > { %v3572_v50 = vpop.xlane.xlu1 %3571 }
 0x911   : > { %7302 = vrcp.f32 %v3572_v50 }
 0x912   : > { %v7289_v38 = vpop.eup %7288  ;;  %7304 = vrcp.f32 %v3569_v51 }
 0x913   : > { %6587 = vmatmul.mubr.msk.bf16.gmra.mxu0 %vm564_vm0, %v3722_v61  ;;  %v7291_v43 = vpop.eup %7290  ;;  %v3694_v47 = vmul.f32 %v7289_v38, %v9901_v63  ;;  %v9909_v61 = vld [vmem:[#allocation39_spill] sm:$0xff] }
 0x914   : > { %6590 = vmatprep.mubr.msk.bf16.mxu0 %vm564_vm0, %v3723_v41  ;;  %v7293_v19 = vpop.eup %7292  ;;  %v3691_v20 = vmul.f32 %v7291_v43, %v9902_v11 }
 0x915   : > { %v3693_v18 = vmul.f32 %v7293_v19, %v9903_v33 }
 0x916   : > { %v3728_v62 = vpack.c.bf16 %v3692_v39, %v3691_v20  ;;  %v7295_v44 = vpop.eup %7294 }
 0x917   : > { %v3729_v0 = vpack.c.bf16 %v3694_v47, %v3693_v18  ;;  %v3696_v53 = vmul.f32 %v7295_v44, %v9904_v35  ;;  %v7308_v18 = vld [vmem:[%s9779_s12 + $0x80] sm:$0xff] }
 0x91a   : > { %v7297_v37 = vpop.eup %7296 }
 0x91b   : > { %6591 = vmatmul.mubr.msk.bf16.gmra.mxu0 %vm564_vm0, %v3724_v42  ;;  %v7299_v55 = vpop.eup %7298  ;;  %v3698_v2 = vmul.f32 %v7297_v37, %v9905_v14 }
 0x91c   : > { %6594 = vmatprep.mubr.msk.bf16.mxu0 %vm564_vm0, %v3725_v27  ;;  %v7301_v5 = vpop.eup %7300  ;;  %v3695_v36 = vmul.f32 %v7299_v55, %v9906_v25  ;;  %v7306_v27 = vld [vmem:[%s9779_s12] sm:$0xff] }
 0x91d   : > { %v3697_v32 = vmul.f32 %v7301_v5, %v9907_v24  ;;  %v4125_v59 = vrot.slane %v7306_v27, %v9247_v58 }
 0x91e   : > { %v3730_v9 = vpack.c.bf16 %v3696_v53, %v3695_v36  ;;  %v7303_v40 = vpop.eup %7302 }
 0x91f   : > { %v3731_v45 = vpack.c.bf16 %v3698_v2, %v3697_v32  ;;  %v7305_v29 = vpop.eup %7304  ;;  %v3700_v3 = vmul.f32 %v7303_v40, %v9908_v21 }
 0x920   : > { %v3699_v1 = vmul.f32 %v7305_v29, %v9909_v61 }
 0x922   : > { %v3732_v41 = vpack.c.bf16 %v3700_v3, %v3699_v1 }
 0x923   : > { %6595 = vmatmul.mubr.msk.bf16.gmra.mxu0 %vm564_vm0, %v3726_v57 }
 0x924   : > { %6598 = vmatprep.mubr.msk.bf16.mxu0 %vm564_vm0, %v3727_v6 }
 0x92b   : > { %6599 = vmatmul.mubr.msk.bf16.gmra.mxu0 %vm564_vm0, %v3728_v62  ;;  %v4165_v62 = vrot.slane %v7308_v18, %v9247_v58 }
 0x92c   : > { %6602 = vmatprep.mubr.msk.bf16.mxu0 %vm564_vm0, %v3729_v0 }
 0x933   : > { %6603 = vmatmul.mubr.msk.bf16.gmra.mxu0 %vm564_vm0, %v3730_v9 }
 0x934   : > { %6606 = vmatprep.mubr.msk.bf16.mxu0 %vm564_vm0, %v3731_v45 }
 0x93b   : > { %6607 = vmatmul.mubr.msk.bf16.gmra.mxu0 %vm564_vm0, %v3732_v41 }
 0x93c   : > { %4786 = vmatprep.mubr.bf16.mxu0 %v9910_v10 }
 0x977   : > { %v6548_v49 = vpop.f32.mrf.mxu0 }
 0x978   : > { %v4128_v4 = vmul.f32 %v6548_v49, %v4125_v59 }
 0x979   : > { %v3867_v23 = vpop.f32.mrf.mxu0 }
 0x97a   : > { %v4126_v54 = vmul.f32 %v4125_v59, %v3867_v23 }
 0x97b   : > { %v6549_v16 = vpop.f32.mrf.mxu0 }
 0x97c   : > { %v4129_v15 = vmul.f32 %v6549_v16, %v4125_v59 }
 0x97d   : > { %v3870_v12 = vpop.f32.mrf.mxu0 }
 0x97e   : > { %v4127_v6 = vmul.f32 %v4125_v59, %v3870_v12  ;;  %v4185_v12 = vrot.slane %v7309_v8, %v9247_v58 }
 0x97f   : > { %v6552_v7 = vpop.f32.mrf.mxu0 }
 0x980   : > { %v4132_v19 = vmul.f32 %v6552_v7, %v4125_v59 }
 0x981   : > { %v3883_v42 = vpop.f32.mrf.mxu0 }
 0x982   : > { %v4130_v47 = vmul.f32 %v4125_v59, %v3883_v42 }
 0x983   : > { %v6553_v28 = vpop.f32.mrf.mxu0 }
 0x984   : > { %v4133_v44 = vmul.f32 %v6553_v28, %v4125_v59 }
 0x985   : > { %v3886_v52 = vpop.f32.mrf.mxu0 }
 0x986   : > { %v4131_v5 = vmul.f32 %v4125_v59, %v3886_v52 }
 0x987   : > { %v6556_v31 = vpop.f32.mrf.mxu0 }
 0x988   : > { %v4148_v26 = vmul.f32 %v6556_v31, %v4145_v13 }
 0x989   : > { %v3899_v60 = vpop.f32.mrf.mxu0 }
 0x98a   : > { %v4156_v48 = vadd.f32 %v4148_v26, %v4128_v4  ;;  %v4146_v46 = vmul.f32 %v4145_v13, %v3899_v60 }
 0x98b   : > { %v6557_v34 = vpop.f32.mrf.mxu0 }
 0x98c   : > { %v4154_v57 = vadd.f32 %v4146_v46, %v4126_v54  ;;  %v4149_v30 = vmul.f32 %v6557_v34, %v4145_v13 }
 0x98d   : > { %v3902_v50 = vpop.f32.mrf.mxu0 }
 0x98e   : > { %v4157_v38 = vadd.f32 %v4149_v30, %v4129_v15  ;;  %v4147_v43 = vmul.f32 %v4145_v13, %v3902_v50 }
 0x98f   : > { %v6560_v51 = vpop.f32.mrf.mxu0 }
 0x990   : > { %v4155_v56 = vadd.f32 %v4147_v43, %v4127_v6  ;;  %v4152_v39 = vmul.f32 %v6560_v51, %v4145_v13 }
 0x991   : > { %v3915_v63 = vpop.f32.mrf.mxu0 }
 0x992   : > { %v4160_v11 = vadd.f32 %v4152_v39, %v4132_v19  ;;  %v4150_v20 = vmul.f32 %v4145_v13, %v3915_v63  ;;  %v7310_v19 = vld [vmem:[%s9779_s12 + $0x100] sm:$0xff] }
 0x993   : > { %v6561_v33 = vpop.f32.mrf.mxu0 }
 0x994   : > { %v4158_v0 = vadd.f32 %v4150_v20, %v4130_v47  ;;  %v4153_v37 = vmul.f32 %v6561_v33, %v4145_v13 }
 0x995   : > { %v3918_v55 = vpop.f32.mrf.mxu0 }
 0x996   : > { %v4161_v35 = vadd.f32 %v4153_v37, %v4133_v44  ;;  %v4151_v53 = vmul.f32 %v4145_v13, %v3918_v55 }
 0x997   : > { %v6564_v14 = vpop.f32.mrf.mxu0 }
 0x998   : > { %v4159_v2 = vadd.f32 %v4151_v53, %v4131_v5  ;;  %v4168_v25 = vmul.f32 %v6564_v14, %v4165_v62 }
 0x999   : > { %v3931_v36 = vpop.f32.mrf.mxu0 }
 0x99a   : > { %v4176_v24 = vadd.f32 %v4168_v25, %v4156_v48  ;;  %v4166_v32 = vmul.f32 %v4165_v62, %v3931_v36 }
 0x99b   : > { %v6565_v9 = vpop.f32.mrf.mxu0 }
 0x99c   : > { %v4174_v40 = vadd.f32 %v4166_v32, %v4154_v57  ;;  %v4169_v45 = vmul.f32 %v6565_v9, %v4165_v62 }
 0x99d   : > { %v3934_v29 = vpop.f32.mrf.mxu0 }
 0x99e   : > { %v4177_v21 = vadd.f32 %v4169_v45, %v4157_v38  ;;  %v4167_v3 = vmul.f32 %v4165_v62, %v3934_v29  ;;  %v7311_v29 = vld [vmem:[%s9779_s12 + $0x140] sm:$0xff] }
 0x9a0   : > { %v4175_v61 = vadd.f32 %v4167_v3, %v4155_v56  ;;  %v4205_v56 = vrot.slane %v7310_v19, %v9247_v58 }
 0x9ab   : > { %v6568_v1 = vpop.f32.mrf.mxu0 }
 0x9ac   : > { %v4172_v41 = vmul.f32 %v6568_v1, %v4165_v62 }
 0x9ad   : > { %v3947_v49 = vpop.f32.mrf.mxu0 }
 0x9ae   : > { %v4180_v17 = vadd.f32 %v4172_v41, %v4160_v11  ;;  %v4170_v23 = vmul.f32 %v4165_v62, %v3947_v49 }
 0x9af   : > { %v6569_v16 = vpop.f32.mrf.mxu0 }
 0x9b0   : > { %v4178_v7 = vadd.f32 %v4170_v23, %v4158_v0  ;;  %v4173_v42 = vmul.f32 %v6569_v16, %v4165_v62 }
 0x9b1   : > { %v3950_v28 = vpop.f32.mrf.mxu0 }
 0x9b2   : > { %v4181_v27 = vadd.f32 %v4173_v42, %v4161_v35  ;;  %v4171_v59 = vmul.f32 %v4165_v62, %v3950_v28 }
 0x9b3   : > { %v6572_v22 = vpop.f32.mrf.mxu0 }
 0x9b4   : > { %v4179_v13 = vadd.f32 %v4171_v59, %v4159_v2  ;;  %v4188_v52 = vmul.f32 %v6572_v22, %v4185_v12 }
 0x9b5   : > { %v3963_v31 = vpop.f32.mrf.mxu0 }
 0x9b6   : > { %v4196_v4 = vadd.f32 %v4188_v52, %v4176_v24  ;;  %v4186_v26 = vmul.f32 %v4185_v12, %v3963_v31 }
 0x9b7   : > { %v6573_v60 = vpop.f32.mrf.mxu0 }
 0x9b8   : > { %v4194_v54 = vadd.f32 %v4186_v26, %v4174_v40  ;;  %v4189_v48 = vmul.f32 %v6573_v60, %v4185_v12 }
 0x9b9   : > { %v3966_v46 = vpop.f32.mrf.mxu0 }
 0x9ba   : > { %v4197_v34 = vadd.f32 %v4189_v48, %v4177_v21  ;;  %v4187_v15 = vmul.f32 %v4185_v12, %v3966_v46  ;;  %v4225_v21 = vrot.slane %v7311_v29, %v9247_v58  ;;  %v7312_v46 = vld [vmem:[%s9779_s12 + $0x180] sm:$0xff] }
 0x9bb   : > { %v6576_v57 = vpop.f32.mrf.mxu0 }
 0x9bc   : > { %v4195_v30 = vadd.f32 %v4187_v15, %v4175_v61  ;;  %v4192_v50 = vmul.f32 %v6576_v57, %v4185_v12 }
 0x9bd   : > { %v3979_v6 = vpop.f32.mrf.mxu0 }
 0x9be   : > { %v4200_v38 = vadd.f32 %v4192_v50, %v4180_v17  ;;  %v4190_v43 = vmul.f32 %v4185_v12, %v3979_v6 }
 0x9bf   : > { %v6577_v51 = vpop.f32.mrf.mxu0 }
 0x9c0   : > { %v4198_v39 = vadd.f32 %v4190_v43, %v4178_v7  ;;  %v4193_v63 = vmul.f32 %v6577_v51, %v4185_v12 }
 0x9c1   : > { %v3982_v47 = vpop.f32.mrf.mxu0 }
 0x9c2   : > { %v4201_v11 = vadd.f32 %v4193_v63, %v4181_v27  ;;  %v4191_v20 = vmul.f32 %v4185_v12, %v3982_v47 }
 0x9c3   : > { %v6580_v33 = vpop.f32.mrf.mxu0 }
 0x9c4   : > { %v4199_v18 = vadd.f32 %v4191_v20, %v4179_v13  ;;  %v4208_v62 = vmul.f32 %v6580_v33, %v4205_v56 }
 0x9c5   : > { %v3995_v44 = vpop.f32.mrf.mxu0 }
 0x9c6   : > { %v4216_v0 = vadd.f32 %v4208_v62, %v4196_v4  ;;  %v4206_v37 = vmul.f32 %v4205_v56, %v3995_v44 }
 0x9c7   : > { %v6581_v55 = vpop.f32.mrf.mxu0 }
 0x9c8   : > { %v4214_v5 = vadd.f32 %v4206_v37, %v4194_v54  ;;  %v4209_v35 = vmul.f32 %v6581_v55, %v4205_v56 }
 0x9c9   : > { %v3998_v53 = vpop.f32.mrf.mxu0 }
 0x9ca   : > { %v4217_v14 = vadd.f32 %v4209_v35, %v4197_v34  ;;  %v4207_v2 = vmul.f32 %v4205_v56, %v3998_v53  ;;  %v4245_v34 = vrot.slane %v7312_v46, %v9247_v58  ;;  %v7313_v53 = vld [vmem:[%s9779_s12 + $0x1c0] sm:$0xff] }
 0x9cb   : > { %v6584_v25 = vpop.f32.mrf.mxu0 }
 0x9cc   : > { %v4215_v36 = vadd.f32 %v4207_v2, %v4195_v30  ;;  %v4212_v24 = vmul.f32 %v6584_v25, %v4205_v56 }
 0x9cd   : > { %v4011_v32 = vpop.f32.mrf.mxu0 }
 0x9ce   : > { %v4220_v9 = vadd.f32 %v4212_v24, %v4200_v38  ;;  %v4210_v40 = vmul.f32 %v4205_v56, %v4011_v32 }
 0x9cf   : > { %v6585_v45 = vpop.f32.mrf.mxu0 }
 0x9d0   : > { %v4218_v3 = vadd.f32 %v4210_v40, %v4198_v39  ;;  %v4213_v61 = vmul.f32 %v6585_v45, %v4205_v56 }
 0x9d1   : > { %v4014_v1 = vpop.f32.mrf.mxu0 }
 0x9d2   : > { %v4221_v41 = vadd.f32 %v4213_v61, %v4201_v11  ;;  %v4211_v49 = vmul.f32 %v4205_v56, %v4014_v1 }
 0x9d3   : > { %v6588_v17 = vpop.f32.mrf.mxu0 }
 0x9d4   : > { %v4219_v23 = vadd.f32 %v4211_v49, %v4199_v18  ;;  %v4228_v16 = vmul.f32 %v6588_v17, %v4225_v21 }
 0x9d5   : > { %v4027_v8 = vpop.f32.mrf.mxu0 }
 0x9d6   : > { %v4236_v12 = vadd.f32 %v4228_v16, %v4216_v0  ;;  %v4226_v7 = vmul.f32 %v4225_v21, %v4027_v8 }
 0x9d7   : > { %v6589_v42 = vpop.f32.mrf.mxu0 }
 0x9d8   : > { %v4234_v28 = vadd.f32 %v4226_v7, %v4214_v5  ;;  %v4229_v27 = vmul.f32 %v6589_v42, %v4225_v21 }
 0x9d9   : > { %v4030_v59 = vpop.f32.mrf.mxu0 }
 0x9da   : > { %v4237_v22 = vadd.f32 %v4229_v27, %v4217_v14  ;;  %v4227_v13 = vmul.f32 %v4225_v21, %v4030_v59  ;;  %v4265_v14 = vrot.slane %v7313_v53, %v9247_v58  ;;  %v6903_v53 = vld [vmem:[%s9781_s14 + $0x40] ss:$8 sps:$4 sm:$0xff]  }
 0x9db   : > { %v6592_v52 = vpop.f32.mrf.mxu0 }
 0x9dc   : > { %v4235_v31 = vadd.f32 %v4227_v13, %v4215_v36  ;;  %v4232_v4 = vmul.f32 %v6592_v52, %v4225_v21 }
 0x9dd   : > { %v4043_v26 = vpop.f32.mrf.mxu0 }
 0x9de   : > { %v4240_v60 = vadd.f32 %v4232_v4, %v4220_v9  ;;  %v4230_v54 = vmul.f32 %v4225_v21, %v4043_v26  ;;  %v6876_v4 = vld [vmem:[%s9780_s13] sm:$0xff]   ;;  %v6894_v26 = vld [vmem:[%s9781_s14 + $0x70] ss:$8 sps:$4 sm:$0xff]  }
 0x9df   : > { %v6593_v48 = vpop.f32.mrf.mxu0  ;;  %6614 = vmatprep.mubr.msk.bf16.mxu1 %vm783_vm1, %v6876_v4  ;;  %v6915_v4 = vld [vmem:[%s9781_s14] ss:$8 sps:$4 sm:$0xff]  }
 0x9e0   : > { %v4238_v15 = vadd.f32 %v4230_v54, %v4218_v3  ;;  %v4233_v57 = vmul.f32 %v6593_v48, %v4225_v21 }
 0x9e1   : > { %v4046_v30 = vpop.f32.mrf.mxu0 }
 0x9e2   : > { %v4241_v50 = vadd.f32 %v4233_v57, %v4221_v41  ;;  %v4231_v6 = vmul.f32 %v4225_v21, %v4046_v30  ;;  %v6877_v30 = vld [vmem:[%s9780_s13 + $0x8] sm:$0xff]  }
 0x9e3   : > { %v6596_v38 = vpop.f32.mrf.mxu0 }
 0x9e4   : > { %v4239_v43 = vadd.f32 %v4231_v6, %v4219_v23  ;;  %v4248_v51 = vmul.f32 %v6596_v38, %v4245_v34  ;;  %v6879_v6 = vld [vmem:[%s9780_s13 + $0x18] sm:$0xff]   ;;  %v6880_v38 = vld [vmem:[%s9780_s13 + $0x20] sm:$0xff]  }
 0x9e5   : > { %v4059_v19 = vpop.f32.mrf.mxu0 }
 0x9e6   : > { %v4256_v56 = vadd.f32 %v4248_v51, %v4236_v12  ;;  %v4246_v39 = vmul.f32 %v4245_v34, %v4059_v19  ;;  %v6882_v51 = vld [vmem:[%s9780_s13 + $0x30] sm:$0xff]   ;;  %v6883_v19 = vld [vmem:[%s9780_s13 + $0x38] sm:$0xff]  }
 0x9e7   : > { %v6597_v63 = vpop.f32.mrf.mxu0 }
 0x9e8   : > { %v4254_v47 = vadd.f32 %v4246_v39, %v4234_v28  ;;  %v4249_v11 = vmul.f32 %v6597_v63, %v4245_v34  ;;  %v6885_v39 = vld [vmem:[%s9780_s13 + $0x48] sm:$0xff]   ;;  %v6886_v63 = vld [vmem:[%s9780_s13 + $0x50] sm:$0xff]  }
 0x9e9   : > { %v4062_v20 = vpop.f32.mrf.mxu0 }
 0x9ea   : > { %v4257_v33 = vadd.f32 %v4249_v11, %v4237_v22  ;;  %v4247_v18 = vmul.f32 %v4245_v34, %v4062_v20  ;;  %v6888_v11 = vld [vmem:[%s9780_s13 + $0x60] sm:$0xff]   ;;  %v6889_v20 = vld [vmem:[%s9780_s13 + $0x68] sm:$0xff]  }
 0x9eb   : > { %v6600_v62 = vpop.f32.mrf.mxu0 }
 0x9ec   : > { %v4255_v44 = vadd.f32 %v4247_v18, %v4235_v31  ;;  %v4252_v0 = vmul.f32 %v6600_v62, %v4245_v34  ;;  %v6891_v18 = vld [vmem:[%s9780_s13 + $0x78] sm:$0xff]   ;;  %v6892_v62 = vld [vmem:[%s9780_s13 + $0x80] sm:$0xff]  }
 0x9ed   : > { %v4075_v37 = vpop.f32.mrf.mxu0 }
 0x9ee   : > { %v4260_v55 = vadd.f32 %v4252_v0, %v4240_v60  ;;  %v4250_v5 = vmul.f32 %v4245_v34, %v4075_v37  ;;  %v6896_v60 = vld [vmem:[%s9781_s14 + $0x74] ss:$8 sps:$4 sm:$0xff]   ;;  %v6899_v0 = vld [vmem:[%s9781_s14 + $0x64] ss:$8 sps:$4 sm:$0xff]   ;;  %v6897_v37 = vld [vmem:[%s9781_s14 + $0x60] ss:$8 sps:$4 sm:$0xff]  }
 0x9ef   : > { %v6601_v35 = vpop.f32.mrf.mxu0  ;;  %4762 = vmatprep.subr.bf16.mxu0 %v6896_v60  ;;  %v6920_v60 = vld [vmem:[%s9781_s14 + $0xb4] ss:$8 sps:$4 sm:$0xff]  }
 0x9f0   : > { %v4258_v2 = vadd.f32 %v4250_v5, %v4238_v15  ;;  %v4253_v25 = vmul.f32 %v6601_v35, %v4245_v34  ;;  %4763 = vmatpush1.bf16.msra.mxu0 %v6894_v26  ;;  %v6902_v5 = vld [vmem:[%s9781_s14 + $0x54] ss:$8 sps:$4 sm:$0xff]   ;;  %v6905_v35 = vld [vmem:[%s9781_s14 + $0x44] ss:$8 sps:$4 sm:$0xff]  }
 0x9f1   : > { %v4078_v36 = vpop.f32.mrf.mxu0  ;;  %4764 = vmatprep.subr.bf16.mxu0 %v6899_v0  ;;  %v6971_v0 = vld [vmem:[%s9781_s14 + $0x194] ss:$8 sps:$4 sm:$0xff]  }
 0x9f2   : > { %v4261_v24 = vadd.f32 %v4253_v25, %v4241_v50  ;;  %v4251_v32 = vmul.f32 %v4245_v34, %v4078_v36  ;;  %v6878_v50 = vld [vmem:[%s9780_s13 + $0x10] sm:$0xff]   ;;  %v6941_v36 = vld [vmem:[%s9781_s14 + $0x124] ss:$8 sps:$4 sm:$0xff]  }
 0x9f3   : > { %v6604_v9 = vpop.f32.mrf.mxu0  ;;  %v6933_v25 = vld [vmem:[%s9781_s14 + $0x130] ss:$8 sps:$4 sm:$0xff]  }
 0x9f4   : > { %v4259_v40 = vadd.f32 %v4251_v32, %v4239_v43  ;;  %v4268_v45 = vmul.f32 %v6604_v9, %v4265_v14  ;;  %v6881_v43 = vld [vmem:[%s9780_s13 + $0x28] sm:$0xff]   ;;  %4765 = vmatpush1.bf16.msra.mxu0 %v6897_v37  ;;  %v6947_v32 = vld [vmem:[%s9781_s14 + $0x114] ss:$8 sps:$4 sm:$0xff]   ;;  %v6945_v9 = vld [vmem:[%s9781_s14 + $0x110] ss:$8 sps:$4 sm:$0xff]  }
 0x9f5   : > { %v4091_v29 = vpop.f32.mrf.mxu0  ;;  %4766 = vmatprep.subr.bf16.mxu0 %v6902_v5 }
 0x9f6   : > { %v4276_v21 = vadd.f32 %v4268_v45, %v4256_v56  ;;  %v4266_v3 = vmul.f32 %v4265_v14, %v4091_v29  ;;  %v6884_v56 = vld [vmem:[%s9780_s13 + $0x40] sm:$0xff]   ;;  %v6959_v29 = vld [vmem:[%s9781_s14 + $0x1b4] ss:$8 sps:$4 sm:$0xff]  }
 0x9f7   : > { %v6605_v61 = vpop.f32.mrf.mxu0  ;;  %v6951_v45 = vld [vmem:[%s9781_s14 + $0x100] ss:$8 sps:$4 sm:$0xff]  }
 0x9f8   : > { %v4274_v1 = vadd.f32 %v4266_v3, %v4254_v47  ;;  %v4269_v41 = vmul.f32 %v6605_v61, %v4265_v14  ;;  %v6887_v47 = vld [vmem:[%s9780_s13 + $0x58] sm:$0xff]  }
 0x9f9   : > { %v4094_v49 = vpop.f32.mrf.mxu0 }
 0x9fa   : > { %v4277_v17 = vadd.f32 %v4269_v41, %v4257_v33  ;;  %v4267_v23 = vmul.f32 %v4265_v14, %v4094_v49  ;;  %4282 = vxpose.xlu0.b32.start [1/8] (short) (narrow) %v4274_v1, 32  ;;  %v6890_v33 = vld [vmem:[%s9780_s13 + $0x70] sm:$0xff]  }
 0x9fb   : > { %v6608_v16 = vpop.f32.mrf.mxu0 }
 0x9fc   : > { %v4275_v58 = vadd.f32 %v4267_v23, %v4255_v44  ;;  %v4272_v8 = vmul.f32 %v6608_v16, %v4265_v14  ;;  %v6893_v44 = vld [vmem:[%s9780_s13 + $0x88] sm:$0xff]   ;;  %v6906_v16 = vld [vmem:[%s9781_s14 + $0x30] ss:$8 sps:$4 sm:$0xff]  }
 0x9fd   : > { %v4107_v12 = vpop.f32.mrf.mxu0 }
 0x9fe   : > { %v4280_v7 = vadd.f32 %v4272_v8, %v4260_v55  ;;  %v4270_v42 = vmul.f32 %v4265_v14, %v4107_v12  ;;  %4283 = vxpose.xlu0.b32.cont [2/8] (short) (narrow) %v4275_v58, 32  ;;  %v6900_v55 = vld [vmem:[%s9781_s14 + $0x50] ss:$8 sps:$4 sm:$0xff]   ;;  %v6911_v8 = vld [vmem:[%s9781_s14 + $0x24] ss:$8 sps:$4 sm:$0xff]  }
 0x9ff   : > { %v6609_v28 = vpop.f32.mrf.mxu0  ;;  %4767 = vmatpush1.bf16.msra.mxu0 %v6900_v55  ;;  %v6930_v55 = vld [vmem:[%s9781_s14 + $0xf0] ss:$8 sps:$4 sm:$0xff]  }
 0xa00   : > { %v4278_v27 = vadd.f32 %v4270_v42, %v4258_v2  ;;  %v4273_v59 = vmul.f32 %v6609_v28, %v4265_v14  ;;  %4768 = vmatprep.subr.bf16.mxu0 %v6905_v35  ;;  %v6935_v2 = vld [vmem:[%s9781_s14 + $0x134] ss:$8 sps:$4 sm:$0xff]  }
 0xa01   : > { %v4110_v22 = vpop.f32.mrf.mxu0  ;;  %v6914_v28 = vld [vmem:[%s9781_s14 + $0x14] ss:$8 sps:$4 sm:$0xff]  }
 0xa02   : > { %v4281_v13 = vadd.f32 %v4273_v59, %v4261_v24  ;;  %v4271_v52 = vmul.f32 %v4265_v14, %v4110_v22  ;;  %4284 = vxpose.xlu0.b32.cont [3/8] (short) (narrow) %v4276_v21, 32  ;;  %v6908_v14 = vld [vmem:[%s9781_s14 + $0x34] ss:$8 sps:$4 sm:$0xff]   ;;  %v6939_v24 = vld [vmem:[%s9781_s14 + $0x120] ss:$8 sps:$4 sm:$0xff]  }
 0xa03   : > { %4769 = vmatpush1.bf16.msra.mxu0 %v6903_v53  ;;  %v6912_v59 = vld [vmem:[%s9781_s14 + $0x10] ss:$8 sps:$4 sm:$0xff]   ;;  %v6938_v53 = vld [vmem:[%s9781_s14 + $0xe4] ss:$8 sps:$4 sm:$0xff]  }
 0xa04   : > { %v4279_v31 = vadd.f32 %v4271_v52, %v4259_v40  ;;  %4861 = vmatprep.subr.bf16.mxu0 %v6908_v14  ;;  %v6953_v40 = vld [vmem:[%s9781_s14 + $0x104] ss:$8 sps:$4 sm:$0xff]   ;;  %v6969_v14 = vld [vmem:[%s9781_s14 + $0x190] ss:$8 sps:$4 sm:$0xff]  }
 0xa05   : > { %v6917_v52 = vld [vmem:[%s9781_s14 + $0x4] ss:$8 sps:$4 sm:$0xff]  }
 0xa06   : > { %4285 = vxpose.xlu0.b32.cont [4/8] (short) (narrow) %v4277_v17, 32 }
 0xa0a   : > { %4286 = vxpose.xlu0.b32.cont [5/8] (short) (narrow) %v4278_v27, 32 }
 0xa0e   : > { %4287 = vxpose.xlu0.b32.cont [6/8] (short) (narrow) %v4279_v31, 32 }
 0xa12   : > { %4288 = vxpose.xlu0.b32.cont [7/8] (short) (narrow) %v4280_v7, 32  ;;  %v6909_v7 = vld [vmem:[%s9781_s14 + $0x20] ss:$8 sps:$4 sm:$0xff]  }
 0xa16   : > { %4289 = vxpose.xlu0.b32.end [8/8] (short) (narrow) %v4281_v13, 32 }
 0xa76   : > { %v4298_v54 = vpop.trf.xlu0 }
 0xa7a   : > { %v4299_v48 = vpop.trf.xlu0 }
 0xa7b   : > { %v4350_v57 = vpack.c.bf16 %v4299_v48, %v4298_v54  ;;  %v6918_v48 = vld [vmem:[%s9781_s14 + $0xb0] ss:$8 sps:$4 sm:$0xff]  }
 0xa7e   : > { %v4300_v46 = vpop.trf.xlu0 }
 0xa82   : > { %v4301_v34 = vpop.trf.xlu0 }
 0xa83   : > { %v4351_v15 = vpack.c.bf16 %v4301_v34, %v4300_v46 }
 0xa85   : > { %6610 = vmatprep.subr.bf16.mxu1 %v4351_v15 }
 0xa86   : > { %6611 = vmatpush3.bf16.msra.mxu1 %v4351_v15  ;;  %v6923_v15 = vld [vmem:[%s9781_s14 + $0xa4] ss:$8 sps:$4 sm:$0xff]  }
 0xa87   : > { %6612 = vmatprep.subr.bf16.mxu1 %v4350_v57 }
 0xa8a   : > { %6613 = vmatpush3.bf16.msra.mxu1 %v4350_v57 }
 0xa8b   : > { %5201 = vmatprep.subr.bf16.mxu1 %v6935_v2 }
 0xa8d   : > { %6615 = vmatmul.mubr.msk.bf16.vlgmr.msra.gmra.mxu1 %vm783_vm1, %v6877_v30  ;;  %v6921_v30 = vld [vmem:[%s9781_s14 + $0xa0] ss:$8 sps:$4 sm:$0xff]  }
 0xa8e   : > { %6618 = vmatprep.mubr.msk.bf16.mxu1 %vm783_vm1, %v6878_v50  ;;  %5202 = vmatpush1.bf16.msra.mxu1 %v6933_v25  ;;  %v6977_v25 = vld [vmem:[%s9781_s14 + $0x184] ss:$8 sps:$4 sm:$0xff]  }
 0xa8f   : > { %5203 = vmatprep.subr.bf16.mxu1 %v6941_v36  ;;  %v6936_v36 = vld [vmem:[%s9781_s14 + $0xe0] ss:$8 sps:$4 sm:$0xff]  }
 0xa92   : > { %5204 = vmatpush1.bf16.msra.mxu1 %v6939_v24 }
 0xa93   : > { %5205 = vmatprep.subr.bf16.mxu1 %v6947_v32  ;;  %v6944_v32 = vld [vmem:[%s9781_s14 + $0xd4] ss:$8 sps:$4 sm:$0xff]  }
 0xa95   : > { %6619 = vmatmul.mubr.msk.bf16.gmra.mxu1 %vm783_vm1, %v6879_v6  ;;  %v6926_v6 = vld [vmem:[%s9781_s14 + $0x94] ss:$8 sps:$4 sm:$0xff]  }
 0xa96   : > { %6622 = vmatprep.mubr.msk.bf16.mxu1 %vm783_vm1, %v6880_v38  ;;  %5206 = vmatpush1.bf16.msra.mxu1 %v6945_v9  ;;  %v6975_v9 = vld [vmem:[%s9781_s14 + $0x180] ss:$8 sps:$4 sm:$0xff]  }
 0xa97   : > { %5207 = vmatprep.subr.bf16.mxu1 %v6953_v40 }
 0xa9a   : > { %5208 = vmatpush1.bf16.msra.mxu1 %v6951_v45  ;;  %v6983_v45 = vld [vmem:[%s9781_s14 + $0x234] ss:$8 sps:$4 sm:$0xff]  }
 0xa9b   : > { %5433 = vmatprep.subr.bf16.mxu1 %v6959_v29  ;;  %v6942_v29 = vld [vmem:[%s9781_s14 + $0xd0] ss:$8 sps:$4 sm:$0xff]  }
 0xa9d   : > { %6623 = vmatmul.mubr.msk.bf16.gmra.mxu1 %vm783_vm1, %v6881_v43  ;;  %v6924_v43 = vld [vmem:[%s9781_s14 + $0x90] ss:$8 sps:$4 sm:$0xff]  }
 0xa9e   : > { %6626 = vmatprep.mubr.msk.bf16.mxu1 %vm783_vm1, %v6882_v51 }
 0xaa5   : > { %6627 = vmatmul.mubr.msk.bf16.gmra.mxu1 %vm783_vm1, %v6883_v19 }
 0xaa6   : > { %6630 = vmatprep.mubr.msk.bf16.mxu1 %vm783_vm1, %v6884_v56  ;;  %v6929_v56 = vld [vmem:[%s9781_s14 + $0x84] ss:$8 sps:$4 sm:$0xff]  }
 0xaad   : > { %6631 = vmatmul.mubr.msk.bf16.gmra.mxu1 %vm783_vm1, %v6885_v39 }
 0xaae   : > { %6634 = vmatprep.mubr.msk.bf16.mxu1 %vm783_vm1, %v6886_v63  ;;  %v6957_v63 = vld [vmem:[%s9781_s14 + $0x1b0] ss:$8 sps:$4 sm:$0xff]  }
 0xab5   : > { %6635 = vmatmul.mubr.msk.bf16.gmra.mxu1 %vm783_vm1, %v6887_v47 }
 0xab6   : > { %6638 = vmatprep.mubr.msk.bf16.mxu1 %vm783_vm1, %v6888_v11  ;;  %v6965_v11 = vld [vmem:[%s9781_s14 + $0x1a4] ss:$8 sps:$4 sm:$0xff]  }
 0xabd   : > { %6639 = vmatmul.mubr.msk.bf16.gmra.mxu1 %vm783_vm1, %v6889_v20  ;;  %v6927_v20 = vld [vmem:[%s9781_s14 + $0x80] ss:$8 sps:$4 sm:$0xff]  }
 0xabe   : > { %6642 = vmatprep.mubr.msk.bf16.mxu1 %vm783_vm1, %v6890_v33 }
 0xac5   : > { %6643 = vmatmul.mubr.msk.bf16.gmra.mxu1 %vm783_vm1, %v6891_v18  ;;  %v6932_v18 = vld [vmem:[%s9781_s14 + $0xf4] ss:$8 sps:$4 sm:$0xff]  }
 0xac6   : > { %6646 = vmatprep.mubr.msk.bf16.mxu1 %vm783_vm1, %v6892_v62  ;;  %v6963_v62 = vld [vmem:[%s9781_s14 + $0x1a0] ss:$8 sps:$4 sm:$0xff]  }
 0xacd   : > { %6647 = vmatmul.mubr.msk.bf16.gmra.mxu1 %vm783_vm1, %v6893_v44 }
 0xace   : > { %5225 = vmatprep.mubr.bf16.mxu1 %v9910_v10 }
 0xb4d   : > { %v6616_v21 = vpop.f32.mrf.mxu1 }
 0xb4f   : > { %v4530_v3 = vpop.f32.mrf.mxu1 }
 0xb51   : > { %v6617_v61 = vpop.f32.mrf.mxu1 }
 0xb52   : > { %v4674_v19 = vpack.c.bf16 %v6617_v61, %v6616_v21  ;;  %v6950_v61 = vld [vmem:[%s9781_s14 + $0xc4] ss:$8 sps:$4 sm:$0xff]  }
 0xb53   : > { %v4533_v1 = vpop.f32.mrf.mxu1 }
 0xb54   : > { %v4673_v34 = vpack.c.bf16 %v4533_v1, %v4530_v3 }
 0xb55   : > { %v6620_v41 = vpop.f32.mrf.mxu1 }
 0xb57   : > { %v4546_v49 = vpop.f32.mrf.mxu1 }
 0xb59   : > { %v6621_v17 = vpop.f32.mrf.mxu1 }
 0xb5a   : > { %v4676_v13 = vpack.c.bf16 %v6621_v17, %v6620_v41  ;;  %v6989_v17 = vld [vmem:[%s9781_s14 + $0x224] ss:$8 sps:$4 sm:$0xff]  }
 0xb5b   : > { %v4549_v23 = vpop.f32.mrf.mxu1 }
 0xb5c   : > { %v4675_v58 = vpack.c.bf16 %v4549_v23, %v4546_v49  ;;  %v6981_v49 = vld [vmem:[%s9781_s14 + $0x230] ss:$8 sps:$4 sm:$0xff]   ;;  %v6948_v23 = vld [vmem:[%s9781_s14 + $0xc0] ss:$8 sps:$4 sm:$0xff]  }
 0xb5d   : > { %v9414_v12 = vpop.f32.mrf.mxu1 }
 0xb5e   : > { %6109 = vmatmul.mubr.msk.bf16.vlgmr.msra.gmra.mxu0 %vm564_vm0, %v4675_v58  ;;  %v6956_v58 = vld [vmem:[%s9781_s14 + $0x174] ss:$8 sps:$4 sm:$0xff]  }
 0xb5f   : > { %4862 = vmatpush1.bf16.msra.mxu0 %v6906_v16  ;;  %4796 = vmatprep.mubr.bf16.mxu0 %v9910_v10  ;;  %v9421_v42 = vpop.f32.mrf.mxu1 }
 0xb60   : > { %4863 = vmatprep.subr.bf16.mxu0 %v6911_v8 }
 0xb61   : > { %v9426_v27 = vpop.f32.mrf.mxu1 }
 0xb62   : > { %v4678_v3 = vpack.c.bf16 %v9426_v27, %v9414_v12  ;;  %v6987_v12 = vld [vmem:[%s9781_s14 + $0x220] ss:$8 sps:$4 sm:$0xff]  }
 0xb63   : > { %4864 = vmatpush1.bf16.msra.mxu0 %v6909_v7  ;;  %v9431_v22 = vpop.f32.mrf.mxu1  ;;  %v6995_v7 = vld [vmem:[%s9781_s14 + $0x214] ss:$8 sps:$4 sm:$0xff]  }
 0xb64   : > { %4865 = vmatprep.subr.bf16.mxu0 %v6914_v28  ;;  %v4677_v35 = vpack.c.bf16 %v9431_v22, %v9421_v42  ;;  %v6954_v42 = vld [vmem:[%s9781_s14 + $0x170] ss:$8 sps:$4 sm:$0xff]  }
 0xb65   : > { %v9436_v31 = vpop.f32.mrf.mxu1 }
 0xb66   : > { %6110 = vmatmul.mubr.msk.bf16.gmra.mxu0 %vm564_vm0, %v4676_v13 }
 0xb67   : > { %4866 = vmatpush1.bf16.msra.mxu0 %v6912_v59  ;;  %4885 = vmatprep.mubr.bf16.mxu0 %v9910_v10  ;;  %v9443_v26 = vpop.f32.mrf.mxu1  ;;  %v6962_v59 = vld [vmem:[%s9781_s14 + $0x164] ss:$8 sps:$4 sm:$0xff]  }
 0xb68   : > { %4867 = vmatprep.subr.bf16.mxu0 %v6917_v52  ;;  %v6993_v52 = vld [vmem:[%s9781_s14 + $0x210] ss:$8 sps:$4 sm:$0xff]  }
 0xb69   : > { %v9448_v54 = vpop.f32.mrf.mxu1 }
 0xb6b   : > { %4868 = vmatpush1.bf16.msra.mxu0 %v6915_v4  ;;  %v9453_v46 = vpop.f32.mrf.mxu1  ;;  %v7001_v4 = vld [vmem:[%s9781_s14 + $0x204] ss:$8 sps:$4 sm:$0xff]  }
 0xb6c   : > { %4969 = vmatprep.subr.bf16.mxu0 %v6920_v60  ;;  %v4679_v27 = vpack.c.bf16 %v9453_v46, %v9443_v26  ;;  %v6960_v26 = vld [vmem:[%s9781_s14 + $0x160] ss:$8 sps:$4 sm:$0xff]  }
 0xb6d   : > { %v6632_v57 = vpop.f32.mrf.mxu1 }
 0xb6e   : > { %6119 = vmatmul.mubr.msk.bf16.vlgmr.msra.gmra.mxu0 %vm564_vm0, %v4673_v34  ;;  %v6999_v34 = vld [vmem:[%s9781_s14 + $0x200] ss:$8 sps:$4 sm:$0xff]  }
 0xb6f   : > { %4970 = vmatpush1.bf16.msra.mxu0 %v6918_v48  ;;  %4895 = vmatprep.mubr.bf16.mxu0 %v9910_v10  ;;  %v4594_v50 = vpop.f32.mrf.mxu1  ;;  %v6968_v48 = vld [vmem:[%s9781_s14 + $0x154] ss:$8 sps:$4 sm:$0xff]  }
 0xb70   : > { %4971 = vmatprep.subr.bf16.mxu0 %v6923_v15  ;;  %v6966_v15 = vld [vmem:[%s9781_s14 + $0x150] ss:$8 sps:$4 sm:$0xff]  }
 0xb71   : > { %v6633_v38 = vpop.f32.mrf.mxu1 }
 0xb72   : > { %v4682_v37 = vpack.c.bf16 %v6633_v38, %v6632_v57  ;;  %v6972_v38 = vld [vmem:[%s9781_s14 + $0x140] ss:$8 sps:$4 sm:$0xff]  }
 0xb73   : > { %4972 = vmatpush1.bf16.msra.mxu0 %v6921_v30  ;;  %v4597_v51 = vpop.f32.mrf.mxu1  ;;  %v4680_v30 = vpack.c.bf16 %v9448_v54, %v9436_v31  ;;  %v6980_v31 = vld [vmem:[%s9781_s14 + $0x1f4] ss:$8 sps:$4 sm:$0xff]   ;;  %v6978_v54 = vld [vmem:[%s9781_s14 + $0x1f0] ss:$8 sps:$4 sm:$0xff]  }
 0xb74   : > { %4973 = vmatprep.subr.bf16.mxu0 %v6926_v6  ;;  %v4681_v39 = vpack.c.bf16 %v4597_v51, %v4594_v50  ;;  %v6974_v50 = vld [vmem:[%s9781_s14 + $0x144] ss:$8 sps:$4 sm:$0xff]  }
 0xb75   : > { %v9475_v47 = vpop.f32.mrf.mxu1  ;;  %v6986_v51 = vld [vmem:[%s9781_s14 + $0x1e4] ss:$8 sps:$4 sm:$0xff]  }
 0xb76   : > { %6120 = vmatmul.mubr.msk.bf16.gmra.mxu0 %vm564_vm0, %v4674_v19  ;;  %6173 = vmatmul.mubr.msk.bf16.vlgmr.msra.gmra.mxu1 %vm564_vm0, %v4681_v39  ;;  %v6992_v39 = vld [vmem:[%s9781_s14 + $0x1d4] ss:$8 sps:$4 sm:$0xff]  }
 0xb77   : > { %4974 = vmatpush1.bf16.msra.mxu0 %v6924_v43  ;;  %4993 = vmatprep.mubr.bf16.mxu0 %v9910_v10  ;;  %v9486_v33 = vpop.f32.mrf.mxu1 }
 0xb78   : > { %4975 = vmatprep.subr.bf16.mxu0 %v6929_v56  ;;  %5434 = vmatpush1.bf16.msra.mxu1 %v6957_v63  ;;  %v6984_v56 = vld [vmem:[%s9781_s14 + $0x1e0] ss:$8 sps:$4 sm:$0xff]   ;;  %v6990_v63 = vld [vmem:[%s9781_s14 + $0x1d0] ss:$8 sps:$4 sm:$0xff]  }
 0xb79   : > { %v9494_v44 = vpop.f32.mrf.mxu1  ;;  %5435 = vmatprep.subr.bf16.mxu1 %v6965_v11  ;;  %5235 = vmatprep.mubr.bf16.mxu1 %v9910_v10 }
 0xb7a   : > { %v4684_v11 = vpack.c.bf16 %v9494_v44, %v9475_v47 }
 0xb7b   : > { %4976 = vmatpush1.bf16.msra.mxu0 %v6927_v20  ;;  %v9503_v5 = vpop.f32.mrf.mxu1  ;;  %v6998_v20 = vld [vmem:[%s9781_s14 + $0x1c4] ss:$8 sps:$4 sm:$0xff]  }
 0xb7c   : > { %5085 = vmatprep.subr.bf16.mxu0 %v6932_v18  ;;  %5436 = vmatpush1.bf16.msra.mxu1 %v6963_v62  ;;  %v4683_v43 = vpack.c.bf16 %v9503_v5, %v9486_v33  ;;  %v6996_v33 = vld [vmem:[%s9781_s14 + $0x1c0] ss:$8 sps:$4 sm:$0xff]  }
 0xb7d   : > { %v9513_v2 = vpop.f32.mrf.mxu1  ;;  %5437 = vmatprep.subr.bf16.mxu1 %v6971_v0 }
 0xb7e   : > { %6137 = vmatmul.mubr.msk.bf16.vlgmr.msra.gmra.mxu0 %vm564_vm0, %v4677_v35  ;;  %6174 = vmatmul.mubr.msk.bf16.gmra.mxu1 %vm564_vm0, %v4682_v37 }
 0xb7f   : > { %5086 = vmatpush1.bf16.msra.mxu0 %v6930_v55  ;;  %5003 = vmatprep.mubr.bf16.mxu0 %v9910_v10  ;;  %v4626_v24 = vpop.f32.mrf.mxu1 }
 0xb80   : > { %5087 = vmatprep.subr.bf16.mxu0 %v6938_v53  ;;  %5438 = vmatpush1.bf16.msra.mxu1 %v6969_v14 }
 0xb81   : > { %v6641_v40 = vpop.f32.mrf.mxu1  ;;  %5439 = vmatprep.subr.bf16.mxu1 %v6977_v25  ;;  %5457 = vmatprep.mubr.bf16.mxu1 %v9910_v10 }
 0xb82   : > { %v4686_v22 = vpack.c.bf16 %v6641_v40, %v9513_v2 }
 0xb83   : > { %5088 = vmatpush1.bf16.msra.mxu0 %v6936_v36  ;;  %v4629_v21 = vpop.f32.mrf.mxu1 }
 0xb84   : > { %5089 = vmatprep.subr.bf16.mxu0 %v6944_v32  ;;  %v4685_v1 = vpack.c.bf16 %v4629_v21, %v4626_v24  ;;  %5440 = vmatpush1.bf16.msra.mxu1 %v6975_v9 }
 0xb85   : > { %v9542_v41 = vpop.f32.mrf.mxu1  ;;  %5665 = vmatprep.subr.bf16.mxu1 %v6983_v45 }
 0xb86   : > { %6138 = vmatmul.mubr.msk.bf16.gmra.mxu0 %vm564_vm0, %v4678_v3 }
 0xb87   : > { %5090 = vmatpush1.bf16.msra.mxu0 %v6942_v29  ;;  %5109 = vmatprep.mubr.bf16.mxu0 %v9910_v10  ;;  %v9555_v16 = vpop.f32.mrf.mxu1 }
 0xb88   : > { %5091 = vmatprep.subr.bf16.mxu0 %v6950_v61  ;;  %6209 = vmatmul.mubr.msk.bf16.vlgmr.msra.gmra.mxu1 %vm564_vm0, %v4685_v1 }
 0xb89   : > { %5666 = vmatpush1.bf16.msra.mxu1 %v6981_v49  ;;  %v9561_v8 = vpop.f32.mrf.mxu1  ;;  %5467 = vmatprep.mubr.bf16.mxu1 %v9910_v10 }
 0xb8a   : > { %5667 = vmatprep.subr.bf16.mxu1 %v6989_v17  ;;  %v4688_v47 = vpack.c.bf16 %v9561_v8, %v9542_v41 }
 0xb8b   : > { %5092 = vmatpush1.bf16.msra.mxu0 %v6948_v23  ;;  %v9573_v28 = vpop.f32.mrf.mxu1 }
 0xb8c   : > { %5317 = vmatprep.subr.bf16.mxu0 %v6956_v58  ;;  %v4687_v18 = vpack.c.bf16 %v9573_v28, %v9555_v16 }
 0xb8d   : > { %5668 = vmatpush1.bf16.msra.mxu1 %v6987_v12  ;;  %v6648_v13 = vpop.f32.mrf.mxu1 }
 0xb8e   : > { %6155 = vmatmul.mubr.msk.bf16.vlgmr.msra.gmra.mxu0 %vm564_vm0, %v4679_v27  ;;  %5669 = vmatprep.subr.bf16.mxu1 %v6995_v7 }
 0xb8f   : > { %5318 = vmatpush1.bf16.msra.mxu0 %v6954_v42  ;;  %5119 = vmatprep.mubr.bf16.mxu0 %v9910_v10  ;;  %v4658_v60 = vpop.f32.mrf.mxu1 }
 0xb90   : > { %5319 = vmatprep.subr.bf16.mxu0 %v6962_v59  ;;  %6210 = vmatmul.mubr.msk.bf16.gmra.mxu1 %vm564_vm0, %v4686_v22 }
 0xb91   : > { %5670 = vmatpush1.bf16.msra.mxu1 %v6993_v52  ;;  %v6649_v46 = vpop.f32.mrf.mxu1  ;;  %5689 = vmatprep.mubr.bf16.mxu1 %v9910_v10 }
 0xb92   : > { %5671 = vmatprep.subr.bf16.mxu1 %v7001_v4  ;;  %v4690_v19 = vpack.c.bf16 %v6649_v46, %v6648_v13 }
 0xb93   : > { %5320 = vmatpush1.bf16.msra.mxu0 %v6960_v26  ;;  %v4661_v57 = vpop.f32.mrf.mxu1 }
 0xb94   : > { %5321 = vmatprep.subr.bf16.mxu0 %v6968_v48  ;;  %v4689_v6 = vpack.c.bf16 %v4661_v57, %v4658_v60 }
 0xb95   : > { %5672 = vmatpush1.bf16.msra.mxu1 %v6999_v34 }
 0xb96   : > { %6156 = vmatmul.mubr.msk.bf16.gmra.mxu0 %vm564_vm0, %v4680_v30 }
 0xb97   : > { %5322 = vmatpush1.bf16.msra.mxu0 %v6966_v15  ;;  %5341 = vmatprep.mubr.bf16.mxu0 %v9910_v10 }
 0xb98   : > { %5323 = vmatprep.subr.bf16.mxu0 %v6974_v50  ;;  %6245 = vmatmul.mubr.msk.bf16.vlgmr.msra.gmra.mxu1 %vm564_vm0, %v4689_v6 }
 0xb99   : > { %5699 = vmatprep.mubr.bf16.mxu1 %v9910_v10 }
 0xb9b   : > { %5324 = vmatpush1.bf16.msra.mxu0 %v6972_v38 }
 0xb9c   : > { %5549 = vmatprep.subr.bf16.mxu0 %v6980_v31 }
 0xb9e   : > { %6191 = vmatmul.mubr.msk.bf16.vlgmr.msra.gmra.mxu0 %vm564_vm0, %v4683_v43 }
 0xb9f   : > { %5550 = vmatpush1.bf16.msra.mxu0 %v6978_v54  ;;  %5351 = vmatprep.mubr.bf16.mxu0 %v9910_v10 }
 0xba0   : > { %5551 = vmatprep.subr.bf16.mxu0 %v6986_v51  ;;  %6246 = vmatmul.mubr.msk.bf16.gmra.mxu1 %vm564_vm0, %v4690_v19 }
 0xba3   : > { %5552 = vmatpush1.bf16.msra.mxu0 %v6984_v56 }
 0xba4   : > { %5553 = vmatprep.subr.bf16.mxu0 %v6992_v39 }
 0xba6   : > { %6192 = vmatmul.mubr.msk.bf16.gmra.mxu0 %vm564_vm0, %v4684_v11 }
 0xba7   : > { %5554 = vmatpush1.bf16.msra.mxu0 %v6990_v63  ;;  %5573 = vmatprep.mubr.bf16.mxu0 %v9910_v10 }
 0xba8   : > { %5555 = vmatprep.subr.bf16.mxu0 %v6998_v20 }
 0xbab   : > { %5556 = vmatpush1.bf16.msra.mxu0 %v6996_v33 }
 0xbae   : > { %6227 = vmatmul.mubr.msk.bf16.vlgmr.msra.gmra.mxu0 %vm564_vm0, %v4687_v18 }
 0xbaf   : > { %5583 = vmatprep.mubr.bf16.mxu0 %v9910_v10 }
 0xbb6   : > { %6228 = vmatmul.mubr.msk.bf16.gmra.mxu0 %vm564_vm0, %v4688_v47 }
 0xc1e   : > { %v4788_v62 = vpop.f32.mrf.mxu0 }
 0xc20   : > { %v4790_v44 = vpop.f32.mrf.mxu0 }
 0xc22   : > { %v4792_v0 = vpop.f32.mrf.mxu0 }
 0xc24   : > { %v4794_v37 = vpop.f32.mrf.mxu0 }
 0xc26   : > { %v4798_v55 = vpop.f32.mrf.mxu0 }
 0xc28   : > { %v9655_v5 = vpop.f32.mrf.mxu0 }
 0xc2a   : > { %v9657_v35 = vpop.f32.mrf.mxu0 }
 0xc2c   : > { %v9659_v53 = vpop.f32.mrf.mxu0 }
 0xc2e   : > { %v4887_v14 = vpop.f32.mrf.mxu0 }
 0xc2f   : > { %v4888_v6 = vadd.f32 %v4887_v14, %v4788_v62 }
 0xc30   : > { %v4889_v2 = vpop.f32.mrf.mxu0 }
 0xc31   : > { %v4890_v31 = vadd.f32 %v4889_v2, %v4790_v44 }
 0xc32   : > { %v4891_v25 = vpop.f32.mrf.mxu0 }
 0xc33   : > { %v4892_v19 = vadd.f32 %v4891_v25, %v4792_v0 }
 0xc34   : > { %v4893_v10 = vpop.f32.mrf.mxu0 }
 0xc35   : > { %v4894_v11 = vadd.f32 %v4893_v10, %v4794_v37 }
 0xc36   : > { %v4897_v36 = vpop.f32.mrf.mxu0  ;;  %v5227_v24 = vpop.f32.mrf.mxu1 }
 0xc38   : > { %v4899_v32 = vpop.f32.mrf.mxu0  ;;  %v5229_v9 = vpop.f32.mrf.mxu1 }
 0xc39   : > { %v4900_v62 = vadd.f32 %v4899_v32, %v9655_v5 }
 0xc3a   : > { %v4901_v40 = vpop.f32.mrf.mxu0  ;;  %v5231_v45 = vpop.f32.mrf.mxu1 }
 0xc3b   : > { %v4902_v25 = vadd.f32 %v4901_v40, %v9657_v35 }
 0xc3c   : > { %v9661_v29 = vpop.f32.mrf.mxu0  ;;  %v9663_v21 = vpop.f32.mrf.mxu1 }
 0xc3e   : > { %v4995_v3 = vpop.f32.mrf.mxu0  ;;  %v9665_v61 = vpop.f32.mrf.mxu1 }
 0xc3f   : > { %v5014_v54 = vadd.f32 %v4995_v3, %v4888_v6 }
 0xc40   : > { %v4997_v1 = vpop.f32.mrf.mxu0  ;;  %v9667_v41 = vpop.f32.mrf.mxu1 }
 0xc41   : > { %v5015_v56 = vadd.f32 %v4997_v1, %v4890_v31 }
 0xc42   : > { %v4999_v49 = vpop.f32.mrf.mxu0  ;;  %v9669_v17 = vpop.f32.mrf.mxu1 }
 0xc43   : > { %v5016_v20 = vadd.f32 %v4999_v49, %v4892_v19 }
 0xc44   : > { %v5001_v23 = vpop.f32.mrf.mxu0  ;;  %v9671_v16 = vpop.f32.mrf.mxu1 }
 0xc46   : > { %v5005_v58 = vpop.f32.mrf.mxu0 }
 0xc48   : > { %v5007_v8 = vpop.f32.mrf.mxu0  ;;  %v5459_v12 = vpop.f32.mrf.mxu1 }
 0xc49   : > { %v5019_v37 = vadd.f32 %v5007_v8, %v4900_v62 }
 0xc4a   : > { %v5009_v7 = vpop.f32.mrf.mxu0  ;;  %v9673_v42 = vpop.f32.mrf.mxu1 }
 0xc4c   : > { %v5011_v28 = vpop.f32.mrf.mxu0  ;;  %v9675_v27 = vpop.f32.mrf.mxu1 }
 0xc4e   : > { %v5111_v59 = vpop.f32.mrf.mxu0  ;;  %v9677_v22 = vpop.f32.mrf.mxu1 }
 0xc4f   : > { %v5130_v39 = vadd.f32 %v5111_v59, %v5014_v54 }
 0xc50   : > { %v5113_v13 = vpop.f32.mrf.mxu0  ;;  %v9679_v4 = vpop.f32.mrf.mxu1 }
 0xc51   : > { %9911 = vst [vmem:[#allocation21_spill] sm:$0xff] %v9679_v4  ;;  %v5131_v33 = vadd.f32 %v5113_v13, %v5015_v56  ;;  %v5246_v4 = vadd.f32 %v5227_v24, %v5130_v39  ;;  %v5020_v24 = vadd.f32 %v5009_v7, %v4902_v25 }
 0xc52   : > { %v5115_v52 = vpop.f32.mrf.mxu0  ;;  %v9681_v48 = vpop.f32.mrf.mxu1 }
 0xc53   : > { %9912 = vst [vmem:[#allocation19_spill] sm:$0xff] %v9681_v48  ;;  %v5017_v48 = vadd.f32 %v5001_v23, %v4894_v11  ;;  %v5247_v2 = vadd.f32 %v5229_v9, %v5131_v33 }
 0xc54   : > { %v5117_v26 = vpop.f32.mrf.mxu0  ;;  %v9683_v15 = vpop.f32.mrf.mxu1 }
 0xc55   : > { %9913 = vst [vmem:[#allocation20_spill] sm:$0xff] %v9683_v15  ;;  %v4898_v15 = vadd.f32 %v4897_v36, %v4798_v55  ;;  %v5133_v3 = vadd.f32 %v5117_v26, %v5017_v48  ;;  %v4904_v36 = vadd.f32 %v9661_v29, %v9659_v53 }
 0xc56   : > { %v5121_v60 = vpop.f32.mrf.mxu0  ;;  %v9685_v50 = vpop.f32.mrf.mxu1 }
 0xc57   : > { %9914 = vst [vmem:[#allocation18_spill] sm:$0xff] %v9685_v50  ;;  %v5132_v50 = vadd.f32 %v5115_v52, %v5016_v20  ;;  %v5018_v14 = vadd.f32 %v5005_v58, %v4898_v15  ;;  %v5249_v9 = vadd.f32 %v9663_v21, %v5133_v3  ;;  %v5021_v35 = vadd.f32 %v5011_v28, %v4904_v36 }
 0xc58   : > { %v5123_v46 = vpop.f32.mrf.mxu0  ;;  %v5691_v51 = vpop.f32.mrf.mxu1 }
 0xc59   : > { %v5248_v49 = vadd.f32 %v5231_v45, %v5132_v50  ;;  %v5134_v59 = vadd.f32 %v5121_v60, %v5018_v14  ;;  %v5135_v5 = vadd.f32 %v5123_v46, %v5019_v37 }
 0xc5a   : > { %v5125_v34 = vpop.f32.mrf.mxu0  ;;  %v5693_v47 = vpop.f32.mrf.mxu1  ;;  %v9916_v54 = vld [vmem:[#allocation19_spill] sm:$0xff] }
 0xc5b   : > { %v5136_v40 = vadd.f32 %v5125_v34, %v5020_v24  ;;  %v5250_v45 = vadd.f32 %v9665_v61, %v5134_v59  ;;  %v5251_v53 = vadd.f32 %v9667_v41, %v5135_v5 }
 0xc5c   : > { %v5127_v57 = vpop.f32.mrf.mxu0  ;;  %v5695_v1 = vpop.f32.mrf.mxu1  ;;  %v9917_v39 = vld [vmem:[#allocation20_spill] sm:$0xff] }
 0xc5d   : > { %v5137_v29 = vadd.f32 %v5127_v57, %v5021_v35  ;;  %v5252_v28 = vadd.f32 %v9669_v17, %v5136_v40 }
 0xc5e   : > { %v5343_v30 = vpop.f32.mrf.mxu0  ;;  %v5697_v13 = vpop.f32.mrf.mxu1 }
 0xc5f   : > { %v5362_v0 = vadd.f32 %v5343_v30, %v5246_v4  ;;  %v9915_v30 = vld [vmem:[#allocation21_spill] sm:$0xff] }
 0xc60   : > { %v5345_v38 = vpop.f32.mrf.mxu0  ;;  %v5701_v34 = vpop.f32.mrf.mxu1 }
 0xc61   : > { %v5363_v55 = vadd.f32 %v5345_v38, %v5247_v2  ;;  %v5478_v23 = vadd.f32 %v5459_v12, %v5362_v0 }
 0xc62   : > { %v5347_v43 = vpop.f32.mrf.mxu0  ;;  %v5703_v31 = vpop.f32.mrf.mxu1 }
 0xc63   : > { %v5364_v58 = vadd.f32 %v5347_v43, %v5248_v49  ;;  %v5479_v52 = vadd.f32 %v9673_v42, %v5363_v55 }
 0xc64   : > { %v5349_v63 = vpop.f32.mrf.mxu0 }
 0xc65   : > { %v5365_v4 = vadd.f32 %v5349_v63, %v5249_v9  ;;  %v5480_v21 = vadd.f32 %v9675_v27, %v5364_v58  ;;  %v5253_v27 = vadd.f32 %v9671_v16, %v5137_v29 }
 0xc66   : > { %v5353_v18 = vpop.f32.mrf.mxu0 }
 0xc67   : > { %v5366_v12 = vadd.f32 %v5353_v18, %v5250_v45  ;;  %v5481_v15 = vadd.f32 %v9677_v22, %v5365_v4  ;;  %v5705_v18 = vpop.f32.mrf.mxu1 }
 0xc68   : > { %v5355_v44 = vpop.f32.mrf.mxu0 }
 0xc69   : > { %v5367_v61 = vadd.f32 %v5355_v44, %v5251_v53  ;;  %v5482_v50 = vadd.f32 %v9915_v30, %v5366_v12  ;;  %v5707_v25 = vpop.f32.mrf.mxu1 }
 0xc6a   : > { %v5357_v10 = vpop.f32.mrf.mxu0 }
 0xc6b   : > { %v5368_v17 = vadd.f32 %v5357_v10, %v5252_v28  ;;  %v5483_v43 = vadd.f32 %v9916_v54, %v5367_v61 }
 0xc6c   : > { %v5359_v32 = vpop.f32.mrf.mxu0 }
 0xc6d   : > { %v5484_v63 = vadd.f32 %v9917_v39, %v5368_v17 }
 0xc6e   : > { %v5575_v8 = vpop.f32.mrf.mxu0 }
 0xc6f   : > { %v5594_v26 = vadd.f32 %v5575_v8, %v5478_v23 }
 0xc70   : > { %v5577_v7 = vpop.f32.mrf.mxu0 }
 0xc71   : > { %v5595_v60 = vadd.f32 %v5577_v7, %v5479_v52  ;;  %v5710_v48 = vadd.f32 %v5691_v51, %v5594_v26  ;;  %v5369_v51 = vadd.f32 %v5359_v32, %v5253_v27 }
 0xc72   : > { %v5579_v46 = vpop.f32.mrf.mxu0 }
 0xc73   : > { %5718 = vst [vmem:[%s9701_s15] sm:$0xff] %v5710_v48  ;;  %v5596_v41 = vadd.f32 %v5579_v46, %v5480_v21  ;;  %v5711_v42 = vadd.f32 %v5693_v47, %v5595_v60  ;;  %v9918_v47 = vld [vmem:[#allocation18_spill] sm:$0xff] }
 0xc74   : > { %v5581_v57 = vpop.f32.mrf.mxu0  ;;  %v5485_v62 = vadd.f32 %v9918_v47, %v5369_v51 }
 0xc75   : > { %5719 = vst [vmem:[%s9701_s15 + $0x8] sm:$0xff] %v5711_v42  ;;  %v5597_v6 = vadd.f32 %v5581_v57, %v5481_v15  ;;  %v5712_v38 = vadd.f32 %v5695_v1, %v5596_v41 }
 0xc76   : > { %v5585_v22 = vpop.f32.mrf.mxu0 }
 0xc77   : > { %5720 = vst [vmem:[%s9701_s15 + $0x10] sm:$0xff] %v5712_v38  ;;  %v5598_v19 = vadd.f32 %v5585_v22, %v5482_v50  ;;  %v5713_v16 = vadd.f32 %v5697_v13, %v5597_v6 }
 0xc78   : > { %v5587_v56 = vpop.f32.mrf.mxu0 }
 0xc79   : > { %5721 = vst [vmem:[%s9701_s15 + $0x18] sm:$0xff] %v5713_v16  ;;  %v5599_v11 = vadd.f32 %v5587_v56, %v5483_v43  ;;  %v5714_v20 = vadd.f32 %v5701_v34, %v5598_v19 }
 0xc7a   : > { %v5589_v33 = vpop.f32.mrf.mxu0 }
 0xc7b   : > { %5722 = vst [vmem:[%s9701_s15 + $0x20] sm:$0xff] %v5714_v20  ;;  %v5600_v44 = vadd.f32 %v5589_v33, %v5484_v63  ;;  %v5715_v14 = vadd.f32 %v5703_v31, %v5599_v11 }
 0xc7c   : > { %v5591_v2 = vpop.f32.mrf.mxu0 }
 0xc7d   : > { %5723 = vst [vmem:[%s9701_s15 + $0x28] sm:$0xff] %v5715_v14  ;;  %v5601_v3 = vadd.f32 %v5591_v2, %v5485_v62  ;;  %v5716_v0 = vadd.f32 %v5705_v18, %v5600_v44 }
 0xc7f   : > { %5724 = vst [vmem:[%s9701_s15 + $0x30] sm:$0xff] %v5716_v0  ;;  %v5717_v37 = vadd.f32 %v5707_v25, %v5601_v3 }
 0xc81   : > { %5725 = vst [vmem:[%s9701_s15 + $0x38] sm:$0xff] %v5717_v37 }
 0xc82   : > { %7327 = shalt.err (!%p7324_p3)
}
 0xc83   : > { %s7328_s23 = scalar_lea.hbm %s9719_s25, 1024  ;;  %s7332_s20 = scalar_lea.hbm %s9920_s29, 2048 }
 0xc84   : > { %p7329_p4 = scmp.ne.s32.totalorder %s9719_s25, %s7328_s23  ;;  %p7333_p9 = scmp.lt.s32.totalorder %s9719_s25, %s9920_s29 }
 0xc85   : > { %p7334_p10 = scmp.lt.s32.totalorder %s7332_s20, %s7328_s23 }
 0xc86   : > { %p7330_p7 = pnand %p7329_p4, %p7499_p5 }
 0xc87   : > { %p7335_p11 = por %p7334_p10, %p7333_p9 }
 0xc88   : > { %p7331_p8 = pneg %p7330_p7 }
 0xc8a   : > { %p7336_p12 = pnand %p7335_p11, %p7331_p8 }
 0xc8c   : > { %7339 = shalt.err (!%p7336_p12)
}
 0xc8d   : > { %s7379_s26 = smov 256   ;;  %s7380_s30 = smov 16  }
 0xc8e   : > { %6650 = dma.vmem_to_hbm [thread:$0]  (%p7499_p5), %s9721_s21, 1024, %s9719_s25, %s9727_s22, %s7379_s26, %s7379_s26, %s7380_s30  }
 0xc8f PF: > { %s9921_s16 = sld [smem:[#allocation7_spill]] }
 0xc90   : > { %s9922_s17 = sld [smem:[#allocation5_spill]] }
 0xc95   : > { %p6656_p13 = scmp.ge.s32.totalorder %s9921_s16, 2 }
 0xc96   : > { %s5755_s15 = sand.u32 1, %s9922_s17  }
 0xc97   : > { %p6653_p0 = pnand %p6656_p13, %p7503_p6  ;;  %s5756_s23 = scalar_lea.sflag [#allocation3], %s5755_s15 }
 0xc99   : > { %p6654_p1 = pneg %p6653_p0 }
 0xc9b   : > { %7357 = dma.done.wait (%p6654_p1), %s5756_s23, 1024  }
 0xc9c   : > { %7359 = vsyncadd (%p6654_p1), %s5756_s23, 4294966272  ;;  %s9924_s21 = sld [smem:[#allocation8_spill]]  ;;  %s9927_s18 = smov %s7366_s19 }
 0xc9d   : > { %s9925_s20 = sld [smem:[#allocation6_spill]] }
 0xc9e   : > { %s9926_s27 = sld [smem:[#allocation9_spill]] }
 0xca2   : > { %p25_p2 = scmp.ge.s32.totalorder %s9924_s21, 4  }
 0xca3   : > { %s9928_s19 = smov %s9925_s20 }
 0xca4   : > { %s9929_s20 = smov %s9926_s27  ;;  %27 = sbr.rel (!%p25_p2) target bundleno = 5 (0x5), region = 126 }
 0xca9   :  { %5761 = vsyncpa [#allocation3], 1 }
 0xcaa   :  { %5763 = vsyncpa [#allocation3 + $0x1], 1 }

</bundles_post_ra>
